<compile_context>
chip_gen: v6e
topology: v6e:2x2x1
jax: 0.10.0
libtpu: 0.0.40
codegen_flags: <defaults>
</compile_context>

<pallas_src>
import jax
import jax.numpy as jnp
from jax.experimental import pallas as pl
from jax.experimental.pallas import tpu as pltpu


_HID = 768        # BERT hidden size (fixed by the module)
_FC1_OUT = 256
_N_CLASSES = 2


def _tpu_generation():
    """Best-effort TPU generation sniff (7 / 6 / 5 / 0=unknown)."""
    try:
        kind = jax.devices()[0].device_kind.lower()
    except Exception:
        return 0
    if "v7" in kind or "tpu7" in kind or "7x" in kind:
        return 7
    if "v6" in kind:
        return 6
    if "v5" in kind:
        return 5
    return 0


def _fused_head_kernel(x_ref, w1_ref, b1_ref, w2t_ref, b2_ref, out_ref, acc_ref):
    """Single-TC path. Grid = (K // tk,): walk the fc1 reduction, full 256-wide output.

      x_ref  : (B_pad, tk)        f32  (cast to bf16 in-kernel for the MXU)
      w1_ref : (256, tk)          bf16 -- PyTorch (out, in) layout, tiled on K
      b1_ref : (1, 256)           f32
      w2t_ref: (256, 2)           f32
      b2_ref : (1, 2)             f32
      out_ref: (B_pad, 2)         f32  log-probabilities
      acc_ref: (B_pad, 256)       f32  accumulator scratch (resident across the K axis)
    """
    k = pl.program_id(0)

    @pl.when(k == 0)
    def _():
        acc_ref[...] = jnp.zeros_like(acc_ref)

    # (B_pad, tk) . (256, tk) contracted over tk -> (B_pad, 256).
    # bf16 operands, f32 accumulation on the MXU; no weight transpose needed.
    acc_ref[...] += jax.lax.dot_general(
        x_ref[...].astype(jnp.bfloat16), w1_ref[...],
        dimension_numbers=(((1,), (1,)), ((), ())),
        preferred_element_type=jnp.float32)

    @pl.when(k == pl.num_programs(0) - 1)
    def _():
        # nn.Dropout(0.2) in eval() mode is the identity.
        # TODO(synk): training-mode dropout (pltpu PRNG mask) not implemented.
        h = jnp.maximum(acc_ref[...] + b1_ref[...], 0.0)
        logits = jnp.dot(h, w2t_ref[...],
                         preferred_element_type=jnp.float32) + b2_ref[...]
        m = jnp.max(logits, axis=1, keepdims=True)
        z = logits - m
        lse = jnp.log(jnp.sum(jnp.exp(z), axis=1, keepdims=True))
        out_ref[...] = (z - lse).astype(out_ref.dtype)


def _fc1_relu_kernel(x_ref, w1_ref, b1_ref, h_ref, acc_ref):
    """Dual-TC (v7x) path. Grid = (n_split, K // tk): axis 0 ("parallel") splits the 256-wide
    fc1 output across TensorCores; axis 1 ("arbitrary") walks the K reduction.

      x_ref  : (B_pad, tk)      f32 (cast to bf16 in-kernel)
      w1_ref : (n_half, tk)     bf16
      b1_ref : (1, n_half)      f32
      h_ref  : (B_pad, n_half)  f32  relu(fc1) half, resident across the K axis
      acc_ref: (B_pad, n_half)  f32  accumulator scratch
    """
    k = pl.program_id(1)

    @pl.when(k == 0)
    def _():
        acc_ref[...] = jnp.zeros_like(acc_ref)

    acc_ref[...] += jax.lax.dot_general(
        x_ref[...].astype(jnp.bfloat16), w1_ref[...],
        dimension_numbers=(((1,), (1,)), ((), ())),
        preferred_element_type=jnp.float32)

    @pl.when(k == pl.num_programs(1) - 1)
    def _():
        h_ref[...] = jnp.maximum(acc_ref[...] + b1_ref[...], 0.0).astype(h_ref.dtype)


def _pick_tk(K, b_pad, n_out, budget_bytes, *, w1_buffers=3, x_bytes=4):
    """Largest K tile (multiple of 128, divides K) whose streamed buffers
    (w1_buffers x bf16 w1 tile + 2 x f32 x tile) fit within `budget_bytes` of VMEM."""
    per_tk = w1_buffers * 2 * n_out + 2 * x_bytes * b_pad   # bytes per unit of tk
    cap = max(128, budget_bytes // per_tk)
    if K <= cap:
        return K                        # whole reduction in a single grid step
    best = 128
    t = 256
    while t <= cap:
        if K % t == 0:
            best = t
        t += 128
    return best


def sentimental_bert_head(hidden_states, w1, b1, w2, b2, *,
                          n_split=None, tk=None,
                          vmem_budget_bytes=None, vmem_limit_bytes=None):
    """hidden_states: (B, maxlen, 768) -- output of the BERT backbone.
    w1: (256, 768*maxlen), b1: (256,), w2: (2, 256), b2: (2,)  (PyTorch layouts).
    Pass w1 already stored in bfloat16 to avoid a per-call cast of the largest tensor.
    Returns log-probabilities of shape (B, 2)."""
    B, maxlen, hid = hidden_states.shape
    assert hid == _HID
    K = maxlen * hid
    assert w1.shape == (_FC1_OUT, K)
    assert K % 128 == 0

    gen = _tpu_generation()
    if n_split is None:
        # 2-way output split only pays when there are two TensorCores (v7x).
        n_split = 2 if gen == 7 else 1
    if vmem_budget_bytes is None:
        vmem_budget_bytes = {5: 80 << 20, 6: 80 << 20, 7: 32 << 20}.get(gen, 32 << 20)
    if vmem_limit_bytes is None:
        vmem_limit_bytes = {5: 96 << 20, 6: 96 << 20, 7: 56 << 20}.get(gen, 48 << 20)

    assert _FC1_OUT % n_split == 0
    n_out = _FC1_OUT // n_split
    assert n_out % 128 == 0

    B_pad = ((B + 7) // 8) * 8          # pad batch to full sublanes

    # nn.Flatten(1, -1); keep activations f32 in HBM (cast to bf16 in-kernel).
    x = hidden_states.reshape(B, K)
    if B_pad != B:
        x = jnp.pad(x, ((0, B_pad - B), (0, 0)))

    w1_bf = w1.astype(jnp.bfloat16)                   # no-op if caller caches bf16 weights
    b1_r = b1.reshape(1, _FC1_OUT).astype(jnp.float32)
    w2_t = jnp.transpose(w2).astype(jnp.float32)      # (256, 2) -- tiny, negligible cost
    b2_r = b2.reshape(1, _N_CLASSES).astype(jnp.float32)

    if tk is None:
        tk = _pick_tk(K, B_pad, n_out, vmem_budget_bytes)
    assert K % tk == 0 and tk % 128 == 0
    n_k = K // tk

    # 3-deep w1 buffering only matters when the reduction actually has several steps.
    w1_pipeline = {"pipeline_mode": pl.Buffered(3)} if n_k >= 3 else {}

    if n_split == 1:
        # Fully fused single kernel: fc1 reduction + (bias, relu, fc2, log_softmax) epilogue.
        out = pl.pallas_call(
            _fused_head_kernel,
            out_shape=jax.ShapeDtypeStruct((B_pad, _N_CLASSES), jnp.float32),
            grid_spec=pltpu.PrefetchScalarGridSpec(
                num_scalar_prefetch=0,
                grid=(n_k,),
                in_specs=[
                    pl.BlockSpec((B_pad, tk), lambda k: (0, k)),                     # x
                    pl.BlockSpec((_FC1_OUT, tk), lambda k: (0, k), **w1_pipeline),   # w1
                    pl.BlockSpec((1, _FC1_OUT), lambda k: (0, 0)),                   # b1
                    pl.BlockSpec((_FC1_OUT, _N_CLASSES), lambda k: (0, 0)),          # w2^T
                    pl.BlockSpec((1, _N_CLASSES), lambda k: (0, 0)),                 # b2
                ],
                out_specs=pl.BlockSpec((B_pad, _N_CLASSES), lambda k: (0, 0)),
                scratch_shapes=[pltpu.VMEM((B_pad, _FC1_OUT), jnp.float32)],
            ),
            compiler_params=pltpu.CompilerParams(
                dimension_semantics=("arbitrary",),
                vmem_limit_bytes=vmem_limit_bytes),
        )(x, w1_bf, b1_r, w2_t, b2_r)
        return out[:B]

    # v7x path: split the 256-wide fc1 output across the two TensorCores, then do the
    # trivial fc2 + log_softmax epilogue with plain (XLA-fused) jnp ops.
    h = pl.pallas_call(
        _fc1_relu_kernel,
        out_shape=jax.ShapeDtypeStruct((B_pad, _FC1_OUT), jnp.float32),
        grid_spec=pltpu.PrefetchScalarGridSpec(
            num_scalar_prefetch=0,
            grid=(n_split, n_k),
            in_specs=[
                pl.BlockSpec((B_pad, tk), lambda n, k: (0, k)),                    # x
                pl.BlockSpec((n_out, tk), lambda n, k: (n, k), **w1_pipeline),     # w1 half
                pl.BlockSpec((1, n_out), lambda n, k: (0, n)),                     # b1 half
            ],
            out_specs=pl.BlockSpec((B_pad, n_out), lambda n, k: (0, n)),
            scratch_shapes=[pltpu.VMEM((B_pad, n_out), jnp.float32)],
        ),
        compiler_params=pltpu.CompilerParams(
            dimension_semantics=("parallel", "arbitrary"),
            vmem_limit_bytes=vmem_limit_bytes),
    )(x, w1_bf, b1_r)

    logits = h[:B] @ w2_t + b2_r
    return jax.nn.log_softmax(logits, axis=1)


def _reference(hidden_states, w1, b1, w2, b2):
    """Pure-JAX reference applying the same bf16 rounding to the fc1 operands."""
    B = hidden_states.shape[0]
    x = hidden_states.reshape(B, -1).astype(jnp.bfloat16).astype(jnp.float32)
    w1f = w1.astype(jnp.bfloat16).astype(jnp.float32)
    h = jnp.maximum(x @ w1f.T + b1, 0.0)
    logits = h @ w2.T + b2
    return jax.nn.log_softmax(logits, axis=1)


if __name__ == "__main__":
    B, maxlen, hid = 2, 8, 768          # small seq len; hidden=768 fixed by the module
    K = maxlen * hid

    key = jax.random.PRNGKey(0)
    k_x, k_w1, k_b1, k_w2, k_b2 = jax.random.split(key, 5)

    # Synthetic BERT hidden states (stand-in for bert(sent_id, mask)[1][2]).
    hidden_states = jax.random.normal(k_x, (B, maxlen, hid), dtype=jnp.float32)

    # Deterministic parameter init, PyTorch Linear shapes (out_features, in_features).
    w1 = jax.random.normal(k_w1, (256, K), dtype=jnp.float32) * 0.02
    b1 = jax.random.normal(k_b1, (256,), dtype=jnp.float32) * 0.02
    w2 = jax.random.normal(k_w2, (2, 256), dtype=jnp.float32) * 0.02
    b2 = jax.random.normal(k_b2, (2,), dtype=jnp.float32) * 0.02

    # In deployment the fc1 weight is cached in bf16 once, outside the hot path.
    w1_bf16 = w1.astype(jnp.bfloat16)

    out = sentimental_bert_head(hidden_states, w1_bf16, b1, w2, b2)
    out = jax.block_until_ready(out)

    ref = _reference(hidden_states, w1, b1, w2, b2)
    assert out.shape == (B, 2)
    assert jnp.allclose(out, ref, atol=2e-3, rtol=2e-3), (
        "mismatch vs reference, max abs diff = "
        f"{float(jnp.max(jnp.abs(out - ref)))}")

    print("KERNEL_OK")
</pallas_src>

<mosaic_0001>
module attributes {stable_mosaic.version = 11 : i64} {
  func.func @_fused_head_kernel(%arg0: i32, %arg1: memref<8x6144xf32, #tpu.memory_space<vmem>>, %arg2: memref<256x6144xbf16, #tpu.memory_space<vmem>>, %arg3: memref<1x256xf32, #tpu.memory_space<vmem>>, %arg4: memref<256x2xf32, #tpu.memory_space<vmem>>, %arg5: memref<1x2xf32, #tpu.memory_space<vmem>>, %arg6: memref<8x2xf32, #tpu.memory_space<vmem>>, %arg7: memref<8x256xf32, #tpu.memory_space<vmem>>) attributes {dimension_semantics = [#tpu.dimension_semantics<arbitrary>], iteration_bounds = array<i64: 1>, scalar_prefetch = 0 : i64, scratch_operands = 1 : i64, tpu.core_type = #tpu.core_type<tc>, window_params = [{transform_indices = @transform_0, window_bounds = array<i64: 8, 6144>}, {transform_indices = @transform_1, window_bounds = array<i64: 256, 6144>}, {pipeline_mode = #tpu.pipeline_mode<synchronous>, transform_indices = @transform_2, window_bounds = array<i64: 1, 256>}, {pipeline_mode = #tpu.pipeline_mode<synchronous>, transform_indices = @transform_3, window_bounds = array<i64: 256, 2>}, {pipeline_mode = #tpu.pipeline_mode<synchronous>, transform_indices = @transform_4, window_bounds = array<i64: 1, 2>}, {pipeline_mode = #tpu.pipeline_mode<synchronous>, transform_indices = @transform_5, window_bounds = array<i64: 8, 2>}]} {
    %c0_i32 = arith.constant 0 : i32
    %0 = arith.cmpi eq, %arg0, %c0_i32 : i32
    %1 = arith.extui %0 : i1 to i32
    %c0_i32_0 = arith.constant 0 : i32
    %2 = arith.cmpi ne, %1, %c0_i32_0 : i32
    scf.if %2 {
      %cst_10 = arith.constant 0.000000e+00 : f32
      %13 = vector.broadcast %cst_10 : f32 to vector<8x256xf32>
      %c0_11 = arith.constant 0 : index
      %c0_12 = arith.constant 0 : index
      %14 = vector.load %arg7[%c0_11, %c0_12] : memref<8x256xf32, #tpu.memory_space<vmem>>, vector<8x256xf32>
      tpu.vector_store %arg7[%c0_11, %c0_12], %13 {strides = array<i32>} : memref<8x256xf32, #tpu.memory_space<vmem>>, vector<8x256xf32>,
    } else {
    }
    %c0 = arith.constant 0 : index
    %c0_1 = arith.constant 0 : index
    %3 = vector.load %arg7[%c0, %c0_1] : memref<8x256xf32, #tpu.memory_space<vmem>>, vector<8x256xf32>
    %c0_2 = arith.constant 0 : index
    %c0_3 = arith.constant 0 : index
    %4 = vector.load %arg1[%c0_2, %c0_3] : memref<8x6144xf32, #tpu.memory_space<vmem>>, vector<8x6144xf32>
    %5 = arith.truncf %4 : vector<8x6144xf32> to vector<8x6144xbf16>
    %c0_4 = arith.constant 0 : index
    %c0_5 = arith.constant 0 : index
    %6 = vector.load %arg2[%c0_4, %c0_5] : memref<256x6144xbf16, #tpu.memory_space<vmem>>, vector<256x6144xbf16>
    %cst = arith.constant dense<0.000000e+00> : vector<8x256xf32>
    %7 = tpu.matmul %5, %6, %cst {dimension_numbers = #tpu.dot_dimension_numbers<[1], [1], [0], [0], [0, 0, 1, 0], [], []>} : vector<8x6144xbf16>, vector<256x6144xbf16>, vector<8x256xf32> -> vector<8x256xf32>
    %8 = arith.addf %3, %7 : vector<8x256xf32>
    %c0_6 = arith.constant 0 : index
    %c0_7 = arith.constant 0 : index
    %9 = vector.load %arg7[%c0_6, %c0_7] : memref<8x256xf32, #tpu.memory_space<vmem>>, vector<8x256xf32>
    tpu.vector_store %arg7[%c0_6, %c0_7], %8 {strides = array<i32>} : memref<8x256xf32, #tpu.memory_space<vmem>>, vector<8x256xf32>,
    %c0_i32_8 = arith.constant 0 : i32
    %10 = arith.cmpi eq, %arg0, %c0_i32_8 : i32
    %11 = arith.extui %10 : i1 to i32
    %c0_i32_9 = arith.constant 0 : i32
    %12 = arith.cmpi ne, %11, %c0_i32_9 : i32
    scf.if %12 {
      %c0_10 = arith.constant 0 : index
      %c0_11 = arith.constant 0 : index
      %13 = vector.load %arg7[%c0_10, %c0_11] : memref<8x256xf32, #tpu.memory_space<vmem>>, vector<8x256xf32>
      %c0_12 = arith.constant 0 : index
      %c0_13 = arith.constant 0 : index
      %14 = vector.load %arg3[%c0_12, %c0_13] : memref<1x256xf32, #tpu.memory_space<vmem>>, vector<1x256xf32>
      %15 = vector.broadcast %14 : vector<1x256xf32> to vector<8x256xf32>
      %16 = arith.addf %13, %15 : vector<8x256xf32>
      %cst_14 = arith.constant 0.000000e+00 : f32
      %17 = vector.broadcast %cst_14 : f32 to vector<8x256xf32>
      %18 = arith.maximumf %16, %17 : vector<8x256xf32>
      %c0_15 = arith.constant 0 : index
      %c0_16 = arith.constant 0 : index
      %19 = vector.load %arg4[%c0_15, %c0_16] : memref<256x2xf32, #tpu.memory_space<vmem>>, vector<256x2xf32>
      %cst_17 = arith.constant dense<0.000000e+00> : vector<8x2xf32>
      %20 = tpu.matmul %18, %19, %cst_17 {dimension_numbers = #tpu.dot_dimension_numbers<[1], [0], [0], [1], [0, 0, 1, 1], [], []>} : vector<8x256xf32>, vector<256x2xf32>, vector<8x2xf32> -> vector<8x2xf32>
      %c0_18 = arith.constant 0 : index
      %c0_19 = arith.constant 0 : index
      %21 = vector.load %arg5[%c0_18, %c0_19] : memref<1x2xf32, #tpu.memory_space<vmem>>, vector<1x2xf32>
      %22 = vector.broadcast %21 : vector<1x2xf32> to vector<8x2xf32>
      %23 = arith.addf %20, %22 : vector<8x2xf32>
      %cst_20 = arith.constant dense<0xFF800000> : vector<8xf32>
      %24 = vector.multi_reduction <maximumf>, %23, %cst_20 [1] : vector<8x2xf32> to vector<8xf32>
      %25 = vector.shape_cast %24 : vector<8xf32> to vector<8x1xf32>
      %26 = vector.broadcast %25 : vector<8x1xf32> to vector<8x2xf32>
      %27 = arith.subf %23, %26 : vector<8x2xf32>
      %28 = math.exp %27 : vector<8x2xf32>
      %cst_21 = arith.constant dense<0.000000e+00> : vector<8xf32>
      %29 = vector.multi_reduction <add>, %28, %cst_21 [1] : vector<8x2xf32> to vector<8xf32>
      %30 = vector.shape_cast %29 : vector<8xf32> to vector<8x1xf32>
      %31 = math.log %30 : vector<8x1xf32>
      %32 = vector.broadcast %31 : vector<8x1xf32> to vector<8x2xf32>
      %33 = arith.subf %27, %32 : vector<8x2xf32>
      %c0_22 = arith.constant 0 : index
      %c0_23 = arith.constant 0 : index
      %34 = vector.load %arg6[%c0_22, %c0_23] : memref<8x2xf32, #tpu.memory_space<vmem>>, vector<8x2xf32>
      tpu.vector_store %arg6[%c0_22, %c0_23], %33 {strides = array<i32>} : memref<8x2xf32, #tpu.memory_space<vmem>>, vector<8x2xf32>,
    } else {
    }
    return
  }
  func.func @transform_0(%arg0: i32) -> (i32, i32) {
    %c0_i32 = arith.constant 0 : i32
    %c0_i32_0 = arith.constant 0 : i32
    return %c0_i32, %arg0 : i32, i32
  }
  func.func @transform_1(%arg0: i32) -> (i32, i32) {
    %c0_i32 = arith.constant 0 : i32
    %c0_i32_0 = arith.constant 0 : i32
    return %c0_i32, %arg0 : i32, i32
  }
  func.func @transform_2(%arg0: i32) -> (i32, i32) {
    %c0_i32 = arith.constant 0 : i32
    %c0_i32_0 = arith.constant 0 : i32
    %c0_i32_1 = arith.constant 0 : i32
    return %c0_i32, %c0_i32_0 : i32, i32
  }
  func.func @transform_3(%arg0: i32) -> (i32, i32) {
    %c0_i32 = arith.constant 0 : i32
    %c0_i32_0 = arith.constant 0 : i32
    %c0_i32_1 = arith.constant 0 : i32
    return %c0_i32, %c0_i32_0 : i32, i32
  }
  func.func @transform_4(%arg0: i32) -> (i32, i32) {
    %c0_i32 = arith.constant 0 : i32
    %c0_i32_0 = arith.constant 0 : i32
    %c0_i32_1 = arith.constant 0 : i32
    return %c0_i32, %c0_i32_0 : i32, i32
  }
  func.func @transform_5(%arg0: i32) -> (i32, i32) {
    %c0_i32 = arith.constant 0 : i32
    %c0_i32_0 = arith.constant 0 : i32
    %c0_i32_1 = arith.constant 0 : i32
    return %c0_i32, %c0_i32_0 : i32, i32
  }
}

</mosaic_0001>

<bundles_post_ra>
// kernel: tpu_custom_call.1
= control target key start
LH: loop header
LB: loop body
LE: loop exit
PB: predicated region body
PF: predicated region fallthrough
CT: control target
= control target key end

     0   :  { %10 = vsyncpa [#allocation4], 0  ;;  %s7030_s0 = inlined_call_operand.hbm [shape: f32[8,6144], index: 0, kind: input, shape index: {}]   ;;  %s7031_s1 = inlined_call_operand.hbm [shape: bf16[256,6144], index: 1, kind: input, shape index: {}]   ;;  %s7032_s2 = inlined_call_operand.hbm [shape: f32[1,256], index: 2, kind: input, shape index: {}]   ;;  %s7033_s3 = inlined_call_operand.vmem [shape: f32[256,2], index: 3, kind: input, shape index: {}]   ;;  %s7034_s4 = inlined_call_operand.hbm [shape: f32[1,2], index: 4, kind: input, shape index: {}]   ;;  %s7035_s5 = inlined_call_operand.vmem [shape: f32[8,2], index: 5, kind: output, shape index: {}]  }
   0x1   :  { %11 = vsyncpa [#allocation6], 0 }
   0x2   :  { %12 = vsyncpa [#allocation9], 0  ;;  %s6820_s18 = smov [#allocation5]  }
   0x3   :  { %s28_s19 = sshll.u32 %s6820_s18, 4  ;;  %s29_s19 = int_to_ptr.vmem [resolvable:$true] %s28_s19 }
   0x4   :  { %s6742_s20 = scalar_lea.vmem %s29_s19, 98304  ;;  %p6747_p1 = scmp.lt.s32.totalorder %s29_s19, %s29_s19 }
   0x5   :  { %p6743_p0 = scmp.ne.s32.totalorder %s29_s19, %s6742_s20  ;;  %p6748_p2 = scmp.lt.s32.totalorder %s6742_s20, %s6742_s20 }
   0x7   :  { %p6749_p3 = por %p6748_p2, %p6747_p1 }
   0x9   :  { %p6750_p4 = pnand %p6749_p3, %p6743_p0 }
   0xb   :  { %6753 = shalt.err (!%p6750_p4)
}
   0xc   :  { %s6821_s21 = smov 3072   ;;  %s6822_s22 = smov 192  }
   0xd   :  { %34 = dma.hbm_to_vmem [thread:$0]  %s7031_s1, 98304, %s29_s19, [#allocation6], %s6821_s21, %s6821_s21, %s6822_s22  }
   0xe   :  { %s6823_s25 = smov [#allocation3]   ;;  %s6824_s27 = smov [#allocation7]  }
   0xf   :  { %s19_s26 = sshll.u32 %s6823_s25, 4  ;;  %s41_s28 = sshll.u32 %s6824_s27, 4  ;;  %s20_s26 = int_to_ptr.vmem [resolvable:$true] %s19_s26  ;;  %s42_s28 = int_to_ptr.vmem [resolvable:$true] %s41_s28 }
  0x10   :  { %s6762_s29 = scalar_lea.vmem %s20_s26, 6144  ;;  %p6767_p6 = scmp.lt.s32.totalorder %s20_s26, %s20_s26 }
  0x11   :  { %p6763_p5 = scmp.ne.s32.totalorder %s20_s26, %s6762_s29  ;;  %p6768_p7 = scmp.lt.s32.totalorder %s6762_s29, %s6762_s29 }
  0x13   :  { %p6769_p8 = por %p6768_p7, %p6767_p6 }
  0x15   :  { %p6770_p9 = pnand %p6769_p8, %p6763_p5 }
  0x17   :  { %6773 = shalt.err (!%p6770_p9)
}
  0x18   :  { %22 = dma.hbm_to_vmem [thread:$0]  %s7030_s0, 6144, %s20_s26, [#allocation4]  }
  0x19   :  { %s6782_s7 = scalar_lea.vmem %s42_s28, 32  ;;  %p6787_p11 = scmp.lt.s32.totalorder %s42_s28, %s42_s28 }
  0x1a   :  { %p6783_p10 = scmp.ne.s32.totalorder %s42_s28, %s6782_s7  ;;  %p6788_p12 = scmp.lt.s32.totalorder %s6782_s7, %s6782_s7 }
  0x1c   :  { %p6789_p13 = por %p6788_p12, %p6787_p11 }
  0x1e   :  { %p6790_p0 = pnand %p6789_p13, %p6783_p10 }
  0x20   :  { %6793 = shalt.err (!%p6790_p0)
}
  0x21   :  { %44 = dma.hbm_to_vmem [thread:$0]  %s7032_s2, 32, %s42_s28, [#allocation6]  }
  0x22   :  { %s6825_s9 = smov [#allocation8]  }
  0x23   :  { %s53_s10 = sshll.u32 %s6825_s9, 4  ;;  %s54_s10 = int_to_ptr.vmem [resolvable:$true] %s53_s10 }
  0x24   :  { %s6802_s11 = scalar_lea.vmem %s54_s10, 16  ;;  %s6806_s12 = scalar_lea.vmem %s54_s10, 32 }
  0x25   :  { %p6803_p1 = scmp.ne.s32.totalorder %s54_s10, %s6802_s11  ;;  %p6807_p2 = scmp.lt.s32.totalorder %s54_s10, %s54_s10 }
  0x26   :  { %p6808_p3 = scmp.lt.s32.totalorder %s6806_s12, %s6802_s11 }
  0x28   :  { %p6809_p4 = por %p6808_p3, %p6807_p2 }
  0x2a   :  { %p6810_p5 = pnand %p6809_p4, %p6803_p1 }
  0x2c   :  { %6813 = shalt.err (!%p6810_p5)
}
  0x2d   :  { %56 = dma.hbm_to_vmem [thread:$0]  %s7034_s4, 16, %s54_s10, [#allocation9]  }
  0x2e   :  { %6814 = dma.done.wait [#allocation4], 6144  }
  0x2f   :  { %6815 = vsyncadd [#allocation4], 4294961152 }
  0x30   :  { %6816 = dma.done.wait [#allocation6], 98336  }
  0x31   :  { %6817 = vsyncadd [#allocation6], 4294868960 }
  0x32   :  { %6818 = dma.done.wait [#allocation9], 16  }
  0x33   :  { %6819 = vsyncadd [#allocation9], 4294967280  ;;  %v509_v0 = vld [vmem:[#allocation5 + $0xa80] sm:$0xff]  ;;  %v510_v2 = vld [vmem:[#allocation5 + $0xa88] sm:$0xff]  ;;  %vm5899_vm0 = vcmask 15360  }
  0x34   :  { %v533_v1 = vld [vmem:[#allocation5 + $0xb40] sm:$0xff]  ;;  %v534_v4 = vld [vmem:[#allocation5 + $0xb48] sm:$0xff]  ;;  %v80_v31 = vld [vmem:[#allocation3 + $0x18] sm:$0xff] }
  0x35   :  { %v6257_v3 = vcombine.high %v509_v0, %v533_v1  ;;  %v6256_v5 = vcombine.low %v509_v0, %v533_v1  ;;  %v461_v6 = vld [vmem:[#allocation5 + $0x900] sm:$0xff]  ;;  %v6259_v8 = vcombine.high %v510_v2, %v534_v4  ;;  %v6258_v9 = vcombine.low %v510_v2, %v534_v4  ;;  %v462_v11 = vld [vmem:[#allocation5 + $0x908] sm:$0xff] }
  0x36   :  { %v485_v7 = vld [vmem:[#allocation5 + $0x9c0] sm:$0xff]  ;;  %v486_v12 = vld [vmem:[#allocation5 + $0x9c8] sm:$0xff]  ;;  %v128_v35 = vpack.c.bf16 %v80_v31, %v80_v31 }
  0x37   :  { %v6209_v10 = vcombine.high %v461_v6, %v485_v7  ;;  %4781 = vmatprep.subr.bf16.mxu0 %v6257_v3  ;;  %v6211_v13 = vcombine.high %v462_v11, %v486_v12  ;;  %4822 = vmatprep.subr.bf16.mxu1 %v6259_v8  ;;  %v413_v14 = vld [vmem:[#allocation5 + $0x780] sm:$0xff]  ;;  %v414_v16 = vld [vmem:[#allocation5 + $0x788] sm:$0xff]  ;;  %v6208_v18 = vcombine.low %v461_v6, %v485_v7 }
  0x38   :  { %4782 = vmatpush1.bf16.xpose.msra.mxu0 %v6256_v5  ;;  %4823 = vmatpush1.bf16.xpose.msra.mxu1 %v6258_v9  ;;  %v437_v15 = vld [vmem:[#allocation5 + $0x840] sm:$0xff]  ;;  %v438_v17 = vld [vmem:[#allocation5 + $0x848] sm:$0xff]  ;;  %v6210_v19 = vcombine.low %v462_v11, %v486_v12 }
  0x39   :  { %4783 = vmatprep.subr.bf16.mxu0 %v6209_v10  ;;  %4824 = vmatprep.subr.bf16.mxu1 %v6211_v13  ;;  %v6161_v20 = vcombine.high %v413_v14, %v437_v15  ;;  %v6163_v21 = vcombine.high %v414_v16, %v438_v17  ;;  %v365_v22 = vld [vmem:[#allocation5 + $0x600] sm:$0xff]  ;;  %v366_v24 = vld [vmem:[#allocation5 + $0x608] sm:$0xff]  ;;  %v6160_v26 = vcombine.low %v413_v14, %v437_v15 }
  0x3a   :  { %v389_v23 = vld [vmem:[#allocation5 + $0x6c0] sm:$0xff]  ;;  %v390_v25 = vld [vmem:[#allocation5 + $0x6c8] sm:$0xff]  ;;  %v6162_v27 = vcombine.low %v414_v16, %v438_v17  ;;  %4854 = vmatprep.mubr.bf16.mxu1 %v128_v35 }
  0x3b   :  { %v6113_v28 = vcombine.high %v365_v22, %v389_v23  ;;  %v6115_v29 = vcombine.high %v366_v24, %v390_v25  ;;  %v78_v30 = vld [vmem:[#allocation3 + $0x8] sm:$0xff]  ;;  %v317_v32 = vld [vmem:[#allocation5 + $0x480] sm:$0xff]  ;;  %v6112_v38 = vcombine.low %v365_v22, %v389_v23  ;;  %v6114_v39 = vcombine.low %v366_v24, %v390_v25 }
  0x3c   :  { %v341_v33 = vld [vmem:[#allocation5 + $0x540] sm:$0xff]  ;;  %v126_v34 = vpack.c.bf16 %v78_v30, %v78_v30  ;;  %v318_v36 = vld [vmem:[#allocation5 + $0x488] sm:$0xff] }
  0x3d   :  { %v342_v37 = vld [vmem:[#allocation5 + $0x548] sm:$0xff]  ;;  %v6065_v40 = vcombine.high %v317_v32, %v341_v33  ;;  %v269_v42 = vld [vmem:[#allocation5 + $0x300] sm:$0xff]  ;;  %v6064_v46 = vcombine.low %v317_v32, %v341_v33 }
  0x3e   :  { %4813 = vmatprep.mubr.bf16.mxu0 %v126_v34  ;;  %v6067_v41 = vcombine.high %v318_v36, %v342_v37  ;;  %v293_v43 = vld [vmem:[#allocation5 + $0x3c0] sm:$0xff]  ;;  %v270_v44 = vld [vmem:[#allocation5 + $0x308] sm:$0xff]  ;;  %v6066_v47 = vcombine.low %v318_v36, %v342_v37 }
  0x3f   :  { %v294_v45 = vld [vmem:[#allocation5 + $0x3c8] sm:$0xff]  ;;  %v6017_v48 = vcombine.high %v269_v42, %v293_v43  ;;  %v221_v50 = vld [vmem:[#allocation5 + $0x180] sm:$0xff]  ;;  %v6016_v54 = vcombine.low %v269_v42, %v293_v43 }
  0x40   :  { %4784 = vmatpush1.bf16.xpose.msra.mxu0 %v6208_v18  ;;  %4825 = vmatpush1.bf16.xpose.msra.mxu1 %v6210_v19  ;;  %v6019_v49 = vcombine.high %v270_v44, %v294_v45  ;;  %v245_v51 = vld [vmem:[#allocation5 + $0x240] sm:$0xff]  ;;  %v222_v52 = vld [vmem:[#allocation5 + $0x188] sm:$0xff]  ;;  %v6018_v55 = vcombine.low %v270_v44, %v294_v45 }
  0x41   :  { %4785 = vmatprep.subr.bf16.mxu0 %v6161_v20  ;;  %4826 = vmatprep.subr.bf16.mxu1 %v6163_v21  ;;  %v246_v53 = vld [vmem:[#allocation5 + $0x248] sm:$0xff]  ;;  %v5969_v56 = vcombine.high %v221_v50, %v245_v51  ;;  %v173_v58 = vld [vmem:[#allocation5] sm:$0xff]  ;;  %v5968_v62 = vcombine.low %v221_v50, %v245_v51 }
  0x42   :  { %v5971_v57 = vcombine.high %v222_v52, %v246_v53  ;;  %v197_v59 = vld [vmem:[#allocation5 + $0xc0] sm:$0xff]  ;;  %v174_v60 = vld [vmem:[#allocation5 + $0x8] sm:$0xff]  ;;  %v5970_v63 = vcombine.low %v222_v52, %v246_v53 }
  0x43   :  { %v198_v61 = vld [vmem:[#allocation5 + $0xc8] sm:$0xff]  ;;  %v5921_v0 = vcombine.high %v173_v58, %v197_v59  ;;  %v893_v2 = vld [vmem:[#allocation5 + $0x1680] sm:$0xff]  ;;  %v5920_v6 = vcombine.low %v173_v58, %v197_v59 }
  0x44   :  { %v5923_v1 = vcombine.high %v174_v60, %v198_v61  ;;  %v917_v3 = vld [vmem:[#allocation5 + $0x1740] sm:$0xff]  ;;  %v894_v4 = vld [vmem:[#allocation5 + $0x1688] sm:$0xff]  ;;  %v5922_v7 = vcombine.low %v174_v60, %v198_v61 }
  0x45   :  { %v918_v5 = vld [vmem:[#allocation5 + $0x1748] sm:$0xff]  ;;  %v6641_v8 = vcombine.high %v893_v2, %v917_v3  ;;  %v845_v10 = vld [vmem:[#allocation5 + $0x1500] sm:$0xff]  ;;  %v6640_v14 = vcombine.low %v893_v2, %v917_v3  ;;  %v511_v2 = vld [vmem:[#allocation5 + $0xa90] sm:$0xff] }
  0x46   :  { %v6643_v9 = vcombine.high %v894_v4, %v918_v5  ;;  %v869_v11 = vld [vmem:[#allocation5 + $0x15c0] sm:$0xff]  ;;  %v846_v12 = vld [vmem:[#allocation5 + $0x1508] sm:$0xff]  ;;  %v6642_v15 = vcombine.low %v894_v4, %v918_v5  ;;  %v535_v3 = vld [vmem:[#allocation5 + $0xb50] sm:$0xff] }
  0x47   :  { %v870_v13 = vld [vmem:[#allocation5 + $0x15c8] sm:$0xff]  ;;  %v6593_v16 = vcombine.high %v845_v10, %v869_v11  ;;  %v797_v18 = vld [vmem:[#allocation5 + $0x1380] sm:$0xff]  ;;  %v6592_v22 = vcombine.low %v845_v10, %v869_v11  ;;  %v512_v4 = vld [vmem:[#allocation5 + $0xa98] sm:$0xff] }
  0x48   :  { %4786 = vmatpush1.bf16.xpose.msra.mxu0 %v6160_v26  ;;  %4827 = vmatpush1.bf16.xpose.msra.mxu1 %v6162_v27  ;;  %v6595_v17 = vcombine.high %v846_v12, %v870_v13  ;;  %v821_v19 = vld [vmem:[#allocation5 + $0x1440] sm:$0xff]  ;;  %v798_v20 = vld [vmem:[#allocation5 + $0x1388] sm:$0xff]  ;;  %v6594_v23 = vcombine.low %v846_v12, %v870_v13  ;;  %v536_v5 = vld [vmem:[#allocation5 + $0xb58] sm:$0xff] }
  0x49   :  { %4787 = vmatprep.subr.bf16.mxu0 %v6113_v28  ;;  %4828 = vmatprep.subr.bf16.mxu1 %v6115_v29  ;;  %v822_v21 = vld [vmem:[#allocation5 + $0x1448] sm:$0xff]  ;;  %v6545_v24 = vcombine.high %v797_v18, %v821_v19  ;;  %v749_v26 = vld [vmem:[#allocation5 + $0x1200] sm:$0xff]  ;;  %v6544_v30 = vcombine.low %v797_v18, %v821_v19  ;;  %v79_v11 = vld [vmem:[#allocation3 + $0x10] sm:$0xff]  ;;  %v6260_v19 = vcombine.low %v511_v2, %v535_v3 }
  0x4a   :  { %v6547_v25 = vcombine.high %v798_v20, %v822_v21  ;;  %v773_v27 = vld [vmem:[#allocation5 + $0x12c0] sm:$0xff]  ;;  %v750_v28 = vld [vmem:[#allocation5 + $0x1208] sm:$0xff]  ;;  %v6546_v31 = vcombine.low %v798_v20, %v822_v21  ;;  %v463_v12 = vld [vmem:[#allocation5 + $0x910] sm:$0xff]  ;;  %v127_v18 = vpack.c.bf16 %v79_v11, %v79_v11  ;;  %v6262_v21 = vcombine.low %v512_v4, %v536_v5 }
  0x4b   :  { %v774_v29 = vld [vmem:[#allocation5 + $0x12c8] sm:$0xff]  ;;  %v6497_v32 = vcombine.high %v749_v26, %v773_v27  ;;  %v701_v34 = vld [vmem:[#allocation5 + $0x1080] sm:$0xff]  ;;  %v487_v13 = vld [vmem:[#allocation5 + $0x9d0] sm:$0xff] }
  0x4c   :  { %v6499_v33 = vcombine.high %v750_v28, %v774_v29  ;;  %v725_v35 = vld [vmem:[#allocation5 + $0x1140] sm:$0xff]  ;;  %v702_v36 = vld [vmem:[#allocation5 + $0x1088] sm:$0xff]  ;;  %v84_v20 = vld [vmem:[#allocation3 + $0x38] sm:$0xff] }
  0x4d   :  { %v726_v37 = vld [vmem:[#allocation5 + $0x1148] sm:$0xff]  ;;  %v653_v42 = vld [vmem:[#allocation5 + $0xf00] sm:$0xff]  ;;  %v919_v11 = vld [vmem:[#allocation5 + $0x1750] sm:$0xff] }
  0x4e   :  { %v677_v43 = vld [vmem:[#allocation5 + $0xfc0] sm:$0xff]  ;;  %v654_v44 = vld [vmem:[#allocation5 + $0xf08] sm:$0xff] }
  0x4f   :  { %v678_v45 = vld [vmem:[#allocation5 + $0xfc8] sm:$0xff]  ;;  %v605_v50 = vld [vmem:[#allocation5 + $0xd80] sm:$0xff] }
  0x50   :  { %4788 = vmatpush1.bf16.xpose.msra.mxu0 %v6112_v38  ;;  %4829 = vmatpush1.bf16.xpose.msra.mxu1 %v6114_v39  ;;  %v6496_v38 = vcombine.low %v749_v26, %v773_v27  ;;  %v6498_v39 = vcombine.low %v750_v28, %v774_v29  ;;  %v629_v51 = vld [vmem:[#allocation5 + $0xe40] sm:$0xff]  ;;  %v606_v52 = vld [vmem:[#allocation5 + $0xd88] sm:$0xff]  ;;  %v415_v26 = vld [vmem:[#allocation5 + $0x790] sm:$0xff] }
  0x51   :  { %4789 = vmatprep.subr.bf16.mxu0 %v6065_v40  ;;  %4830 = vmatprep.subr.bf16.mxu1 %v6067_v41  ;;  %v6449_v40 = vcombine.high %v701_v34, %v725_v35  ;;  %v6451_v41 = vcombine.high %v702_v36, %v726_v37  ;;  %v630_v53 = vld [vmem:[#allocation5 + $0xe48] sm:$0xff]  ;;  %v557_v58 = vld [vmem:[#allocation5 + $0xc00] sm:$0xff]  ;;  %v439_v27 = vld [vmem:[#allocation5 + $0x850] sm:$0xff] }
  0x52   :  { %v581_v59 = vld [vmem:[#allocation5 + $0xcc0] sm:$0xff]  ;;  %v558_v60 = vld [vmem:[#allocation5 + $0xc08] sm:$0xff]  ;;  %v416_v28 = vld [vmem:[#allocation5 + $0x798] sm:$0xff] }
  0x53   :  { %v582_v61 = vld [vmem:[#allocation5 + $0xcc8] sm:$0xff]  ;;  %v77_v10 = vld [vmem:[#allocation3] sm:$0xff]  ;;  %v440_v29 = vld [vmem:[#allocation5 + $0x858] sm:$0xff] }
  0x58   :  { %4790 = vmatpush1.bf16.xpose.msra.mxu0 %v6064_v46  ;;  %4831 = vmatpush1.bf16.xpose.msra.mxu1 %v6066_v47  ;;  %v6448_v46 = vcombine.low %v701_v34, %v725_v35  ;;  %v6450_v47 = vcombine.low %v702_v36, %v726_v37  ;;  %v367_v34 = vld [vmem:[#allocation5 + $0x610] sm:$0xff]  ;;  %v368_v36 = vld [vmem:[#allocation5 + $0x618] sm:$0xff] }
  0x59   :  { %4791 = vmatprep.subr.bf16.mxu0 %v6017_v48  ;;  %4832 = vmatprep.subr.bf16.mxu1 %v6019_v49  ;;  %v6401_v48 = vcombine.high %v653_v42, %v677_v43  ;;  %v6403_v49 = vcombine.high %v654_v44, %v678_v45  ;;  %v391_v35 = vld [vmem:[#allocation5 + $0x6d0] sm:$0xff]  ;;  %v392_v37 = vld [vmem:[#allocation5 + $0x6d8] sm:$0xff] }
  0x60   :  { %4792 = vmatpush1.bf16.xpose.msra.mxu0 %v6016_v54  ;;  %4833 = vmatpush1.bf16.xpose.msra.mxu1 %v6018_v55  ;;  %v6400_v54 = vcombine.low %v653_v42, %v677_v43  ;;  %v6402_v55 = vcombine.low %v654_v44, %v678_v45  ;;  %v319_v42 = vld [vmem:[#allocation5 + $0x490] sm:$0xff]  ;;  %v320_v44 = vld [vmem:[#allocation5 + $0x498] sm:$0xff] }
  0x61   :  { %4793 = vmatprep.subr.bf16.mxu0 %v5969_v56  ;;  %4834 = vmatprep.subr.bf16.mxu1 %v5971_v57  ;;  %v6353_v56 = vcombine.high %v605_v50, %v629_v51  ;;  %v6355_v57 = vcombine.high %v606_v52, %v630_v53  ;;  %v343_v43 = vld [vmem:[#allocation5 + $0x550] sm:$0xff]  ;;  %v344_v45 = vld [vmem:[#allocation5 + $0x558] sm:$0xff] }
  0x68   :  { %4794 = vmatpush1.bf16.xpose.msra.mxu0 %v5968_v62  ;;  %4835 = vmatpush1.bf16.xpose.msra.mxu1 %v5970_v63  ;;  %v6352_v62 = vcombine.low %v605_v50, %v629_v51  ;;  %v6354_v63 = vcombine.low %v606_v52, %v630_v53  ;;  %v271_v50 = vld [vmem:[#allocation5 + $0x310] sm:$0xff]  ;;  %v272_v52 = vld [vmem:[#allocation5 + $0x318] sm:$0xff] }
  0x69   :  { %4795 = vmatprep.subr.bf16.mxu0 %v5921_v0  ;;  %4836 = vmatprep.subr.bf16.mxu1 %v5923_v1  ;;  %v6305_v0 = vcombine.high %v557_v58, %v581_v59  ;;  %v6307_v1 = vcombine.high %v558_v60, %v582_v61  ;;  %v295_v51 = vld [vmem:[#allocation5 + $0x3d0] sm:$0xff]  ;;  %v296_v53 = vld [vmem:[#allocation5 + $0x3d8] sm:$0xff] }
  0x70   :  { %4796 = vmatpush1.bf16.xpose.msra.mxu0 %v5920_v6  ;;  %4837 = vmatpush1.bf16.xpose.msra.mxu1 %v5922_v7  ;;  %v6304_v6 = vcombine.low %v557_v58, %v581_v59  ;;  %v6306_v7 = vcombine.low %v558_v60, %v582_v61  ;;  %v223_v58 = vld [vmem:[#allocation5 + $0x190] sm:$0xff]  ;;  %v224_v60 = vld [vmem:[#allocation5 + $0x198] sm:$0xff] }
  0x71   :  { %4797 = vmatprep.subr.bf16.mxu0 %v6641_v8  ;;  %4838 = vmatprep.subr.bf16.mxu1 %v6643_v9  ;;  %v6261_v8 = vcombine.high %v511_v2, %v535_v3  ;;  %v6263_v9 = vcombine.high %v512_v4, %v536_v5  ;;  %v247_v59 = vld [vmem:[#allocation5 + $0x250] sm:$0xff]  ;;  %v248_v61 = vld [vmem:[#allocation5 + $0x258] sm:$0xff] }
  0x72   :  { %v175_v2 = vld [vmem:[#allocation5 + $0x10] sm:$0xff]  ;;  %v176_v4 = vld [vmem:[#allocation5 + $0x18] sm:$0xff] }
  0x73   :  { %v199_v3 = vld [vmem:[#allocation5 + $0xd0] sm:$0xff]  ;;  %v200_v5 = vld [vmem:[#allocation5 + $0xd8] sm:$0xff] }
  0x78   :  { %4798 = vmatpush2.bf16.xpose.msra.mxu0 %v6640_v14  ;;  %4839 = vmatpush2.bf16.xpose.msra.mxu1 %v6642_v15  ;;  %v125_v14 = vpack.c.bf16 %v77_v10, %v77_v10  ;;  %v464_v15 = vld [vmem:[#allocation5 + $0x918] sm:$0xff]  ;;  %v895_v10 = vld [vmem:[#allocation5 + $0x1690] sm:$0xff] }
  0x79   :  { %4799 = vmatprep.subr.bf16.mxu0 %v6593_v16  ;;  %4840 = vmatprep.subr.bf16.mxu1 %v6595_v17  ;;  %v488_v16 = vld [vmem:[#allocation5 + $0x9d8] sm:$0xff]  ;;  %v82_v17 = vld [vmem:[#allocation3 + $0x28] sm:$0xff] }
  0x80   :  { %4800 = vmatpush2.bf16.xpose.msra.mxu0 %v6592_v22  ;;  %4841 = vmatpush2.bf16.xpose.msra.mxu1 %v6594_v23  ;;  %v6213_v22 = vcombine.high %v463_v12, %v487_v13  ;;  %v6215_v23 = vcombine.high %v464_v15, %v488_v16 }
  0x81   :  { %4801 = vmatprep.subr.bf16.mxu0 %v6545_v24  ;;  %4842 = vmatprep.subr.bf16.mxu1 %v6547_v25  ;;  %v130_v24 = vpack.c.bf16 %v82_v17, %v82_v17  ;;  %v132_v25 = vpack.c.bf16 %v84_v20, %v84_v20  ;;  %v848_v20 = vld [vmem:[#allocation5 + $0x1518] sm:$0xff] }
  0x88   :  { %4802 = vmatpush2.bf16.xpose.msra.mxu0 %v6544_v30  ;;  %4843 = vmatpush2.bf16.xpose.msra.mxu1 %v6546_v31  ;;  %v6212_v30 = vcombine.low %v463_v12, %v487_v13  ;;  %v6214_v31 = vcombine.low %v464_v15, %v488_v16  ;;  %v896_v12 = vld [vmem:[#allocation5 + $0x1698] sm:$0xff]  ;;  %v5926_v15 = vcombine.low %v176_v4, %v200_v5 }
  0x89   :  { %4803 = vmatprep.subr.bf16.mxu0 %v6497_v32  ;;  %4844 = vmatprep.subr.bf16.mxu1 %v6499_v33  ;;  %v6165_v32 = vcombine.high %v415_v26, %v439_v27  ;;  %v6167_v33 = vcombine.high %v416_v28, %v440_v29  ;;  %v920_v13 = vld [vmem:[#allocation5 + $0x1758] sm:$0xff]  ;;  %v6645_v16 = vcombine.high %v895_v10, %v919_v11 }
  0x8a   :  { %v6647_v17 = vcombine.high %v896_v12, %v920_v13 }
  0x90   :  { %4804 = vmatpush2.bf16.xpose.msra.mxu0 %v6496_v38  ;;  %4845 = vmatpush2.bf16.xpose.msra.mxu1 %v6498_v39  ;;  %v6164_v38 = vcombine.low %v415_v26, %v439_v27  ;;  %v6166_v39 = vcombine.low %v416_v28, %v440_v29  ;;  %v799_v26 = vld [vmem:[#allocation5 + $0x1390] sm:$0xff]  ;;  %v800_v28 = vld [vmem:[#allocation5 + $0x1398] sm:$0xff] }
  0x91   :  { %4805 = vmatprep.subr.bf16.mxu0 %v6449_v40  ;;  %4846 = vmatprep.subr.bf16.mxu1 %v6451_v41  ;;  %v6117_v40 = vcombine.high %v367_v34, %v391_v35  ;;  %v6119_v41 = vcombine.high %v368_v36, %v392_v37  ;;  %v823_v27 = vld [vmem:[#allocation5 + $0x1450] sm:$0xff]  ;;  %v824_v29 = vld [vmem:[#allocation5 + $0x1458] sm:$0xff] }
  0x98   :  { %4806 = vmatpush2.bf16.xpose.msra.mxu0 %v6448_v46  ;;  %4847 = vmatpush2.bf16.xpose.msra.mxu1 %v6450_v47  ;;  %v6116_v46 = vcombine.low %v367_v34, %v391_v35  ;;  %v6118_v47 = vcombine.low %v368_v36, %v392_v37  ;;  %v751_v34 = vld [vmem:[#allocation5 + $0x1210] sm:$0xff]  ;;  %v752_v36 = vld [vmem:[#allocation5 + $0x1218] sm:$0xff] }
  0x99   :  { %4807 = vmatprep.subr.bf16.mxu0 %v6401_v48  ;;  %4848 = vmatprep.subr.bf16.mxu1 %v6403_v49  ;;  %v6069_v48 = vcombine.high %v319_v42, %v343_v43  ;;  %v6071_v49 = vcombine.high %v320_v44, %v344_v45  ;;  %v775_v35 = vld [vmem:[#allocation5 + $0x12d0] sm:$0xff]  ;;  %v776_v37 = vld [vmem:[#allocation5 + $0x12d8] sm:$0xff] }
  0xa0   :  { %4808 = vmatpush2.bf16.xpose.msra.mxu0 %v6400_v54  ;;  %4849 = vmatpush2.bf16.xpose.msra.mxu1 %v6402_v55  ;;  %v6068_v54 = vcombine.low %v319_v42, %v343_v43  ;;  %v6070_v55 = vcombine.low %v320_v44, %v344_v45  ;;  %v703_v42 = vld [vmem:[#allocation5 + $0x1090] sm:$0xff]  ;;  %v704_v44 = vld [vmem:[#allocation5 + $0x1098] sm:$0xff] }
  0xa1   :  { %4809 = vmatprep.subr.bf16.mxu0 %v6353_v56  ;;  %4850 = vmatprep.subr.bf16.mxu1 %v6355_v57  ;;  %v6021_v56 = vcombine.high %v271_v50, %v295_v51  ;;  %v6023_v57 = vcombine.high %v272_v52, %v296_v53  ;;  %v727_v43 = vld [vmem:[#allocation5 + $0x1150] sm:$0xff]  ;;  %v728_v45 = vld [vmem:[#allocation5 + $0x1158] sm:$0xff] }
  0xa8   :  { %4810 = vmatpush2.bf16.xpose.msra.mxu0 %v6352_v62  ;;  %4851 = vmatpush2.bf16.xpose.msra.mxu1 %v6354_v63  ;;  %v6020_v62 = vcombine.low %v271_v50, %v295_v51  ;;  %v6022_v63 = vcombine.low %v272_v52, %v296_v53  ;;  %v655_v50 = vld [vmem:[#allocation5 + $0xf10] sm:$0xff]  ;;  %v656_v52 = vld [vmem:[#allocation5 + $0xf18] sm:$0xff] }
  0xa9   :  { %4811 = vmatprep.subr.bf16.mxu0 %v6305_v0  ;;  %4852 = vmatprep.subr.bf16.mxu1 %v6307_v1  ;;  %v5973_v0 = vcombine.high %v223_v58, %v247_v59  ;;  %v5975_v1 = vcombine.high %v224_v60, %v248_v61  ;;  %v679_v51 = vld [vmem:[#allocation5 + $0xfd0] sm:$0xff]  ;;  %v680_v53 = vld [vmem:[#allocation5 + $0xfd8] sm:$0xff] }
  0xb0   :  { %4812 = vmatpush2.bf16.xpose.msra.mxu0 %v6304_v6  ;;  %4853 = vmatpush2.bf16.xpose.msra.mxu1 %v6306_v7  ;;  %v5972_v6 = vcombine.low %v223_v58, %v247_v59  ;;  %v5974_v7 = vcombine.low %v224_v60, %v248_v61  ;;  %v607_v58 = vld [vmem:[#allocation5 + $0xd90] sm:$0xff]  ;;  %v608_v60 = vld [vmem:[#allocation5 + $0xd98] sm:$0xff] }
  0xb1   :  { %4863 = vmatprep.subr.bf16.mxu0 %v6261_v8  ;;  %4904 = vmatprep.subr.bf16.mxu1 %v6263_v9  ;;  %v5925_v8 = vcombine.high %v175_v2, %v199_v3  ;;  %v5927_v9 = vcombine.high %v176_v4, %v200_v5  ;;  %v631_v59 = vld [vmem:[#allocation5 + $0xe50] sm:$0xff]  ;;  %v632_v61 = vld [vmem:[#allocation5 + $0xe58] sm:$0xff] }
  0xb2   :  { %v560_v4 = vld [vmem:[#allocation5 + $0xc18] sm:$0xff] }
  0xb3   :  { %v584_v5 = vld [vmem:[#allocation5 + $0xcd8] sm:$0xff] }
  0xb7   :  { %4814 = vmatmul.mubr.bf16.vlgmr.msra.gmra.mxu0 %v125_v14  ;;  %4855 = vmatmul.mubr.bf16.vlgmr.msra.gmra.mxu1 %v127_v18  ;;  %v5924_v14 = vcombine.low %v175_v2, %v199_v3  ;;  %v847_v18 = vld [vmem:[#allocation5 + $0x1510] sm:$0xff] }
  0xb8   :  { %4864 = vmatpush1.bf16.xpose.msra.mxu0 %v6260_v19  ;;  %4905 = vmatpush1.bf16.xpose.msra.mxu1 %v6262_v21  ;;  %v871_v19 = vld [vmem:[#allocation5 + $0x15d0] sm:$0xff]  ;;  %v872_v21 = vld [vmem:[#allocation5 + $0x15d8] sm:$0xff] }
  0xb9   :  { %4865 = vmatprep.subr.bf16.mxu0 %v6213_v22  ;;  %4906 = vmatprep.subr.bf16.mxu1 %v6215_v23  ;;  %v6644_v22 = vcombine.low %v895_v10, %v919_v11  ;;  %v6646_v23 = vcombine.low %v896_v12, %v920_v13  ;;  %v559_v2 = vld [vmem:[#allocation5 + $0xc10] sm:$0xff]  ;;  %v513_v10 = vld [vmem:[#allocation5 + $0xaa0] sm:$0xff]  ;;  %v514_v12 = vld [vmem:[#allocation5 + $0xaa8] sm:$0xff] }
  0xba   :  { %4895 = vmatprep.mubr.bf16.mxu0 %v130_v24  ;;  %4936 = vmatprep.mubr.bf16.mxu1 %v132_v25  ;;  %v6597_v24 = vcombine.high %v847_v18, %v871_v19  ;;  %v6599_v25 = vcombine.high %v848_v20, %v872_v21  ;;  %v583_v3 = vld [vmem:[#allocation5 + $0xcd0] sm:$0xff]  ;;  %v537_v11 = vld [vmem:[#allocation5 + $0xb60] sm:$0xff]  ;;  %v538_v13 = vld [vmem:[#allocation5 + $0xb68] sm:$0xff] }
  0xc0   :  { %4866 = vmatpush1.bf16.xpose.msra.mxu0 %v6212_v30  ;;  %4907 = vmatpush1.bf16.xpose.msra.mxu1 %v6214_v31  ;;  %v6596_v30 = vcombine.low %v847_v18, %v871_v19  ;;  %v6598_v31 = vcombine.low %v848_v20, %v872_v21  ;;  %v81_v18 = vld [vmem:[#allocation3 + $0x20] sm:$0xff]  ;;  %v83_v19 = vld [vmem:[#allocation3 + $0x30] sm:$0xff] }
  0xc1   :  { %4867 = vmatprep.subr.bf16.mxu0 %v6165_v32  ;;  %4908 = vmatprep.subr.bf16.mxu1 %v6167_v33  ;;  %v6549_v32 = vcombine.high %v799_v26, %v823_v27  ;;  %v6551_v33 = vcombine.high %v800_v28, %v824_v29  ;;  %v465_v20 = vld [vmem:[#allocation5 + $0x920] sm:$0xff] }
  0xc2   :  { %v489_v21 = vld [vmem:[#allocation5 + $0x9e0] sm:$0xff] }
  0xc8   :  { %4868 = vmatpush1.bf16.xpose.msra.mxu0 %v6164_v38  ;;  %4909 = vmatpush1.bf16.xpose.msra.mxu1 %v6166_v39  ;;  %v6548_v38 = vcombine.low %v799_v26, %v823_v27  ;;  %v6550_v39 = vcombine.low %v800_v28, %v824_v29  ;;  %v131_v26 = vpack.c.bf16 %v83_v19, %v83_v19  ;;  %v88_v28 = vld [vmem:[#allocation3 + $0x58] sm:$0xff]  ;;  %v921_v19 = vld [vmem:[#allocation5 + $0x1760] sm:$0xff] }
  0xc9   :  { %4869 = vmatprep.subr.bf16.mxu0 %v6117_v40  ;;  %4910 = vmatprep.subr.bf16.mxu1 %v6119_v41  ;;  %v6501_v40 = vcombine.high %v751_v34, %v775_v35  ;;  %v6503_v41 = vcombine.high %v752_v36, %v776_v37  ;;  %v6264_v27 = vcombine.low %v513_v10, %v537_v11 }
  0xca   :  { %v6266_v29 = vcombine.low %v514_v12, %v538_v13 }
  0xd0   :  { %4870 = vmatpush1.bf16.xpose.msra.mxu0 %v6116_v46  ;;  %4911 = vmatpush1.bf16.xpose.msra.mxu1 %v6118_v47  ;;  %v6500_v46 = vcombine.low %v751_v34, %v775_v35  ;;  %v6502_v47 = vcombine.low %v752_v36, %v776_v37  ;;  %v417_v34 = vld [vmem:[#allocation5 + $0x7a0] sm:$0xff]  ;;  %v418_v36 = vld [vmem:[#allocation5 + $0x7a8] sm:$0xff] }
  0xd1   :  { %4871 = vmatprep.subr.bf16.mxu0 %v6069_v48  ;;  %4912 = vmatprep.subr.bf16.mxu1 %v6071_v49  ;;  %v6453_v48 = vcombine.high %v703_v42, %v727_v43  ;;  %v6455_v49 = vcombine.high %v704_v44, %v728_v45  ;;  %v441_v35 = vld [vmem:[#allocation5 + $0x860] sm:$0xff]  ;;  %v442_v37 = vld [vmem:[#allocation5 + $0x868] sm:$0xff] }
  0xd8   :  { %4872 = vmatpush1.bf16.xpose.msra.mxu0 %v6068_v54  ;;  %4913 = vmatpush1.bf16.xpose.msra.mxu1 %v6070_v55  ;;  %v6452_v54 = vcombine.low %v703_v42, %v727_v43  ;;  %v6454_v55 = vcombine.low %v704_v44, %v728_v45  ;;  %v369_v42 = vld [vmem:[#allocation5 + $0x620] sm:$0xff]  ;;  %v370_v44 = vld [vmem:[#allocation5 + $0x628] sm:$0xff] }
  0xd9   :  { %4873 = vmatprep.subr.bf16.mxu0 %v6021_v56  ;;  %4914 = vmatprep.subr.bf16.mxu1 %v6023_v57  ;;  %v6405_v56 = vcombine.high %v655_v50, %v679_v51  ;;  %v6407_v57 = vcombine.high %v656_v52, %v680_v53  ;;  %v393_v43 = vld [vmem:[#allocation5 + $0x6e0] sm:$0xff]  ;;  %v394_v45 = vld [vmem:[#allocation5 + $0x6e8] sm:$0xff] }
  0xe0   :  { %4874 = vmatpush1.bf16.xpose.msra.mxu0 %v6020_v62  ;;  %4915 = vmatpush1.bf16.xpose.msra.mxu1 %v6022_v63  ;;  %v6404_v62 = vcombine.low %v655_v50, %v679_v51  ;;  %v6406_v63 = vcombine.low %v656_v52, %v680_v53  ;;  %v321_v50 = vld [vmem:[#allocation5 + $0x4a0] sm:$0xff]  ;;  %v322_v52 = vld [vmem:[#allocation5 + $0x4a8] sm:$0xff] }
  0xe1   :  { %4875 = vmatprep.subr.bf16.mxu0 %v5973_v0  ;;  %4916 = vmatprep.subr.bf16.mxu1 %v5975_v1  ;;  %v6357_v0 = vcombine.high %v607_v58, %v631_v59  ;;  %v6359_v1 = vcombine.high %v608_v60, %v632_v61  ;;  %v345_v51 = vld [vmem:[#allocation5 + $0x560] sm:$0xff]  ;;  %v346_v53 = vld [vmem:[#allocation5 + $0x568] sm:$0xff] }
  0xe8   :  { %4876 = vmatpush1.bf16.xpose.msra.mxu0 %v5972_v6  ;;  %4917 = vmatpush1.bf16.xpose.msra.mxu1 %v5974_v7  ;;  %v6356_v6 = vcombine.low %v607_v58, %v631_v59  ;;  %v6358_v7 = vcombine.low %v608_v60, %v632_v61  ;;  %v273_v58 = vld [vmem:[#allocation5 + $0x320] sm:$0xff]  ;;  %v274_v60 = vld [vmem:[#allocation5 + $0x328] sm:$0xff] }
  0xe9   :  { %4877 = vmatprep.subr.bf16.mxu0 %v5925_v8  ;;  %4918 = vmatprep.subr.bf16.mxu1 %v5927_v9  ;;  %v6309_v8 = vcombine.high %v559_v2, %v583_v3  ;;  %v6311_v9 = vcombine.high %v560_v4, %v584_v5  ;;  %v297_v59 = vld [vmem:[#allocation5 + $0x3e0] sm:$0xff]  ;;  %v298_v61 = vld [vmem:[#allocation5 + $0x3e8] sm:$0xff] }
  0xf0   :  { %4878 = vmatpush1.bf16.xpose.msra.mxu0 %v5924_v14  ;;  %4919 = vmatpush1.bf16.xpose.msra.mxu1 %v5926_v15  ;;  %v6308_v14 = vcombine.low %v559_v2, %v583_v3  ;;  %v6310_v15 = vcombine.low %v560_v4, %v584_v5  ;;  %v225_v2 = vld [vmem:[#allocation5 + $0x1a0] sm:$0xff]  ;;  %v226_v4 = vld [vmem:[#allocation5 + $0x1a8] sm:$0xff] }
  0xf1   :  { %4879 = vmatprep.subr.bf16.mxu0 %v6645_v16  ;;  %4920 = vmatprep.subr.bf16.mxu1 %v6647_v17  ;;  %v6265_v16 = vcombine.high %v513_v10, %v537_v11  ;;  %v6267_v17 = vcombine.high %v514_v12, %v538_v13  ;;  %v249_v3 = vld [vmem:[#allocation5 + $0x260] sm:$0xff]  ;;  %v250_v5 = vld [vmem:[#allocation5 + $0x268] sm:$0xff] }
  0xf2   :  { %v177_v10 = vld [vmem:[#allocation5 + $0x20] sm:$0xff]  ;;  %v178_v12 = vld [vmem:[#allocation5 + $0x28] sm:$0xff] }
  0xf3   :  { %v201_v11 = vld [vmem:[#allocation5 + $0xe0] sm:$0xff]  ;;  %v202_v13 = vld [vmem:[#allocation5 + $0xe8] sm:$0xff] }
  0xf8   :  { %4880 = vmatpush2.bf16.xpose.msra.mxu0 %v6644_v22  ;;  %4921 = vmatpush2.bf16.xpose.msra.mxu1 %v6646_v23  ;;  %v129_v22 = vpack.c.bf16 %v81_v18, %v81_v18  ;;  %v466_v23 = vld [vmem:[#allocation5 + $0x928] sm:$0xff]  ;;  %v897_v18 = vld [vmem:[#allocation5 + $0x16a0] sm:$0xff] }
  0xf9   :  { %4881 = vmatprep.subr.bf16.mxu0 %v6597_v24  ;;  %4922 = vmatprep.subr.bf16.mxu1 %v6599_v25  ;;  %v490_v24 = vld [vmem:[#allocation5 + $0x9e8] sm:$0xff] }
  0xfa   :  { %v86_v25 = vld [vmem:[#allocation3 + $0x48] sm:$0xff] }
 0x100   :  { %4882 = vmatpush2.bf16.xpose.msra.mxu0 %v6596_v30  ;;  %4923 = vmatpush2.bf16.xpose.msra.mxu1 %v6598_v31  ;;  %v6217_v30 = vcombine.high %v465_v20, %v489_v21  ;;  %v6219_v31 = vcombine.high %v466_v23, %v490_v24 }
 0x101   :  { %4883 = vmatprep.subr.bf16.mxu0 %v6549_v32  ;;  %4924 = vmatprep.subr.bf16.mxu1 %v6551_v33  ;;  %v134_v32 = vpack.c.bf16 %v86_v25, %v86_v25  ;;  %v136_v33 = vpack.c.bf16 %v88_v28, %v88_v28  ;;  %v850_v28 = vld [vmem:[#allocation5 + $0x1528] sm:$0xff] }
 0x108   :  { %4884 = vmatpush2.bf16.xpose.msra.mxu0 %v6548_v38  ;;  %4925 = vmatpush2.bf16.xpose.msra.mxu1 %v6550_v39  ;;  %v6216_v38 = vcombine.low %v465_v20, %v489_v21  ;;  %v6218_v39 = vcombine.low %v466_v23, %v490_v24  ;;  %v898_v20 = vld [vmem:[#allocation5 + $0x16a8] sm:$0xff]  ;;  %v5930_v23 = vcombine.low %v178_v12, %v202_v13 }
 0x109   :  { %4885 = vmatprep.subr.bf16.mxu0 %v6501_v40  ;;  %4926 = vmatprep.subr.bf16.mxu1 %v6503_v41  ;;  %v6169_v40 = vcombine.high %v417_v34, %v441_v35  ;;  %v6171_v41 = vcombine.high %v418_v36, %v442_v37  ;;  %v922_v21 = vld [vmem:[#allocation5 + $0x1768] sm:$0xff]  ;;  %v6649_v24 = vcombine.high %v897_v18, %v921_v19 }
 0x10a   :  { %v6651_v25 = vcombine.high %v898_v20, %v922_v21 }
 0x110   :  { %4886 = vmatpush2.bf16.xpose.msra.mxu0 %v6500_v46  ;;  %4927 = vmatpush2.bf16.xpose.msra.mxu1 %v6502_v47  ;;  %v6168_v46 = vcombine.low %v417_v34, %v441_v35  ;;  %v6170_v47 = vcombine.low %v418_v36, %v442_v37 }
 0x111   :  { %4887 = vmatprep.subr.bf16.mxu0 %v6453_v48  ;;  %4928 = vmatprep.subr.bf16.mxu1 %v6455_v49  ;;  %v6121_v48 = vcombine.high %v369_v42, %v393_v43  ;;  %v6123_v49 = vcombine.high %v370_v44, %v394_v45 }
 0x118   :  { %4888 = vmatpush2.bf16.xpose.msra.mxu0 %v6452_v54  ;;  %4929 = vmatpush2.bf16.xpose.msra.mxu1 %v6454_v55  ;;  %v6120_v54 = vcombine.low %v369_v42, %v393_v43  ;;  %v6122_v55 = vcombine.low %v370_v44, %v394_v45  ;;  %v802_v43 = vld [vmem:[#allocation5 + $0x13a8] sm:$0xff] }
 0x119   :  { %4889 = vmatprep.subr.bf16.mxu0 %v6405_v56  ;;  %4930 = vmatprep.subr.bf16.mxu1 %v6407_v57  ;;  %v6073_v56 = vcombine.high %v321_v50, %v345_v51  ;;  %v6075_v57 = vcombine.high %v322_v52, %v346_v53  ;;  %v826_v44 = vld [vmem:[#allocation5 + $0x1468] sm:$0xff] }
 0x120   :  { %4890 = vmatpush2.bf16.xpose.msra.mxu0 %v6404_v62  ;;  %4931 = vmatpush2.bf16.xpose.msra.mxu1 %v6406_v63  ;;  %v6072_v62 = vcombine.low %v321_v50, %v345_v51  ;;  %v6074_v63 = vcombine.low %v322_v52, %v346_v53  ;;  %v6555_v51 = vcombine.high %v802_v43, %v826_v44  ;;  %v753_v52 = vld [vmem:[#allocation5 + $0x1220] sm:$0xff] }
 0x121   :  { %4891 = vmatprep.subr.bf16.mxu0 %v6357_v0  ;;  %4932 = vmatprep.subr.bf16.mxu1 %v6359_v1  ;;  %v6025_v0 = vcombine.high %v273_v58, %v297_v59  ;;  %v6027_v1 = vcombine.high %v274_v60, %v298_v61  ;;  %v777_v53 = vld [vmem:[#allocation5 + $0x12e0] sm:$0xff] }
 0x128   :  { %4892 = vmatpush2.bf16.xpose.msra.mxu0 %v6356_v6  ;;  %4933 = vmatpush2.bf16.xpose.msra.mxu1 %v6358_v7  ;;  %v6024_v6 = vcombine.low %v273_v58, %v297_v59  ;;  %v6026_v7 = vcombine.low %v274_v60, %v298_v61  ;;  %v6505_v58 = vcombine.high %v753_v52, %v777_v53  ;;  %v705_v60 = vld [vmem:[#allocation5 + $0x10a0] sm:$0xff] }
 0x129   :  { %4893 = vmatprep.subr.bf16.mxu0 %v6309_v8  ;;  %4934 = vmatprep.subr.bf16.mxu1 %v6311_v9  ;;  %v5977_v8 = vcombine.high %v225_v2, %v249_v3  ;;  %v5979_v9 = vcombine.high %v226_v4, %v250_v5  ;;  %v729_v61 = vld [vmem:[#allocation5 + $0x1160] sm:$0xff] }
 0x130   :  { %4894 = vmatpush2.bf16.xpose.msra.mxu0 %v6308_v14  ;;  %4935 = vmatpush2.bf16.xpose.msra.mxu1 %v6310_v15  ;;  %v5976_v14 = vcombine.low %v225_v2, %v249_v3  ;;  %v5978_v15 = vcombine.low %v226_v4, %v250_v5  ;;  %v6457_v2 = vcombine.high %v705_v60, %v729_v61  ;;  %v657_v4 = vld [vmem:[#allocation5 + $0xf20] sm:$0xff] }
 0x131   :  { %4945 = vmatprep.subr.bf16.mxu0 %v6265_v16  ;;  %4986 = vmatprep.subr.bf16.mxu1 %v6267_v17  ;;  %v5929_v16 = vcombine.high %v177_v10, %v201_v11  ;;  %v5931_v17 = vcombine.high %v178_v12, %v202_v13  ;;  %v681_v5 = vld [vmem:[#allocation5 + $0xfe0] sm:$0xff] }
 0x132   :  { %v609_v12 = vld [vmem:[#allocation5 + $0xda0] sm:$0xff] }
 0x133   :  { %v633_v13 = vld [vmem:[#allocation5 + $0xe60] sm:$0xff] }
 0x137   :  { %4896 = vmatmul.mubr.bf16.vlgmr.msra.gmra.mxu0 %v129_v22  ;;  %4937 = vmatmul.mubr.bf16.vlgmr.msra.gmra.mxu1 %v131_v26  ;;  %v5928_v22 = vcombine.low %v177_v10, %v201_v11  ;;  %v849_v26 = vld [vmem:[#allocation5 + $0x1520] sm:$0xff]  ;;  %v6409_v10 = vcombine.high %v657_v4, %v681_v5 }
 0x138   :  { %4946 = vmatpush1.bf16.xpose.msra.mxu0 %v6264_v27  ;;  %4987 = vmatpush1.bf16.xpose.msra.mxu1 %v6266_v29  ;;  %v873_v27 = vld [vmem:[#allocation5 + $0x15e0] sm:$0xff]  ;;  %v874_v29 = vld [vmem:[#allocation5 + $0x15e8] sm:$0xff] }
 0x139   :  { %4947 = vmatprep.subr.bf16.mxu0 %v6217_v30  ;;  %4988 = vmatprep.subr.bf16.mxu1 %v6219_v31  ;;  %v6648_v30 = vcombine.low %v897_v18, %v921_v19  ;;  %v6650_v31 = vcombine.low %v898_v20, %v922_v21  ;;  %v6361_v18 = vcombine.high %v609_v12, %v633_v13  ;;  %v561_v20 = vld [vmem:[#allocation5 + $0xc20] sm:$0xff] }
 0x13a   :  { %4977 = vmatprep.mubr.bf16.mxu0 %v134_v32  ;;  %5018 = vmatprep.mubr.bf16.mxu1 %v136_v33  ;;  %v6601_v32 = vcombine.high %v849_v26, %v873_v27  ;;  %v6603_v33 = vcombine.high %v850_v28, %v874_v29  ;;  %v585_v21 = vld [vmem:[#allocation5 + $0xce0] sm:$0xff] }
 0x140   :  { %4948 = vmatpush1.bf16.xpose.msra.mxu0 %v6216_v38  ;;  %4989 = vmatpush1.bf16.xpose.msra.mxu1 %v6218_v39  ;;  %v801_v39 = vld [vmem:[#allocation5 + $0x13a0] sm:$0xff] }
 0x141   :  { %4949 = vmatprep.subr.bf16.mxu0 %v6169_v40  ;;  %4990 = vmatprep.subr.bf16.mxu1 %v6171_v41  ;;  %v825_v40 = vld [vmem:[#allocation5 + $0x1460] sm:$0xff] }
 0x148   :  { %4950 = vmatpush1.bf16.xpose.msra.mxu0 %v6168_v46  ;;  %4991 = vmatpush1.bf16.xpose.msra.mxu1 %v6170_v47  ;;  %v6600_v46 = vcombine.low %v849_v26, %v873_v27  ;;  %v6313_v26 = vcombine.high %v561_v20, %v585_v21 }
 0x149   :  { %4951 = vmatprep.subr.bf16.mxu0 %v6121_v48  ;;  %4992 = vmatprep.subr.bf16.mxu1 %v6123_v49  ;;  %v6602_v48 = vcombine.low %v850_v28, %v874_v29  ;;  %v6553_v49 = vcombine.high %v801_v39, %v825_v40  ;;  %v515_v28 = vld [vmem:[#allocation5 + $0xab0] sm:$0xff] }
 0x14a   :  { %v539_v29 = vld [vmem:[#allocation5 + $0xb70] sm:$0xff] }
 0x150   :  { %4952 = vmatpush1.bf16.xpose.msra.mxu0 %v6120_v54  ;;  %4993 = vmatpush1.bf16.xpose.msra.mxu1 %v6122_v55  ;;  %v754_v54 = vld [vmem:[#allocation5 + $0x1228] sm:$0xff] }
 0x151   :  { %4953 = vmatprep.subr.bf16.mxu0 %v6073_v56  ;;  %4994 = vmatprep.subr.bf16.mxu1 %v6075_v57  ;;  %v778_v55 = vld [vmem:[#allocation5 + $0x12e8] sm:$0xff]  ;;  %v6552_v56 = vcombine.low %v801_v39, %v825_v40  ;;  %v6554_v57 = vcombine.low %v802_v43, %v826_v44  ;;  %v467_v39 = vld [vmem:[#allocation5 + $0x930] sm:$0xff]  ;;  %v468_v43 = vld [vmem:[#allocation5 + $0x938] sm:$0xff] }
 0x152   :  { %v6507_v59 = vcombine.high %v754_v54, %v778_v55  ;;  %v491_v40 = vld [vmem:[#allocation5 + $0x9f0] sm:$0xff]  ;;  %v492_v44 = vld [vmem:[#allocation5 + $0x9f8] sm:$0xff] }
 0x158   :  { %4954 = vmatpush1.bf16.xpose.msra.mxu0 %v6072_v62  ;;  %4995 = vmatpush1.bf16.xpose.msra.mxu1 %v6074_v63  ;;  %v706_v62 = vld [vmem:[#allocation5 + $0x10a8] sm:$0xff] }
 0x159   :  { %4955 = vmatprep.subr.bf16.mxu0 %v6025_v0  ;;  %4996 = vmatprep.subr.bf16.mxu1 %v6027_v1  ;;  %v730_v63 = vld [vmem:[#allocation5 + $0x1168] sm:$0xff]  ;;  %v6504_v0 = vcombine.low %v753_v52, %v777_v53  ;;  %v6506_v1 = vcombine.low %v754_v54, %v778_v55  ;;  %v419_v54 = vld [vmem:[#allocation5 + $0x7b0] sm:$0xff] }
 0x15a   :  { %v6459_v3 = vcombine.high %v706_v62, %v730_v63  ;;  %v443_v55 = vld [vmem:[#allocation5 + $0x870] sm:$0xff] }
 0x160   :  { %4956 = vmatpush1.bf16.xpose.msra.mxu0 %v6024_v6  ;;  %4997 = vmatpush1.bf16.xpose.msra.mxu1 %v6026_v7  ;;  %v658_v6 = vld [vmem:[#allocation5 + $0xf28] sm:$0xff] }
 0x161   :  { %4957 = vmatprep.subr.bf16.mxu0 %v5977_v8  ;;  %4998 = vmatprep.subr.bf16.mxu1 %v5979_v9  ;;  %v682_v7 = vld [vmem:[#allocation5 + $0xfe8] sm:$0xff]  ;;  %v6456_v8 = vcombine.low %v705_v60, %v729_v61  ;;  %v6458_v9 = vcombine.low %v706_v62, %v730_v63  ;;  %v6173_v60 = vcombine.high %v419_v54, %v443_v55  ;;  %v371_v62 = vld [vmem:[#allocation5 + $0x630] sm:$0xff] }
 0x162   :  { %v6411_v11 = vcombine.high %v658_v6, %v682_v7  ;;  %v395_v63 = vld [vmem:[#allocation5 + $0x6f0] sm:$0xff] }
 0x168   :  { %4958 = vmatpush1.bf16.xpose.msra.mxu0 %v5976_v14  ;;  %4999 = vmatpush1.bf16.xpose.msra.mxu1 %v5978_v15  ;;  %v610_v14 = vld [vmem:[#allocation5 + $0xda8] sm:$0xff] }
 0x169   :  { %4959 = vmatprep.subr.bf16.mxu0 %v5929_v16  ;;  %5000 = vmatprep.subr.bf16.mxu1 %v5931_v17  ;;  %v634_v15 = vld [vmem:[#allocation5 + $0xe68] sm:$0xff]  ;;  %v6408_v16 = vcombine.low %v657_v4, %v681_v5  ;;  %v6410_v17 = vcombine.low %v658_v6, %v682_v7  ;;  %v6125_v4 = vcombine.high %v371_v62, %v395_v63  ;;  %v323_v6 = vld [vmem:[#allocation5 + $0x4b0] sm:$0xff] }
 0x16a   :  { %v6363_v19 = vcombine.high %v610_v14, %v634_v15  ;;  %v347_v7 = vld [vmem:[#allocation5 + $0x570] sm:$0xff] }
 0x170   :  { %4960 = vmatpush1.bf16.xpose.msra.mxu0 %v5928_v22  ;;  %5001 = vmatpush1.bf16.xpose.msra.mxu1 %v5930_v23  ;;  %v562_v22 = vld [vmem:[#allocation5 + $0xc28] sm:$0xff] }
 0x171   :  { %4961 = vmatprep.subr.bf16.mxu0 %v6649_v24  ;;  %5002 = vmatprep.subr.bf16.mxu1 %v6651_v25  ;;  %v586_v23 = vld [vmem:[#allocation5 + $0xce8] sm:$0xff]  ;;  %v6360_v24 = vcombine.low %v609_v12, %v633_v13  ;;  %v6362_v25 = vcombine.low %v610_v14, %v634_v15  ;;  %v6077_v12 = vcombine.high %v323_v6, %v347_v7  ;;  %v275_v14 = vld [vmem:[#allocation5 + $0x330] sm:$0xff] }
 0x172   :  { %v6315_v27 = vcombine.high %v562_v22, %v586_v23  ;;  %v299_v15 = vld [vmem:[#allocation5 + $0x3f0] sm:$0xff] }
 0x177   :  { %v4815_v34 = vpop.f32.mrf.mxu0  ;;  %v4856_v35 = vpop.f32.mrf.mxu1 }
 0x178   :  { %4962 = vmatpush2.bf16.xpose.msra.mxu0 %v6648_v30  ;;  %v6868_v36 = vadd.f32 %v4856_v35, %v4815_v34  ;;  %5003 = vmatpush2.bf16.xpose.msra.mxu1 %v6650_v31  ;;  %v516_v30 = vld [vmem:[#allocation5 + $0xab8] sm:$0xff]  ;;  %v6269_v34 = vcombine.high %v515_v28, %v539_v29 }
 0x179   :  { %v4817_v37 = vpop.f32.mrf.mxu0  ;;  %4963 = vmatprep.subr.bf16.mxu0 %v6601_v32  ;;  %v4858_v38 = vpop.f32.mrf.mxu1  ;;  %5004 = vmatprep.subr.bf16.mxu1 %v6603_v33  ;;  %v540_v31 = vld [vmem:[#allocation5 + $0xb78] sm:$0xff]  ;;  %v6312_v32 = vcombine.low %v561_v20, %v585_v21  ;;  %v6314_v33 = vcombine.low %v562_v22, %v586_v23  ;;  %v6029_v20 = vcombine.high %v275_v14, %v299_v15  ;;  %v227_v22 = vld [vmem:[#allocation5 + $0x1b0] sm:$0xff] }
 0x17a   :  { %v6870_v41 = vadd.f32 %v4858_v38, %v4817_v37  ;;  %v6271_v35 = vcombine.high %v516_v30, %v540_v31  ;;  %v85_v37 = vld [vmem:[#allocation3 + $0x40] sm:$0xff]  ;;  %v87_v38 = vld [vmem:[#allocation3 + $0x50] sm:$0xff] }
 0x17b   :  { %v4819_v42 = vpop.f32.mrf.mxu0  ;;  %v4860_v45 = vpop.f32.mrf.mxu1  ;;  %v251_v23 = vld [vmem:[#allocation5 + $0x270] sm:$0xff] }
 0x17c   :  { %v133_v42 = vpack.c.bf16 %v85_v37, %v85_v37  ;;  %v90_v45 = vld [vmem:[#allocation3 + $0x68] sm:$0xff] }
 0x17d   :  { %v4820_v47 = vpop.f32.mrf.mxu0  ;;  %v4861_v50 = vpop.f32.mrf.mxu1  ;;  %v138_v52 = vpack.c.bf16 %v90_v45, %v90_v45 }
 0x17e   :  { %v6268_v47 = vcombine.low %v515_v28, %v539_v29  ;;  %v6221_v50 = vcombine.high %v467_v39, %v491_v40  ;;  %v5981_v28 = vcombine.high %v227_v22, %v251_v23 }
 0x180   :  { %4964 = vmatpush2.bf16.xpose.msra.mxu0 %v6600_v46  ;;  %5005 = vmatpush2.bf16.xpose.msra.mxu1 %v6602_v48  ;;  %v135_v46 = vpack.c.bf16 %v87_v38, %v87_v38  ;;  %v92_v48 = vld [vmem:[#allocation3 + $0x78] sm:$0xff] }
 0x181   :  { %4965 = vmatprep.subr.bf16.mxu0 %v6553_v49  ;;  %5006 = vmatprep.subr.bf16.mxu1 %v6555_v51  ;;  %v6270_v49 = vcombine.low %v516_v30, %v540_v31  ;;  %v6223_v51 = vcombine.high %v468_v43, %v492_v44  ;;  %v140_v53 = vpack.c.bf16 %v92_v48, %v92_v48  ;;  %v179_v30 = vld [vmem:[#allocation5 + $0x30] sm:$0xff] }
 0x182   :  { %v203_v31 = vld [vmem:[#allocation5 + $0xf0] sm:$0xff] }
 0x183   :  { %v5933_v37 = vcombine.high %v179_v30, %v203_v31  ;;  %v851_v48 = vld [vmem:[#allocation5 + $0x1530] sm:$0xff] }
 0x188   :  { %4966 = vmatpush2.bf16.xpose.msra.mxu0 %v6552_v56  ;;  %5007 = vmatpush2.bf16.xpose.msra.mxu1 %v6554_v57  ;;  %v420_v56 = vld [vmem:[#allocation5 + $0x7b8] sm:$0xff] }
 0x189   :  { %4967 = vmatprep.subr.bf16.mxu0 %v6505_v58  ;;  %5008 = vmatprep.subr.bf16.mxu1 %v6507_v59  ;;  %v444_v57 = vld [vmem:[#allocation5 + $0x878] sm:$0xff]  ;;  %v6220_v58 = vcombine.low %v467_v39, %v491_v40  ;;  %v6222_v59 = vcombine.low %v468_v43, %v492_v44  ;;  %v899_v39 = vld [vmem:[#allocation5 + $0x16b0] sm:$0xff]  ;;  %v5932_v44 = vcombine.low %v179_v30, %v203_v31 }
 0x18a   :  { %v6175_v61 = vcombine.high %v420_v56, %v444_v57  ;;  %v923_v40 = vld [vmem:[#allocation5 + $0x1770] sm:$0xff]  ;;  %v924_v43 = vld [vmem:[#allocation5 + $0x1778] sm:$0xff] }
 0x190   :  { %4968 = vmatpush2.bf16.xpose.msra.mxu0 %v6504_v0  ;;  %5009 = vmatpush2.bf16.xpose.msra.mxu1 %v6506_v1  ;;  %v372_v0 = vld [vmem:[#allocation5 + $0x638] sm:$0xff] }
 0x191   :  { %4969 = vmatprep.subr.bf16.mxu0 %v6457_v2  ;;  %5010 = vmatprep.subr.bf16.mxu1 %v6459_v3  ;;  %v396_v1 = vld [vmem:[#allocation5 + $0x6f8] sm:$0xff]  ;;  %v6172_v2 = vcombine.low %v419_v54, %v443_v55  ;;  %v6174_v3 = vcombine.low %v420_v56, %v444_v57 }
 0x192   :  { %v6127_v5 = vcombine.high %v372_v0, %v396_v1 }
 0x198   :  { %4970 = vmatpush2.bf16.xpose.msra.mxu0 %v6456_v8  ;;  %5011 = vmatpush2.bf16.xpose.msra.mxu1 %v6458_v9  ;;  %v324_v8 = vld [vmem:[#allocation5 + $0x4b8] sm:$0xff] }
 0x199   :  { %4971 = vmatprep.subr.bf16.mxu0 %v6409_v10  ;;  %5012 = vmatprep.subr.bf16.mxu1 %v6411_v11  ;;  %v348_v9 = vld [vmem:[#allocation5 + $0x578] sm:$0xff]  ;;  %v6124_v10 = vcombine.low %v371_v62, %v395_v63  ;;  %v6126_v11 = vcombine.low %v372_v0, %v396_v1  ;;  %v803_v63 = vld [vmem:[#allocation5 + $0x13b0] sm:$0xff] }
 0x19a   :  { %v6079_v13 = vcombine.high %v324_v8, %v348_v9  ;;  %v827_v0 = vld [vmem:[#allocation5 + $0x1470] sm:$0xff] }
 0x1a0   :  { %4972 = vmatpush2.bf16.xpose.msra.mxu0 %v6408_v16  ;;  %5013 = vmatpush2.bf16.xpose.msra.mxu1 %v6410_v17  ;;  %v276_v16 = vld [vmem:[#allocation5 + $0x338] sm:$0xff] }
 0x1a1   :  { %4973 = vmatprep.subr.bf16.mxu0 %v6361_v18  ;;  %5014 = vmatprep.subr.bf16.mxu1 %v6363_v19  ;;  %v300_v17 = vld [vmem:[#allocation5 + $0x3f8] sm:$0xff]  ;;  %v6076_v18 = vcombine.low %v323_v6, %v347_v7  ;;  %v6078_v19 = vcombine.low %v324_v8, %v348_v9  ;;  %v6557_v8 = vcombine.high %v803_v63, %v827_v0 }
 0x1a2   :  { %v6031_v21 = vcombine.high %v276_v16, %v300_v17 }
 0x1a8   :  { %4974 = vmatpush2.bf16.xpose.msra.mxu0 %v6360_v24  ;;  %5015 = vmatpush2.bf16.xpose.msra.mxu1 %v6362_v25  ;;  %v228_v24 = vld [vmem:[#allocation5 + $0x1b8] sm:$0xff] }
 0x1a9   :  { %4975 = vmatprep.subr.bf16.mxu0 %v6313_v26  ;;  %5016 = vmatprep.subr.bf16.mxu1 %v6315_v27  ;;  %v252_v25 = vld [vmem:[#allocation5 + $0x278] sm:$0xff]  ;;  %v6028_v26 = vcombine.low %v275_v14, %v299_v15  ;;  %v6030_v27 = vcombine.low %v276_v16, %v300_v17  ;;  %v6556_v14 = vcombine.low %v803_v63, %v827_v0  ;;  %v469_v63 = vld [vmem:[#allocation5 + $0x940] sm:$0xff] }
 0x1aa   :  { %v5983_v29 = vcombine.high %v228_v24, %v252_v25  ;;  %v493_v0 = vld [vmem:[#allocation5 + $0xa00] sm:$0xff] }
 0x1b0   :  { %4976 = vmatpush2.bf16.xpose.msra.mxu0 %v6312_v32  ;;  %5017 = vmatpush2.bf16.xpose.msra.mxu1 %v6314_v33  ;;  %v180_v32 = vld [vmem:[#allocation5 + $0x38] sm:$0xff] }
 0x1b1   :  { %5027 = vmatprep.subr.bf16.mxu0 %v6269_v34  ;;  %5068 = vmatprep.subr.bf16.mxu1 %v6271_v35  ;;  %v204_v33 = vld [vmem:[#allocation5 + $0xf8] sm:$0xff]  ;;  %v5980_v34 = vcombine.low %v227_v22, %v251_v23  ;;  %v5982_v35 = vcombine.low %v228_v24, %v252_v25 }
 0x1b2   :  { %v5935_v38 = vcombine.high %v180_v32, %v204_v33  ;;  %v5934_v45 = vcombine.low %v180_v32, %v204_v33 }
 0x1b7   :  { %4978 = vmatmul.mubr.bf16.vlgmr.msra.gmra.mxu0 %v133_v42  ;;  %5019 = vmatmul.mubr.bf16.vlgmr.msra.gmra.mxu1 %v135_v46  ;;  %v900_v42 = vld [vmem:[#allocation5 + $0x16b8] sm:$0xff]  ;;  %v6653_v46 = vcombine.high %v899_v39, %v923_v40 }
 0x1b8   :  { %5028 = vmatpush1.bf16.xpose.msra.mxu0 %v6268_v47  ;;  %5069 = vmatpush1.bf16.xpose.msra.mxu1 %v6270_v49  ;;  %v6655_v47 = vcombine.high %v900_v42, %v924_v43  ;;  %v875_v49 = vld [vmem:[#allocation5 + $0x15f0] sm:$0xff] }
 0x1b9   :  { %5029 = vmatprep.subr.bf16.mxu0 %v6221_v50  ;;  %5070 = vmatprep.subr.bf16.mxu1 %v6223_v51  ;;  %v852_v50 = vld [vmem:[#allocation5 + $0x1538] sm:$0xff]  ;;  %v6605_v54 = vcombine.high %v851_v48, %v875_v49 }
 0x1ba   :  { %5059 = vmatprep.mubr.bf16.mxu0 %v138_v52  ;;  %5100 = vmatprep.mubr.bf16.mxu1 %v140_v53  ;;  %v876_v51 = vld [vmem:[#allocation5 + $0x15f8] sm:$0xff]  ;;  %v6652_v52 = vcombine.low %v899_v39, %v923_v40  ;;  %v6654_v53 = vcombine.low %v900_v42, %v924_v43 }
 0x1bb   :  { %v6607_v55 = vcombine.high %v852_v50, %v876_v51  ;;  %v6606_v7 = vcombine.low %v852_v50, %v876_v51 }
 0x1c0   :  { %5030 = vmatpush1.bf16.xpose.msra.mxu0 %v6220_v58  ;;  %5071 = vmatpush1.bf16.xpose.msra.mxu1 %v6222_v59 }
 0x1c1   :  { %5031 = vmatprep.subr.bf16.mxu0 %v6173_v60  ;;  %5072 = vmatprep.subr.bf16.mxu1 %v6175_v61 }
 0x1c8   :  { %5032 = vmatpush1.bf16.xpose.msra.mxu0 %v6172_v2  ;;  %5073 = vmatpush1.bf16.xpose.msra.mxu1 %v6174_v3  ;;  %v804_v2 = vld [vmem:[#allocation5 + $0x13b8] sm:$0xff] }
 0x1c9   :  { %5033 = vmatprep.subr.bf16.mxu0 %v6125_v4  ;;  %5074 = vmatprep.subr.bf16.mxu1 %v6127_v5  ;;  %v828_v3 = vld [vmem:[#allocation5 + $0x1478] sm:$0xff] }
 0x1ca   :  { %v6558_v15 = vcombine.low %v804_v2, %v828_v3 }
 0x1d0   :  { %5034 = vmatpush1.bf16.xpose.msra.mxu0 %v6124_v10  ;;  %5075 = vmatpush1.bf16.xpose.msra.mxu1 %v6126_v11  ;;  %v6559_v10 = vcombine.high %v804_v2, %v828_v3  ;;  %v779_v11 = vld [vmem:[#allocation5 + $0x12f0] sm:$0xff]  ;;  %v470_v2 = vld [vmem:[#allocation5 + $0x948] sm:$0xff] }
 0x1d1   :  { %5035 = vmatprep.subr.bf16.mxu0 %v6077_v12  ;;  %5076 = vmatprep.subr.bf16.mxu1 %v6079_v13  ;;  %v756_v12 = vld [vmem:[#allocation5 + $0x1238] sm:$0xff]  ;;  %v494_v3 = vld [vmem:[#allocation5 + $0xa08] sm:$0xff] }
 0x1d2   :  { %v780_v13 = vld [vmem:[#allocation5 + $0x12f8] sm:$0xff] }
 0x1d3   :  { %v6511_v17 = vcombine.high %v756_v12, %v780_v13  ;;  %v6510_v23 = vcombine.low %v756_v12, %v780_v13  ;;  %v421_v12 = vld [vmem:[#allocation5 + $0x7c0] sm:$0xff] }
 0x1d4   :  { %v445_v13 = vld [vmem:[#allocation5 + $0x880] sm:$0xff] }
 0x1d8   :  { %5036 = vmatpush1.bf16.xpose.msra.mxu0 %v6076_v18  ;;  %5077 = vmatpush1.bf16.xpose.msra.mxu1 %v6078_v19  ;;  %v707_v18 = vld [vmem:[#allocation5 + $0x10b0] sm:$0xff] }
 0x1d9   :  { %5037 = vmatprep.subr.bf16.mxu0 %v6029_v20  ;;  %5078 = vmatprep.subr.bf16.mxu1 %v6031_v21  ;;  %v731_v19 = vld [vmem:[#allocation5 + $0x1170] sm:$0xff]  ;;  %v708_v20 = vld [vmem:[#allocation5 + $0x10b8] sm:$0xff] }
 0x1da   :  { %v732_v21 = vld [vmem:[#allocation5 + $0x1178] sm:$0xff]  ;;  %v6461_v24 = vcombine.high %v707_v18, %v731_v19  ;;  %v6460_v30 = vcombine.low %v707_v18, %v731_v19  ;;  %v6177_v18 = vcombine.high %v421_v12, %v445_v13 }
 0x1db   :  { %v6463_v25 = vcombine.high %v708_v20, %v732_v21  ;;  %v6462_v31 = vcombine.low %v708_v20, %v732_v21  ;;  %v373_v20 = vld [vmem:[#allocation5 + $0x640] sm:$0xff] }
 0x1dc   :  { %v397_v21 = vld [vmem:[#allocation5 + $0x700] sm:$0xff] }
 0x1e0   :  { %5038 = vmatpush1.bf16.xpose.msra.mxu0 %v6028_v26  ;;  %5079 = vmatpush1.bf16.xpose.msra.mxu1 %v6030_v27  ;;  %v659_v26 = vld [vmem:[#allocation5 + $0xf30] sm:$0xff] }
 0x1e1   :  { %5039 = vmatprep.subr.bf16.mxu0 %v5981_v28  ;;  %5080 = vmatprep.subr.bf16.mxu1 %v5983_v29  ;;  %v683_v27 = vld [vmem:[#allocation5 + $0xff0] sm:$0xff]  ;;  %v660_v28 = vld [vmem:[#allocation5 + $0xf38] sm:$0xff] }
 0x1e2   :  { %v684_v29 = vld [vmem:[#allocation5 + $0xff8] sm:$0xff]  ;;  %v6413_v32 = vcombine.high %v659_v26, %v683_v27  ;;  %v6412_v39 = vcombine.low %v659_v26, %v683_v27  ;;  %v6129_v26 = vcombine.high %v373_v20, %v397_v21 }
 0x1e3   :  { %v6415_v33 = vcombine.high %v660_v28, %v684_v29  ;;  %v6414_v40 = vcombine.low %v660_v28, %v684_v29  ;;  %v325_v28 = vld [vmem:[#allocation5 + $0x4c0] sm:$0xff] }
 0x1e4   :  { %v349_v29 = vld [vmem:[#allocation5 + $0x580] sm:$0xff] }
 0x1e8   :  { %5040 = vmatpush1.bf16.xpose.msra.mxu0 %v5980_v34  ;;  %5081 = vmatpush1.bf16.xpose.msra.mxu1 %v5982_v35  ;;  %v611_v34 = vld [vmem:[#allocation5 + $0xdb0] sm:$0xff] }
 0x1e9   :  { %5041 = vmatprep.subr.bf16.mxu0 %v5933_v37  ;;  %5082 = vmatprep.subr.bf16.mxu1 %v5935_v38  ;;  %v635_v35 = vld [vmem:[#allocation5 + $0xe70] sm:$0xff]  ;;  %v612_v37 = vld [vmem:[#allocation5 + $0xdb8] sm:$0xff] }
 0x1ea   :  { %v636_v38 = vld [vmem:[#allocation5 + $0xe78] sm:$0xff]  ;;  %v6365_v42 = vcombine.high %v611_v34, %v635_v35 }
 0x1eb   :  { %v6367_v43 = vcombine.high %v612_v37, %v636_v38 }
 0x1f0   :  { %5042 = vmatpush1.bf16.xpose.msra.mxu0 %v5932_v44  ;;  %5083 = vmatpush1.bf16.xpose.msra.mxu1 %v5934_v45  ;;  %v563_v44 = vld [vmem:[#allocation5 + $0xc30] sm:$0xff] }
 0x1f1   :  { %5043 = vmatprep.subr.bf16.mxu0 %v6653_v46  ;;  %5084 = vmatprep.subr.bf16.mxu1 %v6655_v47  ;;  %v587_v45 = vld [vmem:[#allocation5 + $0xcf0] sm:$0xff]  ;;  %v564_v46 = vld [vmem:[#allocation5 + $0xc38] sm:$0xff] }
 0x1f2   :  { %v588_v47 = vld [vmem:[#allocation5 + $0xcf8] sm:$0xff]  ;;  %v6317_v50 = vcombine.high %v563_v44, %v587_v45 }
 0x1f3   :  { %v6319_v51 = vcombine.high %v564_v46, %v588_v47 }
 0x1f7   :  { %v4897_v56 = vpop.f32.mrf.mxu0  ;;  %v4938_v58 = vpop.f32.mrf.mxu1 }
 0x1f8   :  { %v4898_v57 = vadd.f32 %v4897_v56, %v6868_v36  ;;  %5044 = vmatpush2.bf16.xpose.msra.mxu0 %v6652_v52  ;;  %5085 = vmatpush2.bf16.xpose.msra.mxu1 %v6654_v53  ;;  %v6604_v36 = vcombine.low %v851_v48, %v875_v49  ;;  %v6364_v48 = vcombine.low %v611_v34, %v635_v35  ;;  %v517_v52 = vld [vmem:[#allocation5 + $0xac0] sm:$0xff] }
 0x1f9   :  { %v4899_v59 = vpop.f32.mrf.mxu0  ;;  %5045 = vmatprep.subr.bf16.mxu0 %v6605_v54  ;;  %v4940_v62 = vpop.f32.mrf.mxu1  ;;  %5086 = vmatprep.subr.bf16.mxu1 %v6607_v55  ;;  %v6366_v49 = vcombine.low %v612_v37, %v636_v38  ;;  %v541_v53 = vld [vmem:[#allocation5 + $0xb80] sm:$0xff]  ;;  %v518_v54 = vld [vmem:[#allocation5 + $0xac8] sm:$0xff]  ;;  %v6316_v56 = vcombine.low %v563_v44, %v587_v45  ;;  %v6081_v34 = vcombine.high %v325_v28, %v349_v29 }
 0x1fa   :  { %v6873_v60 = vadd.f32 %v4938_v58, %v4898_v57  ;;  %v4900_v61 = vadd.f32 %v4899_v59, %v6870_v41  ;;  %v755_v41 = vld [vmem:[#allocation5 + $0x1230] sm:$0xff]  ;;  %v542_v55 = vld [vmem:[#allocation5 + $0xb88] sm:$0xff]  ;;  %v6318_v57 = vcombine.low %v564_v46, %v588_v47  ;;  %v6273_v58 = vcombine.high %v517_v52, %v541_v53  ;;  %v277_v37 = vld [vmem:[#allocation5 + $0x340] sm:$0xff] }
 0x1fb   :  { %v4901_v1 = vpop.f32.mrf.mxu0  ;;  %v4942_v5 = vpop.f32.mrf.mxu1  ;;  %v6509_v16 = vcombine.high %v755_v41, %v779_v11  ;;  %v6508_v22 = vcombine.low %v755_v41, %v779_v11  ;;  %v6275_v59 = vcombine.high %v518_v54, %v542_v55  ;;  %v301_v38 = vld [vmem:[#allocation5 + $0x400] sm:$0xff] }
 0x1fc   :  { %v6876_v4 = vadd.f32 %v4940_v62, %v4900_v61  ;;  %v89_v61 = vld [vmem:[#allocation3 + $0x60] sm:$0xff]  ;;  %v91_v62 = vld [vmem:[#allocation3 + $0x70] sm:$0xff]  ;;  %v94_v5 = vld [vmem:[#allocation3 + $0x88] sm:$0xff]  ;;  %v6033_v44 = vcombine.high %v277_v37, %v301_v38 }
 0x1fd   :  { %v4902_v6 = vpop.f32.mrf.mxu0  ;;  %v4943_v9 = vpop.f32.mrf.mxu1  ;;  %v137_v1 = vpack.c.bf16 %v89_v61, %v89_v61  ;;  %v142_v41 = vpack.c.bf16 %v94_v5, %v94_v5  ;;  %v229_v46 = vld [vmem:[#allocation5 + $0x1c0] sm:$0xff] }
 0x1fe   :  { %v6272_v6 = vcombine.low %v517_v52, %v541_v53  ;;  %v6225_v9 = vcombine.high %v469_v63, %v493_v0  ;;  %v253_v47 = vld [vmem:[#allocation5 + $0x280] sm:$0xff] }
 0x1ff   :  { %v5985_v52 = vcombine.high %v229_v46, %v253_v47 }
 0x200   :  { %5046 = vmatpush2.bf16.xpose.msra.mxu0 %v6604_v36  ;;  %5087 = vmatpush2.bf16.xpose.msra.mxu1 %v6606_v7  ;;  %v139_v36 = vpack.c.bf16 %v91_v62, %v91_v62  ;;  %v96_v7 = vld [vmem:[#allocation3 + $0x98] sm:$0xff] }
 0x201   :  { %5047 = vmatprep.subr.bf16.mxu0 %v6557_v8  ;;  %5088 = vmatprep.subr.bf16.mxu1 %v6559_v10  ;;  %v6274_v8 = vcombine.low %v518_v54, %v542_v55  ;;  %v6227_v10 = vcombine.high %v470_v2, %v494_v3  ;;  %v144_v11 = vpack.c.bf16 %v96_v7, %v96_v7  ;;  %v181_v54 = vld [vmem:[#allocation5 + $0x40] sm:$0xff] }
 0x202   :  { %v205_v55 = vld [vmem:[#allocation5 + $0x100] sm:$0xff] }
 0x203   :  { %v5937_v61 = vcombine.high %v181_v54, %v205_v55  ;;  %v853_v7 = vld [vmem:[#allocation5 + $0x1540] sm:$0xff] }
 0x208   :  { %5048 = vmatpush2.bf16.xpose.msra.mxu0 %v6556_v14  ;;  %5089 = vmatpush2.bf16.xpose.msra.mxu1 %v6558_v15  ;;  %v422_v14 = vld [vmem:[#allocation5 + $0x7c8] sm:$0xff] }
 0x209   :  { %5049 = vmatprep.subr.bf16.mxu0 %v6509_v16  ;;  %5090 = vmatprep.subr.bf16.mxu1 %v6511_v17  ;;  %v446_v15 = vld [vmem:[#allocation5 + $0x888] sm:$0xff]  ;;  %v6224_v16 = vcombine.low %v469_v63, %v493_v0  ;;  %v6226_v17 = vcombine.low %v470_v2, %v494_v3  ;;  %v901_v63 = vld [vmem:[#allocation5 + $0x16c0] sm:$0xff]  ;;  %v5936_v3 = vcombine.low %v181_v54, %v205_v55 }
 0x20a   :  { %v6179_v19 = vcombine.high %v422_v14, %v446_v15  ;;  %v925_v0 = vld [vmem:[#allocation5 + $0x1780] sm:$0xff]  ;;  %v926_v2 = vld [vmem:[#allocation5 + $0x1788] sm:$0xff] }
 0x210   :  { %5050 = vmatpush2.bf16.xpose.msra.mxu0 %v6508_v22  ;;  %5091 = vmatpush2.bf16.xpose.msra.mxu1 %v6510_v23  ;;  %v374_v22 = vld [vmem:[#allocation5 + $0x648] sm:$0xff] }
 0x211   :  { %5051 = vmatprep.subr.bf16.mxu0 %v6461_v24  ;;  %5092 = vmatprep.subr.bf16.mxu1 %v6463_v25  ;;  %v398_v23 = vld [vmem:[#allocation5 + $0x708] sm:$0xff]  ;;  %v6176_v24 = vcombine.low %v421_v12, %v445_v13  ;;  %v6178_v25 = vcombine.low %v422_v14, %v446_v15 }
 0x212   :  { %v6131_v27 = vcombine.high %v374_v22, %v398_v23 }
 0x218   :  { %5052 = vmatpush2.bf16.xpose.msra.mxu0 %v6460_v30  ;;  %5093 = vmatpush2.bf16.xpose.msra.mxu1 %v6462_v31  ;;  %v326_v30 = vld [vmem:[#allocation5 + $0x4c8] sm:$0xff] }
 0x219   :  { %5053 = vmatprep.subr.bf16.mxu0 %v6413_v32  ;;  %5094 = vmatprep.subr.bf16.mxu1 %v6415_v33  ;;  %v350_v31 = vld [vmem:[#allocation5 + $0x588] sm:$0xff]  ;;  %v6128_v32 = vcombine.low %v373_v20, %v397_v21  ;;  %v6130_v33 = vcombine.low %v374_v22, %v398_v23  ;;  %v805_v21 = vld [vmem:[#allocation5 + $0x13c0] sm:$0xff] }
 0x21a   :  { %v6083_v35 = vcombine.high %v326_v30, %v350_v31  ;;  %v829_v22 = vld [vmem:[#allocation5 + $0x1480] sm:$0xff] }
 0x220   :  { %5054 = vmatpush2.bf16.xpose.msra.mxu0 %v6412_v39  ;;  %5095 = vmatpush2.bf16.xpose.msra.mxu1 %v6414_v40  ;;  %v278_v39 = vld [vmem:[#allocation5 + $0x348] sm:$0xff] }
 0x221   :  { %5055 = vmatprep.subr.bf16.mxu0 %v6365_v42  ;;  %5096 = vmatprep.subr.bf16.mxu1 %v6367_v43  ;;  %v302_v40 = vld [vmem:[#allocation5 + $0x408] sm:$0xff]  ;;  %v6080_v42 = vcombine.low %v325_v28, %v349_v29  ;;  %v6082_v43 = vcombine.low %v326_v30, %v350_v31  ;;  %v6561_v30 = vcombine.high %v805_v21, %v829_v22 }
 0x222   :  { %v6035_v45 = vcombine.high %v278_v39, %v302_v40 }
 0x228   :  { %5056 = vmatpush2.bf16.xpose.msra.mxu0 %v6364_v48  ;;  %5097 = vmatpush2.bf16.xpose.msra.mxu1 %v6366_v49  ;;  %v230_v48 = vld [vmem:[#allocation5 + $0x1c8] sm:$0xff] }
 0x229   :  { %5057 = vmatprep.subr.bf16.mxu0 %v6317_v50  ;;  %5098 = vmatprep.subr.bf16.mxu1 %v6319_v51  ;;  %v254_v49 = vld [vmem:[#allocation5 + $0x288] sm:$0xff]  ;;  %v6032_v50 = vcombine.low %v277_v37, %v301_v38  ;;  %v6034_v51 = vcombine.low %v278_v39, %v302_v40  ;;  %v6560_v37 = vcombine.low %v805_v21, %v829_v22  ;;  %v471_v21 = vld [vmem:[#allocation5 + $0x950] sm:$0xff] }
 0x22a   :  { %v5987_v53 = vcombine.high %v230_v48, %v254_v49  ;;  %v495_v22 = vld [vmem:[#allocation5 + $0xa10] sm:$0xff] }
 0x230   :  { %5058 = vmatpush2.bf16.xpose.msra.mxu0 %v6316_v56  ;;  %5099 = vmatpush2.bf16.xpose.msra.mxu1 %v6318_v57  ;;  %v182_v56 = vld [vmem:[#allocation5 + $0x48] sm:$0xff] }
 0x231   :  { %5109 = vmatprep.subr.bf16.mxu0 %v6273_v58  ;;  %5150 = vmatprep.subr.bf16.mxu1 %v6275_v59  ;;  %v206_v57 = vld [vmem:[#allocation5 + $0x108] sm:$0xff]  ;;  %v5984_v58 = vcombine.low %v229_v46, %v253_v47  ;;  %v5986_v59 = vcombine.low %v230_v48, %v254_v49 }
 0x232   :  { %v5939_v62 = vcombine.high %v182_v56, %v206_v57  ;;  %v5938_v5 = vcombine.low %v182_v56, %v206_v57 }
 0x237   :  { %5060 = vmatmul.mubr.bf16.vlgmr.msra.gmra.mxu0 %v137_v1  ;;  %5101 = vmatmul.mubr.bf16.vlgmr.msra.gmra.mxu1 %v139_v36  ;;  %v902_v1 = vld [vmem:[#allocation5 + $0x16c8] sm:$0xff]  ;;  %v6657_v36 = vcombine.high %v901_v63, %v925_v0 }
 0x238   :  { %5110 = vmatpush1.bf16.xpose.msra.mxu0 %v6272_v6  ;;  %5151 = vmatpush1.bf16.xpose.msra.mxu1 %v6274_v8  ;;  %v6659_v6 = vcombine.high %v902_v1, %v926_v2  ;;  %v877_v8 = vld [vmem:[#allocation5 + $0x1600] sm:$0xff] }
 0x239   :  { %5111 = vmatprep.subr.bf16.mxu0 %v6225_v9  ;;  %5152 = vmatprep.subr.bf16.mxu1 %v6227_v10  ;;  %v854_v9 = vld [vmem:[#allocation5 + $0x1548] sm:$0xff]  ;;  %v6609_v12 = vcombine.high %v853_v7, %v877_v8 }
 0x23a   :  { %5141 = vmatprep.mubr.bf16.mxu0 %v142_v41  ;;  %5182 = vmatprep.mubr.bf16.mxu1 %v144_v11  ;;  %v878_v10 = vld [vmem:[#allocation5 + $0x1608] sm:$0xff]  ;;  %v6656_v41 = vcombine.low %v901_v63, %v925_v0  ;;  %v6658_v11 = vcombine.low %v902_v1, %v926_v2 }
 0x23b   :  { %v6611_v13 = vcombine.high %v854_v9, %v878_v10  ;;  %v6610_v29 = vcombine.low %v854_v9, %v878_v10 }
 0x240   :  { %5112 = vmatpush1.bf16.xpose.msra.mxu0 %v6224_v16  ;;  %5153 = vmatpush1.bf16.xpose.msra.mxu1 %v6226_v17 }
 0x241   :  { %5113 = vmatprep.subr.bf16.mxu0 %v6177_v18  ;;  %5154 = vmatprep.subr.bf16.mxu1 %v6179_v19 }
 0x248   :  { %5114 = vmatpush1.bf16.xpose.msra.mxu0 %v6176_v24  ;;  %5155 = vmatpush1.bf16.xpose.msra.mxu1 %v6178_v25  ;;  %v806_v24 = vld [vmem:[#allocation5 + $0x13c8] sm:$0xff] }
 0x249   :  { %5115 = vmatprep.subr.bf16.mxu0 %v6129_v26  ;;  %5156 = vmatprep.subr.bf16.mxu1 %v6131_v27  ;;  %v830_v25 = vld [vmem:[#allocation5 + $0x1488] sm:$0xff] }
 0x24a   :  { %v6562_v38 = vcombine.low %v806_v24, %v830_v25 }
 0x250   :  { %5116 = vmatpush1.bf16.xpose.msra.mxu0 %v6128_v32  ;;  %5157 = vmatpush1.bf16.xpose.msra.mxu1 %v6130_v33  ;;  %v6563_v32 = vcombine.high %v806_v24, %v830_v25  ;;  %v781_v33 = vld [vmem:[#allocation5 + $0x1300] sm:$0xff]  ;;  %v472_v24 = vld [vmem:[#allocation5 + $0x958] sm:$0xff] }
 0x251   :  { %5117 = vmatprep.subr.bf16.mxu0 %v6081_v34  ;;  %5158 = vmatprep.subr.bf16.mxu1 %v6083_v35  ;;  %v758_v34 = vld [vmem:[#allocation5 + $0x1248] sm:$0xff]  ;;  %v496_v25 = vld [vmem:[#allocation5 + $0xa18] sm:$0xff] }
 0x252   :  { %v782_v35 = vld [vmem:[#allocation5 + $0x1308] sm:$0xff] }
 0x253   :  { %v6515_v40 = vcombine.high %v758_v34, %v782_v35  ;;  %v6514_v47 = vcombine.low %v758_v34, %v782_v35  ;;  %v423_v34 = vld [vmem:[#allocation5 + $0x7d0] sm:$0xff] }
 0x254   :  { %v447_v35 = vld [vmem:[#allocation5 + $0x890] sm:$0xff] }
 0x258   :  { %5118 = vmatpush1.bf16.xpose.msra.mxu0 %v6080_v42  ;;  %5159 = vmatpush1.bf16.xpose.msra.mxu1 %v6082_v43  ;;  %v709_v42 = vld [vmem:[#allocation5 + $0x10c0] sm:$0xff] }
 0x259   :  { %5119 = vmatprep.subr.bf16.mxu0 %v6033_v44  ;;  %5160 = vmatprep.subr.bf16.mxu1 %v6035_v45  ;;  %v733_v43 = vld [vmem:[#allocation5 + $0x1180] sm:$0xff]  ;;  %v710_v44 = vld [vmem:[#allocation5 + $0x10c8] sm:$0xff] }
 0x25a   :  { %v734_v45 = vld [vmem:[#allocation5 + $0x1188] sm:$0xff]  ;;  %v6465_v48 = vcombine.high %v709_v42, %v733_v43  ;;  %v6464_v54 = vcombine.low %v709_v42, %v733_v43  ;;  %v6181_v42 = vcombine.high %v423_v34, %v447_v35 }
 0x25b   :  { %v6467_v49 = vcombine.high %v710_v44, %v734_v45  ;;  %v6466_v55 = vcombine.low %v710_v44, %v734_v45  ;;  %v375_v44 = vld [vmem:[#allocation5 + $0x650] sm:$0xff] }
 0x25c   :  { %v399_v45 = vld [vmem:[#allocation5 + $0x710] sm:$0xff] }
 0x260   :  { %5120 = vmatpush1.bf16.xpose.msra.mxu0 %v6032_v50  ;;  %5161 = vmatpush1.bf16.xpose.msra.mxu1 %v6034_v51  ;;  %v661_v50 = vld [vmem:[#allocation5 + $0xf40] sm:$0xff] }
 0x261   :  { %5121 = vmatprep.subr.bf16.mxu0 %v5985_v52  ;;  %5162 = vmatprep.subr.bf16.mxu1 %v5987_v53  ;;  %v685_v51 = vld [vmem:[#allocation5 + $0x1000] sm:$0xff]  ;;  %v662_v52 = vld [vmem:[#allocation5 + $0xf48] sm:$0xff] }
 0x262   :  { %v686_v53 = vld [vmem:[#allocation5 + $0x1008] sm:$0xff]  ;;  %v6417_v56 = vcombine.high %v661_v50, %v685_v51  ;;  %v6416_v63 = vcombine.low %v661_v50, %v685_v51  ;;  %v6133_v50 = vcombine.high %v375_v44, %v399_v45 }
 0x263   :  { %v6419_v57 = vcombine.high %v662_v52, %v686_v53  ;;  %v6418_v0 = vcombine.low %v662_v52, %v686_v53  ;;  %v327_v52 = vld [vmem:[#allocation5 + $0x4d0] sm:$0xff] }
 0x264   :  { %v351_v53 = vld [vmem:[#allocation5 + $0x590] sm:$0xff] }
 0x268   :  { %5122 = vmatpush1.bf16.xpose.msra.mxu0 %v5984_v58  ;;  %5163 = vmatpush1.bf16.xpose.msra.mxu1 %v5986_v59  ;;  %v613_v58 = vld [vmem:[#allocation5 + $0xdc0] sm:$0xff] }
 0x269   :  { %5123 = vmatprep.subr.bf16.mxu0 %v5937_v61  ;;  %5164 = vmatprep.subr.bf16.mxu1 %v5939_v62  ;;  %v637_v59 = vld [vmem:[#allocation5 + $0xe80] sm:$0xff]  ;;  %v614_v61 = vld [vmem:[#allocation5 + $0xdc8] sm:$0xff] }
 0x26a   :  { %v638_v62 = vld [vmem:[#allocation5 + $0xe88] sm:$0xff]  ;;  %v6369_v1 = vcombine.high %v613_v58, %v637_v59 }
 0x26b   :  { %v6371_v2 = vcombine.high %v614_v61, %v638_v62 }
 0x270   :  { %5124 = vmatpush1.bf16.xpose.msra.mxu0 %v5936_v3  ;;  %5165 = vmatpush1.bf16.xpose.msra.mxu1 %v5938_v5  ;;  %v565_v3 = vld [vmem:[#allocation5 + $0xc40] sm:$0xff] }
 0x271   :  { %5125 = vmatprep.subr.bf16.mxu0 %v6657_v36  ;;  %5166 = vmatprep.subr.bf16.mxu1 %v6659_v6  ;;  %v589_v5 = vld [vmem:[#allocation5 + $0xd00] sm:$0xff]  ;;  %v566_v36 = vld [vmem:[#allocation5 + $0xc48] sm:$0xff] }
 0x272   :  { %v590_v6 = vld [vmem:[#allocation5 + $0xd08] sm:$0xff]  ;;  %v6321_v9 = vcombine.high %v565_v3, %v589_v5 }
 0x273   :  { %v6323_v10 = vcombine.high %v566_v36, %v590_v6 }
 0x277   :  { %v4979_v14 = vpop.f32.mrf.mxu0  ;;  %v5020_v16 = vpop.f32.mrf.mxu1 }
 0x278   :  { %v4980_v15 = vadd.f32 %v4979_v14, %v6873_v60  ;;  %5126 = vmatpush2.bf16.xpose.msra.mxu0 %v6656_v41  ;;  %5167 = vmatpush2.bf16.xpose.msra.mxu1 %v6658_v11  ;;  %v6608_v60 = vcombine.low %v853_v7, %v877_v8  ;;  %v6368_v7 = vcombine.low %v613_v58, %v637_v59  ;;  %v519_v41 = vld [vmem:[#allocation5 + $0xad0] sm:$0xff] }
 0x279   :  { %v4981_v17 = vpop.f32.mrf.mxu0  ;;  %5127 = vmatprep.subr.bf16.mxu0 %v6609_v12  ;;  %v5022_v20 = vpop.f32.mrf.mxu1  ;;  %5168 = vmatprep.subr.bf16.mxu1 %v6611_v13  ;;  %v6370_v8 = vcombine.low %v614_v61, %v638_v62  ;;  %v543_v11 = vld [vmem:[#allocation5 + $0xb90] sm:$0xff]  ;;  %v520_v12 = vld [vmem:[#allocation5 + $0xad8] sm:$0xff]  ;;  %v6320_v14 = vcombine.low %v565_v3, %v589_v5  ;;  %v6085_v58 = vcombine.high %v327_v52, %v351_v53 }
 0x27a   :  { %v6879_v18 = vadd.f32 %v5020_v16, %v4980_v15  ;;  %v4982_v19 = vadd.f32 %v4981_v17, %v6876_v4  ;;  %v757_v4 = vld [vmem:[#allocation5 + $0x1240] sm:$0xff]  ;;  %v544_v13 = vld [vmem:[#allocation5 + $0xb98] sm:$0xff]  ;;  %v6322_v15 = vcombine.low %v566_v36, %v590_v6  ;;  %v6277_v16 = vcombine.high %v519_v41, %v543_v11  ;;  %v279_v61 = vld [vmem:[#allocation5 + $0x350] sm:$0xff] }
 0x27b   :  { %v4983_v23 = vpop.f32.mrf.mxu0  ;;  %v5024_v27 = vpop.f32.mrf.mxu1  ;;  %v6513_v39 = vcombine.high %v757_v4, %v781_v33  ;;  %v6512_v46 = vcombine.low %v757_v4, %v781_v33  ;;  %v6279_v17 = vcombine.high %v520_v12, %v544_v13  ;;  %v303_v62 = vld [vmem:[#allocation5 + $0x410] sm:$0xff] }
 0x27c   :  { %v6882_v26 = vadd.f32 %v5022_v20, %v4982_v19  ;;  %v93_v19 = vld [vmem:[#allocation3 + $0x80] sm:$0xff]  ;;  %v95_v20 = vld [vmem:[#allocation3 + $0x90] sm:$0xff]  ;;  %v98_v27 = vld [vmem:[#allocation3 + $0xa8] sm:$0xff]  ;;  %v6037_v3 = vcombine.high %v279_v61, %v303_v62 }
 0x27d   :  { %v4984_v28 = vpop.f32.mrf.mxu0  ;;  %v5025_v31 = vpop.f32.mrf.mxu1  ;;  %v141_v23 = vpack.c.bf16 %v93_v19, %v93_v19  ;;  %v146_v4 = vpack.c.bf16 %v98_v27, %v98_v27  ;;  %v231_v36 = vld [vmem:[#allocation5 + $0x1d0] sm:$0xff] }
 0x27e   :  { %v6276_v28 = vcombine.low %v519_v41, %v543_v11  ;;  %v6229_v31 = vcombine.high %v471_v21, %v495_v22  ;;  %v255_v6 = vld [vmem:[#allocation5 + $0x290] sm:$0xff] }
 0x27f   :  { %v5989_v41 = vcombine.high %v231_v36, %v255_v6 }
 0x280   :  { %5128 = vmatpush2.bf16.xpose.msra.mxu0 %v6608_v60  ;;  %5169 = vmatpush2.bf16.xpose.msra.mxu1 %v6610_v29  ;;  %v143_v60 = vpack.c.bf16 %v95_v20, %v95_v20  ;;  %v100_v29 = vld [vmem:[#allocation3 + $0xb8] sm:$0xff] }
 0x281   :  { %5129 = vmatprep.subr.bf16.mxu0 %v6561_v30  ;;  %5170 = vmatprep.subr.bf16.mxu1 %v6563_v32  ;;  %v6278_v30 = vcombine.low %v520_v12, %v544_v13  ;;  %v6231_v32 = vcombine.high %v472_v24, %v496_v25  ;;  %v148_v33 = vpack.c.bf16 %v100_v29, %v100_v29  ;;  %v183_v12 = vld [vmem:[#allocation5 + $0x50] sm:$0xff] }
 0x282   :  { %v207_v13 = vld [vmem:[#allocation5 + $0x110] sm:$0xff] }
 0x283   :  { %v5941_v19 = vcombine.high %v183_v12, %v207_v13  ;;  %v855_v29 = vld [vmem:[#allocation5 + $0x1550] sm:$0xff] }
 0x288   :  { %5130 = vmatpush2.bf16.xpose.msra.mxu0 %v6560_v37  ;;  %5171 = vmatpush2.bf16.xpose.msra.mxu1 %v6562_v38  ;;  %v424_v37 = vld [vmem:[#allocation5 + $0x7d8] sm:$0xff] }
 0x289   :  { %5131 = vmatprep.subr.bf16.mxu0 %v6513_v39  ;;  %5172 = vmatprep.subr.bf16.mxu1 %v6515_v40  ;;  %v448_v38 = vld [vmem:[#allocation5 + $0x898] sm:$0xff]  ;;  %v6228_v39 = vcombine.low %v471_v21, %v495_v22  ;;  %v6230_v40 = vcombine.low %v472_v24, %v496_v25  ;;  %v903_v21 = vld [vmem:[#allocation5 + $0x16d0] sm:$0xff]  ;;  %v5940_v25 = vcombine.low %v183_v12, %v207_v13 }
 0x28a   :  { %v6183_v43 = vcombine.high %v424_v37, %v448_v38  ;;  %v927_v22 = vld [vmem:[#allocation5 + $0x1790] sm:$0xff]  ;;  %v928_v24 = vld [vmem:[#allocation5 + $0x1798] sm:$0xff] }
 0x290   :  { %5132 = vmatpush2.bf16.xpose.msra.mxu0 %v6512_v46  ;;  %5173 = vmatpush2.bf16.xpose.msra.mxu1 %v6514_v47  ;;  %v376_v46 = vld [vmem:[#allocation5 + $0x658] sm:$0xff] }
 0x291   :  { %5133 = vmatprep.subr.bf16.mxu0 %v6465_v48  ;;  %5174 = vmatprep.subr.bf16.mxu1 %v6467_v49  ;;  %v400_v47 = vld [vmem:[#allocation5 + $0x718] sm:$0xff]  ;;  %v6180_v48 = vcombine.low %v423_v34, %v447_v35  ;;  %v6182_v49 = vcombine.low %v424_v37, %v448_v38 }
 0x292   :  { %v6135_v51 = vcombine.high %v376_v46, %v400_v47 }
 0x298   :  { %5134 = vmatpush2.bf16.xpose.msra.mxu0 %v6464_v54  ;;  %5175 = vmatpush2.bf16.xpose.msra.mxu1 %v6466_v55  ;;  %v328_v54 = vld [vmem:[#allocation5 + $0x4d8] sm:$0xff] }
 0x299   :  { %5135 = vmatprep.subr.bf16.mxu0 %v6417_v56  ;;  %5176 = vmatprep.subr.bf16.mxu1 %v6419_v57  ;;  %v352_v55 = vld [vmem:[#allocation5 + $0x598] sm:$0xff]  ;;  %v6132_v56 = vcombine.low %v375_v44, %v399_v45  ;;  %v6134_v57 = vcombine.low %v376_v46, %v400_v47  ;;  %v807_v45 = vld [vmem:[#allocation5 + $0x13d0] sm:$0xff] }
 0x29a   :  { %v6087_v59 = vcombine.high %v328_v54, %v352_v55  ;;  %v831_v46 = vld [vmem:[#allocation5 + $0x1490] sm:$0xff] }
 0x2a0   :  { %5136 = vmatpush2.bf16.xpose.msra.mxu0 %v6416_v63  ;;  %5177 = vmatpush2.bf16.xpose.msra.mxu1 %v6418_v0  ;;  %v280_v63 = vld [vmem:[#allocation5 + $0x358] sm:$0xff] }
 0x2a1   :  { %5137 = vmatprep.subr.bf16.mxu0 %v6369_v1  ;;  %5178 = vmatprep.subr.bf16.mxu1 %v6371_v2  ;;  %v304_v0 = vld [vmem:[#allocation5 + $0x418] sm:$0xff]  ;;  %v6084_v1 = vcombine.low %v327_v52, %v351_v53  ;;  %v6086_v2 = vcombine.low %v328_v54, %v352_v55  ;;  %v6565_v54 = vcombine.high %v807_v45, %v831_v46 }
 0x2a2   :  { %v6039_v5 = vcombine.high %v280_v63, %v304_v0 }
 0x2a8   :  { %5138 = vmatpush2.bf16.xpose.msra.mxu0 %v6368_v7  ;;  %5179 = vmatpush2.bf16.xpose.msra.mxu1 %v6370_v8  ;;  %v232_v7 = vld [vmem:[#allocation5 + $0x1d8] sm:$0xff] }
 0x2a9   :  { %5139 = vmatprep.subr.bf16.mxu0 %v6321_v9  ;;  %5180 = vmatprep.subr.bf16.mxu1 %v6323_v10  ;;  %v256_v8 = vld [vmem:[#allocation5 + $0x298] sm:$0xff]  ;;  %v6036_v9 = vcombine.low %v279_v61, %v303_v62  ;;  %v6038_v10 = vcombine.low %v280_v63, %v304_v0  ;;  %v6564_v61 = vcombine.low %v807_v45, %v831_v46  ;;  %v473_v45 = vld [vmem:[#allocation5 + $0x960] sm:$0xff] }
 0x2aa   :  { %v5991_v11 = vcombine.high %v232_v7, %v256_v8  ;;  %v497_v46 = vld [vmem:[#allocation5 + $0xa20] sm:$0xff] }
 0x2b0   :  { %5140 = vmatpush2.bf16.xpose.msra.mxu0 %v6320_v14  ;;  %5181 = vmatpush2.bf16.xpose.msra.mxu1 %v6322_v15  ;;  %v184_v14 = vld [vmem:[#allocation5 + $0x58] sm:$0xff] }
 0x2b1   :  { %5191 = vmatprep.subr.bf16.mxu0 %v6277_v16  ;;  %5232 = vmatprep.subr.bf16.mxu1 %v6279_v17  ;;  %v208_v15 = vld [vmem:[#allocation5 + $0x118] sm:$0xff]  ;;  %v5988_v16 = vcombine.low %v231_v36, %v255_v6  ;;  %v5990_v17 = vcombine.low %v232_v7, %v256_v8 }
 0x2b2   :  { %v5943_v20 = vcombine.high %v184_v14, %v208_v15  ;;  %v5942_v27 = vcombine.low %v184_v14, %v208_v15 }
 0x2b7   :  { %5142 = vmatmul.mubr.bf16.vlgmr.msra.gmra.mxu0 %v141_v23  ;;  %5183 = vmatmul.mubr.bf16.vlgmr.msra.gmra.mxu1 %v143_v60  ;;  %v904_v23 = vld [vmem:[#allocation5 + $0x16d8] sm:$0xff]  ;;  %v6661_v60 = vcombine.high %v903_v21, %v927_v22 }
 0x2b8   :  { %5192 = vmatpush1.bf16.xpose.msra.mxu0 %v6276_v28  ;;  %5233 = vmatpush1.bf16.xpose.msra.mxu1 %v6278_v30  ;;  %v6663_v28 = vcombine.high %v904_v23, %v928_v24  ;;  %v879_v30 = vld [vmem:[#allocation5 + $0x1610] sm:$0xff] }
 0x2b9   :  { %5193 = vmatprep.subr.bf16.mxu0 %v6229_v31  ;;  %5234 = vmatprep.subr.bf16.mxu1 %v6231_v32  ;;  %v856_v31 = vld [vmem:[#allocation5 + $0x1558] sm:$0xff]  ;;  %v6613_v34 = vcombine.high %v855_v29, %v879_v30 }
 0x2ba   :  { %5223 = vmatprep.mubr.bf16.mxu0 %v146_v4  ;;  %5264 = vmatprep.mubr.bf16.mxu1 %v148_v33  ;;  %v880_v32 = vld [vmem:[#allocation5 + $0x1618] sm:$0xff]  ;;  %v6660_v4 = vcombine.low %v903_v21, %v927_v22  ;;  %v6662_v33 = vcombine.low %v904_v23, %v928_v24 }
 0x2bb   :  { %v6615_v35 = vcombine.high %v856_v31, %v880_v32  ;;  %v6614_v53 = vcombine.low %v856_v31, %v880_v32 }
 0x2c0   :  { %5194 = vmatpush1.bf16.xpose.msra.mxu0 %v6228_v39  ;;  %5235 = vmatpush1.bf16.xpose.msra.mxu1 %v6230_v40 }
 0x2c1   :  { %5195 = vmatprep.subr.bf16.mxu0 %v6181_v42  ;;  %5236 = vmatprep.subr.bf16.mxu1 %v6183_v43 }
 0x2c8   :  { %5196 = vmatpush1.bf16.xpose.msra.mxu0 %v6180_v48  ;;  %5237 = vmatpush1.bf16.xpose.msra.mxu1 %v6182_v49  ;;  %v808_v48 = vld [vmem:[#allocation5 + $0x13d8] sm:$0xff] }
 0x2c9   :  { %5197 = vmatprep.subr.bf16.mxu0 %v6133_v50  ;;  %5238 = vmatprep.subr.bf16.mxu1 %v6135_v51  ;;  %v832_v49 = vld [vmem:[#allocation5 + $0x1498] sm:$0xff] }
 0x2ca   :  { %v6566_v62 = vcombine.low %v808_v48, %v832_v49 }
 0x2d0   :  { %5198 = vmatpush1.bf16.xpose.msra.mxu0 %v6132_v56  ;;  %5239 = vmatpush1.bf16.xpose.msra.mxu1 %v6134_v57  ;;  %v6567_v56 = vcombine.high %v808_v48, %v832_v49  ;;  %v783_v57 = vld [vmem:[#allocation5 + $0x1310] sm:$0xff]  ;;  %v474_v48 = vld [vmem:[#allocation5 + $0x968] sm:$0xff] }
 0x2d1   :  { %5199 = vmatprep.subr.bf16.mxu0 %v6085_v58  ;;  %5240 = vmatprep.subr.bf16.mxu1 %v6087_v59  ;;  %v760_v58 = vld [vmem:[#allocation5 + $0x1258] sm:$0xff]  ;;  %v498_v49 = vld [vmem:[#allocation5 + $0xa28] sm:$0xff] }
 0x2d2   :  { %v784_v59 = vld [vmem:[#allocation5 + $0x1318] sm:$0xff] }
 0x2d3   :  { %v6519_v0 = vcombine.high %v760_v58, %v784_v59  ;;  %v6518_v6 = vcombine.low %v760_v58, %v784_v59  ;;  %v425_v58 = vld [vmem:[#allocation5 + $0x7e0] sm:$0xff] }
 0x2d4   :  { %v449_v59 = vld [vmem:[#allocation5 + $0x8a0] sm:$0xff] }
 0x2d8   :  { %5200 = vmatpush1.bf16.xpose.msra.mxu0 %v6084_v1  ;;  %5241 = vmatpush1.bf16.xpose.msra.mxu1 %v6086_v2  ;;  %v711_v1 = vld [vmem:[#allocation5 + $0x10d0] sm:$0xff] }
 0x2d9   :  { %5201 = vmatprep.subr.bf16.mxu0 %v6037_v3  ;;  %5242 = vmatprep.subr.bf16.mxu1 %v6039_v5  ;;  %v735_v2 = vld [vmem:[#allocation5 + $0x1190] sm:$0xff]  ;;  %v712_v3 = vld [vmem:[#allocation5 + $0x10d8] sm:$0xff] }
 0x2da   :  { %v736_v5 = vld [vmem:[#allocation5 + $0x1198] sm:$0xff]  ;;  %v6469_v7 = vcombine.high %v711_v1, %v735_v2  ;;  %v6468_v12 = vcombine.low %v711_v1, %v735_v2  ;;  %v6185_v1 = vcombine.high %v425_v58, %v449_v59 }
 0x2db   :  { %v6471_v8 = vcombine.high %v712_v3, %v736_v5  ;;  %v6470_v13 = vcombine.low %v712_v3, %v736_v5  ;;  %v377_v3 = vld [vmem:[#allocation5 + $0x660] sm:$0xff] }
 0x2dc   :  { %v401_v5 = vld [vmem:[#allocation5 + $0x720] sm:$0xff] }
 0x2e0   :  { %5202 = vmatpush1.bf16.xpose.msra.mxu0 %v6036_v9  ;;  %5243 = vmatpush1.bf16.xpose.msra.mxu1 %v6038_v10  ;;  %v663_v9 = vld [vmem:[#allocation5 + $0xf50] sm:$0xff] }
 0x2e1   :  { %5203 = vmatprep.subr.bf16.mxu0 %v5989_v41  ;;  %5244 = vmatprep.subr.bf16.mxu1 %v5991_v11  ;;  %v687_v10 = vld [vmem:[#allocation5 + $0x1010] sm:$0xff]  ;;  %v664_v41 = vld [vmem:[#allocation5 + $0xf58] sm:$0xff] }
 0x2e2   :  { %v688_v11 = vld [vmem:[#allocation5 + $0x1018] sm:$0xff]  ;;  %v6421_v14 = vcombine.high %v663_v9, %v687_v10  ;;  %v6420_v21 = vcombine.low %v663_v9, %v687_v10  ;;  %v6137_v9 = vcombine.high %v377_v3, %v401_v5 }
 0x2e3   :  { %v6423_v15 = vcombine.high %v664_v41, %v688_v11  ;;  %v6422_v22 = vcombine.low %v664_v41, %v688_v11  ;;  %v329_v41 = vld [vmem:[#allocation5 + $0x4e0] sm:$0xff] }
 0x2e4   :  { %v353_v11 = vld [vmem:[#allocation5 + $0x5a0] sm:$0xff] }
 0x2e8   :  { %5204 = vmatpush1.bf16.xpose.msra.mxu0 %v5988_v16  ;;  %5245 = vmatpush1.bf16.xpose.msra.mxu1 %v5990_v17  ;;  %v615_v16 = vld [vmem:[#allocation5 + $0xdd0] sm:$0xff] }
 0x2e9   :  { %5205 = vmatprep.subr.bf16.mxu0 %v5941_v19  ;;  %5246 = vmatprep.subr.bf16.mxu1 %v5943_v20  ;;  %v639_v17 = vld [vmem:[#allocation5 + $0xe90] sm:$0xff]  ;;  %v616_v19 = vld [vmem:[#allocation5 + $0xdd8] sm:$0xff] }
 0x2ea   :  { %v640_v20 = vld [vmem:[#allocation5 + $0xe98] sm:$0xff]  ;;  %v6373_v23 = vcombine.high %v615_v16, %v639_v17 }
 0x2eb   :  { %v6375_v24 = vcombine.high %v616_v19, %v640_v20 }
 0x2f0   :  { %5206 = vmatpush1.bf16.xpose.msra.mxu0 %v5940_v25  ;;  %5247 = vmatpush1.bf16.xpose.msra.mxu1 %v5942_v27  ;;  %v567_v25 = vld [vmem:[#allocation5 + $0xc50] sm:$0xff] }
 0x2f1   :  { %5207 = vmatprep.subr.bf16.mxu0 %v6661_v60  ;;  %5248 = vmatprep.subr.bf16.mxu1 %v6663_v28  ;;  %v591_v27 = vld [vmem:[#allocation5 + $0xd10] sm:$0xff]  ;;  %v568_v60 = vld [vmem:[#allocation5 + $0xc58] sm:$0xff] }
 0x2f2   :  { %v592_v28 = vld [vmem:[#allocation5 + $0xd18] sm:$0xff]  ;;  %v6325_v31 = vcombine.high %v567_v25, %v591_v27 }
 0x2f3   :  { %v6327_v32 = vcombine.high %v568_v60, %v592_v28 }
 0x2f7   :  { %v5061_v37 = vpop.f32.mrf.mxu0  ;;  %v5102_v39 = vpop.f32.mrf.mxu1 }
 0x2f8   :  { %v5062_v38 = vadd.f32 %v5061_v37, %v6879_v18  ;;  %5208 = vmatpush2.bf16.xpose.msra.mxu0 %v6660_v4  ;;  %5249 = vmatpush2.bf16.xpose.msra.mxu1 %v6662_v33  ;;  %v6612_v18 = vcombine.low %v855_v29, %v879_v30  ;;  %v6372_v29 = vcombine.low %v615_v16, %v639_v17  ;;  %v521_v4 = vld [vmem:[#allocation5 + $0xae0] sm:$0xff] }
 0x2f9   :  { %v5063_v40 = vpop.f32.mrf.mxu0  ;;  %5209 = vmatprep.subr.bf16.mxu0 %v6613_v34  ;;  %v5104_v44 = vpop.f32.mrf.mxu1  ;;  %5250 = vmatprep.subr.bf16.mxu1 %v6615_v35  ;;  %v6374_v30 = vcombine.low %v616_v19, %v640_v20  ;;  %v545_v33 = vld [vmem:[#allocation5 + $0xba0] sm:$0xff]  ;;  %v522_v34 = vld [vmem:[#allocation5 + $0xae8] sm:$0xff]  ;;  %v6324_v37 = vcombine.low %v567_v25, %v591_v27  ;;  %v6089_v16 = vcombine.high %v329_v41, %v353_v11 }
 0x2fa   :  { %v6885_v42 = vadd.f32 %v5102_v39, %v5062_v38  ;;  %v5064_v43 = vadd.f32 %v5063_v40, %v6882_v26  ;;  %v759_v26 = vld [vmem:[#allocation5 + $0x1250] sm:$0xff]  ;;  %v546_v35 = vld [vmem:[#allocation5 + $0xba8] sm:$0xff]  ;;  %v6326_v38 = vcombine.low %v568_v60, %v592_v28  ;;  %v6281_v39 = vcombine.high %v521_v4, %v545_v33  ;;  %v281_v19 = vld [vmem:[#allocation5 + $0x360] sm:$0xff] }
 0x2fb   :  { %v5065_v47 = vpop.f32.mrf.mxu0  ;;  %v5106_v51 = vpop.f32.mrf.mxu1  ;;  %v6517_v63 = vcombine.high %v759_v26, %v783_v57  ;;  %v6516_v36 = vcombine.low %v759_v26, %v783_v57  ;;  %v6283_v40 = vcombine.high %v522_v34, %v546_v35  ;;  %v305_v20 = vld [vmem:[#allocation5 + $0x420] sm:$0xff] }
 0x2fc   :  { %v6888_v50 = vadd.f32 %v5104_v44, %v5064_v43  ;;  %v97_v43 = vld [vmem:[#allocation3 + $0xa0] sm:$0xff]  ;;  %v99_v44 = vld [vmem:[#allocation3 + $0xb0] sm:$0xff]  ;;  %v102_v51 = vld [vmem:[#allocation3 + $0xc8] sm:$0xff]  ;;  %v6041_v25 = vcombine.high %v281_v19, %v305_v20 }
 0x2fd   :  { %v5066_v52 = vpop.f32.mrf.mxu0  ;;  %v5107_v55 = vpop.f32.mrf.mxu1  ;;  %v145_v47 = vpack.c.bf16 %v97_v43, %v97_v43  ;;  %v150_v26 = vpack.c.bf16 %v102_v51, %v102_v51  ;;  %v233_v60 = vld [vmem:[#allocation5 + $0x1e0] sm:$0xff] }
 0x2fe   :  { %v6280_v52 = vcombine.low %v521_v4, %v545_v33  ;;  %v6233_v55 = vcombine.high %v473_v45, %v497_v46  ;;  %v257_v28 = vld [vmem:[#allocation5 + $0x2a0] sm:$0xff] }
 0x2ff   :  { %v5993_v4 = vcombine.high %v233_v60, %v257_v28 }
 0x300   :  { %5210 = vmatpush2.bf16.xpose.msra.mxu0 %v6612_v18  ;;  %5251 = vmatpush2.bf16.xpose.msra.mxu1 %v6614_v53  ;;  %v147_v18 = vpack.c.bf16 %v99_v44, %v99_v44  ;;  %v104_v53 = vld [vmem:[#allocation3 + $0xd8] sm:$0xff] }
 0x301   :  { %5211 = vmatprep.subr.bf16.mxu0 %v6565_v54  ;;  %5252 = vmatprep.subr.bf16.mxu1 %v6567_v56  ;;  %v6282_v54 = vcombine.low %v522_v34, %v546_v35  ;;  %v6235_v56 = vcombine.high %v474_v48, %v498_v49  ;;  %v152_v57 = vpack.c.bf16 %v104_v53, %v104_v53  ;;  %v185_v34 = vld [vmem:[#allocation5 + $0x60] sm:$0xff] }
 0x302   :  { %v209_v35 = vld [vmem:[#allocation5 + $0x120] sm:$0xff] }
 0x303   :  { %v5945_v43 = vcombine.high %v185_v34, %v209_v35  ;;  %v857_v53 = vld [vmem:[#allocation5 + $0x1560] sm:$0xff] }
 0x308   :  { %5212 = vmatpush2.bf16.xpose.msra.mxu0 %v6564_v61  ;;  %5253 = vmatpush2.bf16.xpose.msra.mxu1 %v6566_v62  ;;  %v426_v61 = vld [vmem:[#allocation5 + $0x7e8] sm:$0xff] }
 0x309   :  { %5213 = vmatprep.subr.bf16.mxu0 %v6517_v63  ;;  %5254 = vmatprep.subr.bf16.mxu1 %v6519_v0  ;;  %v450_v62 = vld [vmem:[#allocation5 + $0x8a8] sm:$0xff]  ;;  %v6232_v63 = vcombine.low %v473_v45, %v497_v46  ;;  %v6234_v0 = vcombine.low %v474_v48, %v498_v49  ;;  %v905_v45 = vld [vmem:[#allocation5 + $0x16e0] sm:$0xff]  ;;  %v5944_v49 = vcombine.low %v185_v34, %v209_v35 }
 0x30a   :  { %v6187_v2 = vcombine.high %v426_v61, %v450_v62  ;;  %v929_v46 = vld [vmem:[#allocation5 + $0x17a0] sm:$0xff]  ;;  %v930_v48 = vld [vmem:[#allocation5 + $0x17a8] sm:$0xff] }
 0x310   :  { %5214 = vmatpush2.bf16.xpose.msra.mxu0 %v6516_v36  ;;  %5255 = vmatpush2.bf16.xpose.msra.mxu1 %v6518_v6  ;;  %v378_v36 = vld [vmem:[#allocation5 + $0x668] sm:$0xff] }
 0x311   :  { %5215 = vmatprep.subr.bf16.mxu0 %v6469_v7  ;;  %5256 = vmatprep.subr.bf16.mxu1 %v6471_v8  ;;  %v402_v6 = vld [vmem:[#allocation5 + $0x728] sm:$0xff]  ;;  %v6184_v7 = vcombine.low %v425_v58, %v449_v59  ;;  %v6186_v8 = vcombine.low %v426_v61, %v450_v62 }
 0x312   :  { %v6139_v10 = vcombine.high %v378_v36, %v402_v6 }
 0x318   :  { %5216 = vmatpush2.bf16.xpose.msra.mxu0 %v6468_v12  ;;  %5257 = vmatpush2.bf16.xpose.msra.mxu1 %v6470_v13  ;;  %v330_v12 = vld [vmem:[#allocation5 + $0x4e8] sm:$0xff] }
 0x319   :  { %5217 = vmatprep.subr.bf16.mxu0 %v6421_v14  ;;  %5258 = vmatprep.subr.bf16.mxu1 %v6423_v15  ;;  %v354_v13 = vld [vmem:[#allocation5 + $0x5a8] sm:$0xff]  ;;  %v6136_v14 = vcombine.low %v377_v3, %v401_v5  ;;  %v6138_v15 = vcombine.low %v378_v36, %v402_v6  ;;  %v809_v5 = vld [vmem:[#allocation5 + $0x13e0] sm:$0xff] }
 0x31a   :  { %v6091_v17 = vcombine.high %v330_v12, %v354_v13  ;;  %v833_v36 = vld [vmem:[#allocation5 + $0x14a0] sm:$0xff] }
 0x320   :  { %5218 = vmatpush2.bf16.xpose.msra.mxu0 %v6420_v21  ;;  %5259 = vmatpush2.bf16.xpose.msra.mxu1 %v6422_v22  ;;  %v282_v21 = vld [vmem:[#allocation5 + $0x368] sm:$0xff] }
 0x321   :  { %5219 = vmatprep.subr.bf16.mxu0 %v6373_v23  ;;  %5260 = vmatprep.subr.bf16.mxu1 %v6375_v24  ;;  %v306_v22 = vld [vmem:[#allocation5 + $0x428] sm:$0xff]  ;;  %v6088_v23 = vcombine.low %v329_v41, %v353_v11  ;;  %v6090_v24 = vcombine.low %v330_v12, %v354_v13  ;;  %v6569_v12 = vcombine.high %v809_v5, %v833_v36 }
 0x322   :  { %v6043_v27 = vcombine.high %v282_v21, %v306_v22 }
 0x328   :  { %5220 = vmatpush2.bf16.xpose.msra.mxu0 %v6372_v29  ;;  %5261 = vmatpush2.bf16.xpose.msra.mxu1 %v6374_v30  ;;  %v234_v29 = vld [vmem:[#allocation5 + $0x1e8] sm:$0xff] }
 0x329   :  { %5221 = vmatprep.subr.bf16.mxu0 %v6325_v31  ;;  %5262 = vmatprep.subr.bf16.mxu1 %v6327_v32  ;;  %v258_v30 = vld [vmem:[#allocation5 + $0x2a8] sm:$0xff]  ;;  %v6040_v31 = vcombine.low %v281_v19, %v305_v20  ;;  %v6042_v32 = vcombine.low %v282_v21, %v306_v22  ;;  %v6568_v19 = vcombine.low %v809_v5, %v833_v36  ;;  %v475_v5 = vld [vmem:[#allocation5 + $0x970] sm:$0xff] }
 0x32a   :  { %v5995_v33 = vcombine.high %v234_v29, %v258_v30  ;;  %v499_v36 = vld [vmem:[#allocation5 + $0xa30] sm:$0xff] }
 0x330   :  { %5222 = vmatpush2.bf16.xpose.msra.mxu0 %v6324_v37  ;;  %5263 = vmatpush2.bf16.xpose.msra.mxu1 %v6326_v38  ;;  %v186_v37 = vld [vmem:[#allocation5 + $0x68] sm:$0xff] }
 0x331   :  { %5273 = vmatprep.subr.bf16.mxu0 %v6281_v39  ;;  %5314 = vmatprep.subr.bf16.mxu1 %v6283_v40  ;;  %v210_v38 = vld [vmem:[#allocation5 + $0x128] sm:$0xff]  ;;  %v5992_v39 = vcombine.low %v233_v60, %v257_v28  ;;  %v5994_v40 = vcombine.low %v234_v29, %v258_v30 }
 0x332   :  { %v5947_v44 = vcombine.high %v186_v37, %v210_v38  ;;  %v5946_v51 = vcombine.low %v186_v37, %v210_v38 }
 0x337   :  { %5224 = vmatmul.mubr.bf16.vlgmr.msra.gmra.mxu0 %v145_v47  ;;  %5265 = vmatmul.mubr.bf16.vlgmr.msra.gmra.mxu1 %v147_v18  ;;  %v906_v47 = vld [vmem:[#allocation5 + $0x16e8] sm:$0xff]  ;;  %v6665_v18 = vcombine.high %v905_v45, %v929_v46 }
 0x338   :  { %5274 = vmatpush1.bf16.xpose.msra.mxu0 %v6280_v52  ;;  %5315 = vmatpush1.bf16.xpose.msra.mxu1 %v6282_v54  ;;  %v6667_v52 = vcombine.high %v906_v47, %v930_v48  ;;  %v881_v54 = vld [vmem:[#allocation5 + $0x1620] sm:$0xff] }
 0x339   :  { %5275 = vmatprep.subr.bf16.mxu0 %v6233_v55  ;;  %5316 = vmatprep.subr.bf16.mxu1 %v6235_v56  ;;  %v858_v55 = vld [vmem:[#allocation5 + $0x1568] sm:$0xff]  ;;  %v6617_v58 = vcombine.high %v857_v53, %v881_v54 }
 0x33a   :  { %5305 = vmatprep.mubr.bf16.mxu0 %v150_v26  ;;  %5346 = vmatprep.mubr.bf16.mxu1 %v152_v57  ;;  %v882_v56 = vld [vmem:[#allocation5 + $0x1628] sm:$0xff]  ;;  %v6664_v26 = vcombine.low %v905_v45, %v929_v46  ;;  %v6666_v57 = vcombine.low %v906_v47, %v930_v48 }
 0x33b   :  { %v6619_v59 = vcombine.high %v858_v55, %v882_v56  ;;  %v6618_v11 = vcombine.low %v858_v55, %v882_v56 }
 0x340   :  { %5276 = vmatpush1.bf16.xpose.msra.mxu0 %v6232_v63  ;;  %5317 = vmatpush1.bf16.xpose.msra.mxu1 %v6234_v0 }
 0x341   :  { %5277 = vmatprep.subr.bf16.mxu0 %v6185_v1  ;;  %5318 = vmatprep.subr.bf16.mxu1 %v6187_v2 }
 0x348   :  { %5278 = vmatpush1.bf16.xpose.msra.mxu0 %v6184_v7  ;;  %5319 = vmatpush1.bf16.xpose.msra.mxu1 %v6186_v8  ;;  %v810_v7 = vld [vmem:[#allocation5 + $0x13e8] sm:$0xff] }
 0x349   :  { %5279 = vmatprep.subr.bf16.mxu0 %v6137_v9  ;;  %5320 = vmatprep.subr.bf16.mxu1 %v6139_v10  ;;  %v834_v8 = vld [vmem:[#allocation5 + $0x14a8] sm:$0xff] }
 0x34a   :  { %v6570_v20 = vcombine.low %v810_v7, %v834_v8 }
 0x350   :  { %5280 = vmatpush1.bf16.xpose.msra.mxu0 %v6136_v14  ;;  %5321 = vmatpush1.bf16.xpose.msra.mxu1 %v6138_v15  ;;  %v6571_v14 = vcombine.high %v810_v7, %v834_v8  ;;  %v785_v15 = vld [vmem:[#allocation5 + $0x1320] sm:$0xff]  ;;  %v476_v7 = vld [vmem:[#allocation5 + $0x978] sm:$0xff] }
 0x351   :  { %5281 = vmatprep.subr.bf16.mxu0 %v6089_v16  ;;  %5322 = vmatprep.subr.bf16.mxu1 %v6091_v17  ;;  %v762_v16 = vld [vmem:[#allocation5 + $0x1268] sm:$0xff]  ;;  %v500_v8 = vld [vmem:[#allocation5 + $0xa38] sm:$0xff] }
 0x352   :  { %v786_v17 = vld [vmem:[#allocation5 + $0x1328] sm:$0xff] }
 0x353   :  { %v6523_v22 = vcombine.high %v762_v16, %v786_v17  ;;  %v6522_v28 = vcombine.low %v762_v16, %v786_v17  ;;  %v427_v16 = vld [vmem:[#allocation5 + $0x7f0] sm:$0xff] }
 0x354   :  { %v451_v17 = vld [vmem:[#allocation5 + $0x8b0] sm:$0xff] }
 0x358   :  { %5282 = vmatpush1.bf16.xpose.msra.mxu0 %v6088_v23  ;;  %5323 = vmatpush1.bf16.xpose.msra.mxu1 %v6090_v24  ;;  %v713_v23 = vld [vmem:[#allocation5 + $0x10e0] sm:$0xff] }
 0x359   :  { %5283 = vmatprep.subr.bf16.mxu0 %v6041_v25  ;;  %5324 = vmatprep.subr.bf16.mxu1 %v6043_v27  ;;  %v737_v24 = vld [vmem:[#allocation5 + $0x11a0] sm:$0xff]  ;;  %v714_v25 = vld [vmem:[#allocation5 + $0x10e8] sm:$0xff] }
 0x35a   :  { %v738_v27 = vld [vmem:[#allocation5 + $0x11a8] sm:$0xff]  ;;  %v6473_v29 = vcombine.high %v713_v23, %v737_v24  ;;  %v6472_v34 = vcombine.low %v713_v23, %v737_v24  ;;  %v6189_v23 = vcombine.high %v427_v16, %v451_v17 }
 0x35b   :  { %v6475_v30 = vcombine.high %v714_v25, %v738_v27  ;;  %v6474_v35 = vcombine.low %v714_v25, %v738_v27  ;;  %v379_v25 = vld [vmem:[#allocation5 + $0x670] sm:$0xff] }
 0x35c   :  { %v403_v27 = vld [vmem:[#allocation5 + $0x730] sm:$0xff] }
 0x360   :  { %5284 = vmatpush1.bf16.xpose.msra.mxu0 %v6040_v31  ;;  %5325 = vmatpush1.bf16.xpose.msra.mxu1 %v6042_v32  ;;  %v665_v31 = vld [vmem:[#allocation5 + $0xf60] sm:$0xff] }
 0x361   :  { %5285 = vmatprep.subr.bf16.mxu0 %v5993_v4  ;;  %5326 = vmatprep.subr.bf16.mxu1 %v5995_v33  ;;  %v689_v32 = vld [vmem:[#allocation5 + $0x1020] sm:$0xff]  ;;  %v666_v4 = vld [vmem:[#allocation5 + $0xf68] sm:$0xff] }
 0x362   :  { %v690_v33 = vld [vmem:[#allocation5 + $0x1028] sm:$0xff]  ;;  %v6425_v37 = vcombine.high %v665_v31, %v689_v32  ;;  %v6424_v45 = vcombine.low %v665_v31, %v689_v32  ;;  %v6141_v31 = vcombine.high %v379_v25, %v403_v27 }
 0x363   :  { %v6427_v38 = vcombine.high %v666_v4, %v690_v33  ;;  %v6426_v46 = vcombine.low %v666_v4, %v690_v33  ;;  %v331_v4 = vld [vmem:[#allocation5 + $0x4f0] sm:$0xff] }
 0x364   :  { %v355_v33 = vld [vmem:[#allocation5 + $0x5b0] sm:$0xff] }
 0x368   :  { %5286 = vmatpush1.bf16.xpose.msra.mxu0 %v5992_v39  ;;  %5327 = vmatpush1.bf16.xpose.msra.mxu1 %v5994_v40  ;;  %v617_v39 = vld [vmem:[#allocation5 + $0xde0] sm:$0xff] }
 0x369   :  { %5287 = vmatprep.subr.bf16.mxu0 %v5945_v43  ;;  %5328 = vmatprep.subr.bf16.mxu1 %v5947_v44  ;;  %v641_v40 = vld [vmem:[#allocation5 + $0xea0] sm:$0xff]  ;;  %v618_v43 = vld [vmem:[#allocation5 + $0xde8] sm:$0xff] }
 0x36a   :  { %v642_v44 = vld [vmem:[#allocation5 + $0xea8] sm:$0xff]  ;;  %v6377_v47 = vcombine.high %v617_v39, %v641_v40 }
 0x36b   :  { %v6379_v48 = vcombine.high %v618_v43, %v642_v44 }
 0x370   :  { %5288 = vmatpush1.bf16.xpose.msra.mxu0 %v5944_v49  ;;  %5329 = vmatpush1.bf16.xpose.msra.mxu1 %v5946_v51  ;;  %v569_v49 = vld [vmem:[#allocation5 + $0xc60] sm:$0xff] }
 0x371   :  { %5289 = vmatprep.subr.bf16.mxu0 %v6665_v18  ;;  %5330 = vmatprep.subr.bf16.mxu1 %v6667_v52  ;;  %v593_v51 = vld [vmem:[#allocation5 + $0xd20] sm:$0xff]  ;;  %v570_v18 = vld [vmem:[#allocation5 + $0xc68] sm:$0xff] }
 0x372   :  { %v594_v52 = vld [vmem:[#allocation5 + $0xd28] sm:$0xff]  ;;  %v6329_v55 = vcombine.high %v569_v49, %v593_v51 }
 0x373   :  { %v6331_v56 = vcombine.high %v570_v18, %v594_v52 }
 0x377   :  { %v5143_v61 = vpop.f32.mrf.mxu0  ;;  %v5184_v63 = vpop.f32.mrf.mxu1 }
 0x378   :  { %v5144_v62 = vadd.f32 %v5143_v61, %v6885_v42  ;;  %5290 = vmatpush2.bf16.xpose.msra.mxu0 %v6664_v26  ;;  %5331 = vmatpush2.bf16.xpose.msra.mxu1 %v6666_v57  ;;  %v6616_v42 = vcombine.low %v857_v53, %v881_v54  ;;  %v6376_v53 = vcombine.low %v617_v39, %v641_v40  ;;  %v523_v26 = vld [vmem:[#allocation5 + $0xaf0] sm:$0xff] }
 0x379   :  { %v5145_v0 = vpop.f32.mrf.mxu0  ;;  %5291 = vmatprep.subr.bf16.mxu0 %v6617_v58  ;;  %v5186_v3 = vpop.f32.mrf.mxu1  ;;  %5332 = vmatprep.subr.bf16.mxu1 %v6619_v59  ;;  %v6378_v54 = vcombine.low %v618_v43, %v642_v44  ;;  %v547_v57 = vld [vmem:[#allocation5 + $0xbb0] sm:$0xff]  ;;  %v524_v58 = vld [vmem:[#allocation5 + $0xaf8] sm:$0xff]  ;;  %v6328_v61 = vcombine.low %v569_v49, %v593_v51  ;;  %v6093_v39 = vcombine.high %v331_v4, %v355_v33 }
 0x37a   :  { %v6891_v1 = vadd.f32 %v5184_v63, %v5144_v62  ;;  %v5146_v2 = vadd.f32 %v5145_v0, %v6888_v50  ;;  %v761_v50 = vld [vmem:[#allocation5 + $0x1260] sm:$0xff]  ;;  %v548_v59 = vld [vmem:[#allocation5 + $0xbb8] sm:$0xff]  ;;  %v6330_v62 = vcombine.low %v570_v18, %v594_v52  ;;  %v6285_v63 = vcombine.high %v523_v26, %v547_v57  ;;  %v283_v43 = vld [vmem:[#allocation5 + $0x370] sm:$0xff] }
 0x37b   :  { %v5147_v6 = vpop.f32.mrf.mxu0  ;;  %v5188_v10 = vpop.f32.mrf.mxu1  ;;  %v6521_v21 = vcombine.high %v761_v50, %v785_v15  ;;  %v6520_v60 = vcombine.low %v761_v50, %v785_v15  ;;  %v6287_v0 = vcombine.high %v524_v58, %v548_v59  ;;  %v307_v44 = vld [vmem:[#allocation5 + $0x430] sm:$0xff] }
 0x37c   :  { %v6894_v9 = vadd.f32 %v5186_v3, %v5146_v2  ;;  %v101_v2 = vld [vmem:[#allocation3 + $0xc0] sm:$0xff]  ;;  %v103_v3 = vld [vmem:[#allocation3 + $0xd0] sm:$0xff]  ;;  %v106_v10 = vld [vmem:[#allocation3 + $0xe8] sm:$0xff]  ;;  %v6045_v49 = vcombine.high %v283_v43, %v307_v44 }
 0x37d   :  { %v5148_v41 = vpop.f32.mrf.mxu0  ;;  %v5189_v13 = vpop.f32.mrf.mxu1  ;;  %v149_v6 = vpack.c.bf16 %v101_v2, %v101_v2  ;;  %v154_v50 = vpack.c.bf16 %v106_v10, %v106_v10  ;;  %v235_v18 = vld [vmem:[#allocation5 + $0x1f0] sm:$0xff] }
 0x37e   :  { %v6284_v41 = vcombine.low %v523_v26, %v547_v57  ;;  %v6237_v13 = vcombine.high %v475_v5, %v499_v36  ;;  %v259_v52 = vld [vmem:[#allocation5 + $0x2b0] sm:$0xff] }
 0x37f   :  { %v5997_v26 = vcombine.high %v235_v18, %v259_v52 }
 0x380   :  { %5292 = vmatpush2.bf16.xpose.msra.mxu0 %v6616_v42  ;;  %5333 = vmatpush2.bf16.xpose.msra.mxu1 %v6618_v11  ;;  %v151_v42 = vpack.c.bf16 %v103_v3, %v103_v3  ;;  %v108_v11 = vld [vmem:[#allocation3 + $0xf8] sm:$0xff] }
 0x381   :  { %5293 = vmatprep.subr.bf16.mxu0 %v6569_v12  ;;  %5334 = vmatprep.subr.bf16.mxu1 %v6571_v14  ;;  %v6286_v12 = vcombine.low %v524_v58, %v548_v59  ;;  %v6239_v14 = vcombine.high %v476_v7, %v500_v8  ;;  %v156_v15 = vpack.c.bf16 %v108_v11, %v108_v11  ;;  %v187_v58 = vld [vmem:[#allocation5 + $0x70] sm:$0xff] }
 0x382   :  { %v211_v59 = vld [vmem:[#allocation5 + $0x130] sm:$0xff] }
 0x383   :  { %v5949_v2 = vcombine.high %v187_v58, %v211_v59  ;;  %v859_v11 = vld [vmem:[#allocation5 + $0x1570] sm:$0xff] }
 0x388   :  { %5294 = vmatpush2.bf16.xpose.msra.mxu0 %v6568_v19  ;;  %5335 = vmatpush2.bf16.xpose.msra.mxu1 %v6570_v20  ;;  %v428_v19 = vld [vmem:[#allocation5 + $0x7f8] sm:$0xff] }
 0x389   :  { %5295 = vmatprep.subr.bf16.mxu0 %v6521_v21  ;;  %5336 = vmatprep.subr.bf16.mxu1 %v6523_v22  ;;  %v452_v20 = vld [vmem:[#allocation5 + $0x8b8] sm:$0xff]  ;;  %v6236_v21 = vcombine.low %v475_v5, %v499_v36  ;;  %v6238_v22 = vcombine.low %v476_v7, %v500_v8  ;;  %v907_v5 = vld [vmem:[#allocation5 + $0x16f0] sm:$0xff]  ;;  %v5948_v8 = vcombine.low %v187_v58, %v211_v59 }
 0x38a   :  { %v6191_v24 = vcombine.high %v428_v19, %v452_v20  ;;  %v931_v36 = vld [vmem:[#allocation5 + $0x17b0] sm:$0xff]  ;;  %v932_v7 = vld [vmem:[#allocation5 + $0x17b8] sm:$0xff] }
 0x390   :  { %5296 = vmatpush2.bf16.xpose.msra.mxu0 %v6520_v60  ;;  %5337 = vmatpush2.bf16.xpose.msra.mxu1 %v6522_v28  ;;  %v380_v60 = vld [vmem:[#allocation5 + $0x678] sm:$0xff] }
 0x391   :  { %5297 = vmatprep.subr.bf16.mxu0 %v6473_v29  ;;  %5338 = vmatprep.subr.bf16.mxu1 %v6475_v30  ;;  %v404_v28 = vld [vmem:[#allocation5 + $0x738] sm:$0xff]  ;;  %v6188_v29 = vcombine.low %v427_v16, %v451_v17  ;;  %v6190_v30 = vcombine.low %v428_v19, %v452_v20 }
 0x392   :  { %v6143_v32 = vcombine.high %v380_v60, %v404_v28 }
 0x398   :  { %5298 = vmatpush2.bf16.xpose.msra.mxu0 %v6472_v34  ;;  %5339 = vmatpush2.bf16.xpose.msra.mxu1 %v6474_v35  ;;  %v332_v34 = vld [vmem:[#allocation5 + $0x4f8] sm:$0xff] }
 0x399   :  { %5299 = vmatprep.subr.bf16.mxu0 %v6425_v37  ;;  %5340 = vmatprep.subr.bf16.mxu1 %v6427_v38  ;;  %v356_v35 = vld [vmem:[#allocation5 + $0x5b8] sm:$0xff]  ;;  %v6140_v37 = vcombine.low %v379_v25, %v403_v27  ;;  %v6142_v38 = vcombine.low %v380_v60, %v404_v28  ;;  %v811_v27 = vld [vmem:[#allocation5 + $0x13f0] sm:$0xff] }
 0x39a   :  { %v6095_v40 = vcombine.high %v332_v34, %v356_v35  ;;  %v835_v60 = vld [vmem:[#allocation5 + $0x14b0] sm:$0xff] }
 0x3a0   :  { %5300 = vmatpush2.bf16.xpose.msra.mxu0 %v6424_v45  ;;  %5341 = vmatpush2.bf16.xpose.msra.mxu1 %v6426_v46  ;;  %v284_v45 = vld [vmem:[#allocation5 + $0x378] sm:$0xff] }
 0x3a1   :  { %5301 = vmatprep.subr.bf16.mxu0 %v6377_v47  ;;  %5342 = vmatprep.subr.bf16.mxu1 %v6379_v48  ;;  %v308_v46 = vld [vmem:[#allocation5 + $0x438] sm:$0xff]  ;;  %v6092_v47 = vcombine.low %v331_v4, %v355_v33  ;;  %v6094_v48 = vcombine.low %v332_v34, %v356_v35  ;;  %v6573_v34 = vcombine.high %v811_v27, %v835_v60 }
 0x3a2   :  { %v6047_v51 = vcombine.high %v284_v45, %v308_v46 }
 0x3a8   :  { %5302 = vmatpush2.bf16.xpose.msra.mxu0 %v6376_v53  ;;  %5343 = vmatpush2.bf16.xpose.msra.mxu1 %v6378_v54  ;;  %v236_v53 = vld [vmem:[#allocation5 + $0x1f8] sm:$0xff] }
 0x3a9   :  { %5303 = vmatprep.subr.bf16.mxu0 %v6329_v55  ;;  %5344 = vmatprep.subr.bf16.mxu1 %v6331_v56  ;;  %v260_v54 = vld [vmem:[#allocation5 + $0x2b8] sm:$0xff]  ;;  %v6044_v55 = vcombine.low %v283_v43, %v307_v44  ;;  %v6046_v56 = vcombine.low %v284_v45, %v308_v46  ;;  %v6572_v43 = vcombine.low %v811_v27, %v835_v60  ;;  %v477_v27 = vld [vmem:[#allocation5 + $0x980] sm:$0xff] }
 0x3aa   :  { %v5999_v57 = vcombine.high %v236_v53, %v260_v54  ;;  %v501_v60 = vld [vmem:[#allocation5 + $0xa40] sm:$0xff] }
 0x3b0   :  { %5304 = vmatpush2.bf16.xpose.msra.mxu0 %v6328_v61  ;;  %5345 = vmatpush2.bf16.xpose.msra.mxu1 %v6330_v62  ;;  %v188_v61 = vld [vmem:[#allocation5 + $0x78] sm:$0xff] }
 0x3b1   :  { %5355 = vmatprep.subr.bf16.mxu0 %v6285_v63  ;;  %5396 = vmatprep.subr.bf16.mxu1 %v6287_v0  ;;  %v212_v62 = vld [vmem:[#allocation5 + $0x138] sm:$0xff]  ;;  %v5996_v63 = vcombine.low %v235_v18, %v259_v52  ;;  %v5998_v0 = vcombine.low %v236_v53, %v260_v54 }
 0x3b2   :  { %v5951_v3 = vcombine.high %v188_v61, %v212_v62  ;;  %v5950_v10 = vcombine.low %v188_v61, %v212_v62 }
 0x3b7   :  { %5306 = vmatmul.mubr.bf16.vlgmr.msra.gmra.mxu0 %v149_v6  ;;  %5347 = vmatmul.mubr.bf16.vlgmr.msra.gmra.mxu1 %v151_v42  ;;  %v908_v6 = vld [vmem:[#allocation5 + $0x16f8] sm:$0xff]  ;;  %v6669_v42 = vcombine.high %v907_v5, %v931_v36 }
 0x3b8   :  { %5356 = vmatpush1.bf16.xpose.msra.mxu0 %v6284_v41  ;;  %5397 = vmatpush1.bf16.xpose.msra.mxu1 %v6286_v12  ;;  %v6671_v41 = vcombine.high %v908_v6, %v932_v7  ;;  %v883_v12 = vld [vmem:[#allocation5 + $0x1630] sm:$0xff] }
 0x3b9   :  { %5357 = vmatprep.subr.bf16.mxu0 %v6237_v13  ;;  %5398 = vmatprep.subr.bf16.mxu1 %v6239_v14  ;;  %v860_v13 = vld [vmem:[#allocation5 + $0x1578] sm:$0xff]  ;;  %v6621_v16 = vcombine.high %v859_v11, %v883_v12 }
 0x3ba   :  { %5387 = vmatprep.mubr.bf16.mxu0 %v154_v50  ;;  %5428 = vmatprep.mubr.bf16.mxu1 %v156_v15  ;;  %v884_v14 = vld [vmem:[#allocation5 + $0x1638] sm:$0xff]  ;;  %v6668_v50 = vcombine.low %v907_v5, %v931_v36  ;;  %v6670_v15 = vcombine.low %v908_v6, %v932_v7 }
 0x3bb   :  { %v6623_v17 = vcombine.high %v860_v13, %v884_v14  ;;  %v6622_v33 = vcombine.low %v860_v13, %v884_v14 }
 0x3c0   :  { %5358 = vmatpush1.bf16.xpose.msra.mxu0 %v6236_v21  ;;  %5399 = vmatpush1.bf16.xpose.msra.mxu1 %v6238_v22 }
 0x3c1   :  { %5359 = vmatprep.subr.bf16.mxu0 %v6189_v23  ;;  %5400 = vmatprep.subr.bf16.mxu1 %v6191_v24 }
 0x3c8   :  { %5360 = vmatpush1.bf16.xpose.msra.mxu0 %v6188_v29  ;;  %5401 = vmatpush1.bf16.xpose.msra.mxu1 %v6190_v30  ;;  %v812_v29 = vld [vmem:[#allocation5 + $0x13f8] sm:$0xff] }
 0x3c9   :  { %5361 = vmatprep.subr.bf16.mxu0 %v6141_v31  ;;  %5402 = vmatprep.subr.bf16.mxu1 %v6143_v32  ;;  %v836_v30 = vld [vmem:[#allocation5 + $0x14b8] sm:$0xff] }
 0x3ca   :  { %v6574_v44 = vcombine.low %v812_v29, %v836_v30 }
 0x3d0   :  { %5362 = vmatpush1.bf16.xpose.msra.mxu0 %v6140_v37  ;;  %5403 = vmatpush1.bf16.xpose.msra.mxu1 %v6142_v38  ;;  %v6575_v37 = vcombine.high %v812_v29, %v836_v30  ;;  %v787_v38 = vld [vmem:[#allocation5 + $0x1330] sm:$0xff]  ;;  %v478_v29 = vld [vmem:[#allocation5 + $0x988] sm:$0xff] }
 0x3d1   :  { %5363 = vmatprep.subr.bf16.mxu0 %v6093_v39  ;;  %5404 = vmatprep.subr.bf16.mxu1 %v6095_v40  ;;  %v764_v39 = vld [vmem:[#allocation5 + $0x1278] sm:$0xff]  ;;  %v502_v30 = vld [vmem:[#allocation5 + $0xa48] sm:$0xff] }
 0x3d2   :  { %v788_v40 = vld [vmem:[#allocation5 + $0x1338] sm:$0xff] }
 0x3d3   :  { %v6527_v46 = vcombine.high %v764_v39, %v788_v40  ;;  %v6526_v52 = vcombine.low %v764_v39, %v788_v40  ;;  %v429_v39 = vld [vmem:[#allocation5 + $0x800] sm:$0xff] }
 0x3d4   :  { %v453_v40 = vld [vmem:[#allocation5 + $0x8c0] sm:$0xff] }
 0x3d8   :  { %5364 = vmatpush1.bf16.xpose.msra.mxu0 %v6092_v47  ;;  %5405 = vmatpush1.bf16.xpose.msra.mxu1 %v6094_v48  ;;  %v715_v47 = vld [vmem:[#allocation5 + $0x10f0] sm:$0xff] }
 0x3d9   :  { %5365 = vmatprep.subr.bf16.mxu0 %v6045_v49  ;;  %5406 = vmatprep.subr.bf16.mxu1 %v6047_v51  ;;  %v739_v48 = vld [vmem:[#allocation5 + $0x11b0] sm:$0xff]  ;;  %v716_v49 = vld [vmem:[#allocation5 + $0x10f8] sm:$0xff] }
 0x3da   :  { %v740_v51 = vld [vmem:[#allocation5 + $0x11b8] sm:$0xff]  ;;  %v6477_v53 = vcombine.high %v715_v47, %v739_v48  ;;  %v6476_v58 = vcombine.low %v715_v47, %v739_v48  ;;  %v6193_v47 = vcombine.high %v429_v39, %v453_v40 }
 0x3db   :  { %v6479_v54 = vcombine.high %v716_v49, %v740_v51  ;;  %v6478_v59 = vcombine.low %v716_v49, %v740_v51  ;;  %v381_v49 = vld [vmem:[#allocation5 + $0x680] sm:$0xff] }
 0x3dc   :  { %v405_v51 = vld [vmem:[#allocation5 + $0x740] sm:$0xff] }
 0x3e0   :  { %5366 = vmatpush1.bf16.xpose.msra.mxu0 %v6044_v55  ;;  %5407 = vmatpush1.bf16.xpose.msra.mxu1 %v6046_v56  ;;  %v667_v55 = vld [vmem:[#allocation5 + $0xf70] sm:$0xff] }
 0x3e1   :  { %5367 = vmatprep.subr.bf16.mxu0 %v5997_v26  ;;  %5408 = vmatprep.subr.bf16.mxu1 %v5999_v57  ;;  %v691_v56 = vld [vmem:[#allocation5 + $0x1030] sm:$0xff]  ;;  %v668_v26 = vld [vmem:[#allocation5 + $0xf78] sm:$0xff] }
 0x3e2   :  { %v692_v57 = vld [vmem:[#allocation5 + $0x1038] sm:$0xff]  ;;  %v6429_v61 = vcombine.high %v667_v55, %v691_v56  ;;  %v6428_v5 = vcombine.low %v667_v55, %v691_v56  ;;  %v6145_v55 = vcombine.high %v381_v49, %v405_v51 }
 0x3e3   :  { %v6431_v62 = vcombine.high %v668_v26, %v692_v57  ;;  %v6430_v36 = vcombine.low %v668_v26, %v692_v57  ;;  %v333_v26 = vld [vmem:[#allocation5 + $0x500] sm:$0xff] }
 0x3e4   :  { %v357_v57 = vld [vmem:[#allocation5 + $0x5c0] sm:$0xff] }
 0x3e8   :  { %5368 = vmatpush1.bf16.xpose.msra.mxu0 %v5996_v63  ;;  %5409 = vmatpush1.bf16.xpose.msra.mxu1 %v5998_v0  ;;  %v619_v63 = vld [vmem:[#allocation5 + $0xdf0] sm:$0xff] }
 0x3e9   :  { %5369 = vmatprep.subr.bf16.mxu0 %v5949_v2  ;;  %5410 = vmatprep.subr.bf16.mxu1 %v5951_v3  ;;  %v643_v0 = vld [vmem:[#allocation5 + $0xeb0] sm:$0xff]  ;;  %v620_v2 = vld [vmem:[#allocation5 + $0xdf8] sm:$0xff] }
 0x3ea   :  { %v644_v3 = vld [vmem:[#allocation5 + $0xeb8] sm:$0xff]  ;;  %v6381_v6 = vcombine.high %v619_v63, %v643_v0 }
 0x3eb   :  { %v6383_v7 = vcombine.high %v620_v2, %v644_v3 }
 0x3f0   :  { %5370 = vmatpush1.bf16.xpose.msra.mxu0 %v5948_v8  ;;  %5411 = vmatpush1.bf16.xpose.msra.mxu1 %v5950_v10  ;;  %v571_v8 = vld [vmem:[#allocation5 + $0xc70] sm:$0xff] }
 0x3f1   :  { %5371 = vmatprep.subr.bf16.mxu0 %v6669_v42  ;;  %5412 = vmatprep.subr.bf16.mxu1 %v6671_v41  ;;  %v595_v10 = vld [vmem:[#allocation5 + $0xd30] sm:$0xff]  ;;  %v572_v42 = vld [vmem:[#allocation5 + $0xc78] sm:$0xff] }
 0x3f2   :  { %v596_v41 = vld [vmem:[#allocation5 + $0xd38] sm:$0xff]  ;;  %v6333_v13 = vcombine.high %v571_v8, %v595_v10 }
 0x3f3   :  { %v6335_v14 = vcombine.high %v572_v42, %v596_v41 }
 0x3f7   :  { %v5225_v19 = vpop.f32.mrf.mxu0  ;;  %v5266_v21 = vpop.f32.mrf.mxu1 }
 0x3f8   :  { %v5226_v20 = vadd.f32 %v5225_v19, %v6891_v1  ;;  %5372 = vmatpush2.bf16.xpose.msra.mxu0 %v6668_v50  ;;  %5413 = vmatpush2.bf16.xpose.msra.mxu1 %v6670_v15  ;;  %v6620_v1 = vcombine.low %v859_v11, %v883_v12  ;;  %v6380_v11 = vcombine.low %v619_v63, %v643_v0  ;;  %v525_v50 = vld [vmem:[#allocation5 + $0xb00] sm:$0xff] }
 0x3f9   :  { %v5227_v22 = vpop.f32.mrf.mxu0  ;;  %5373 = vmatprep.subr.bf16.mxu0 %v6621_v16  ;;  %v5268_v25 = vpop.f32.mrf.mxu1  ;;  %5414 = vmatprep.subr.bf16.mxu1 %v6623_v17  ;;  %v6382_v12 = vcombine.low %v620_v2, %v644_v3  ;;  %v549_v15 = vld [vmem:[#allocation5 + $0xbc0] sm:$0xff]  ;;  %v526_v16 = vld [vmem:[#allocation5 + $0xb08] sm:$0xff]  ;;  %v6332_v19 = vcombine.low %v571_v8, %v595_v10  ;;  %v6097_v63 = vcombine.high %v333_v26, %v357_v57 }
 0x3fa   :  { %v6897_v23 = vadd.f32 %v5266_v21, %v5226_v20  ;;  %v5228_v24 = vadd.f32 %v5227_v22, %v6894_v9  ;;  %v763_v9 = vld [vmem:[#allocation5 + $0x1270] sm:$0xff]  ;;  %v550_v17 = vld [vmem:[#allocation5 + $0xbc8] sm:$0xff]  ;;  %v6334_v20 = vcombine.low %v572_v42, %v596_v41  ;;  %v6289_v21 = vcombine.high %v525_v50, %v549_v15  ;;  %v285_v2 = vld [vmem:[#allocation5 + $0x380] sm:$0xff] }
 0x3fb   :  { %v5229_v28 = vpop.f32.mrf.mxu0  ;;  %v5270_v32 = vpop.f32.mrf.mxu1  ;;  %v6525_v45 = vcombine.high %v763_v9, %v787_v38  ;;  %v6524_v18 = vcombine.low %v763_v9, %v787_v38  ;;  %v6291_v22 = vcombine.high %v526_v16, %v550_v17  ;;  %v309_v3 = vld [vmem:[#allocation5 + $0x440] sm:$0xff] }
 0x3fc   :  { %v6900_v31 = vadd.f32 %v5268_v25, %v5228_v24  ;;  %v105_v24 = vld [vmem:[#allocation3 + $0xe0] sm:$0xff]  ;;  %v107_v25 = vld [vmem:[#allocation3 + $0xf0] sm:$0xff]  ;;  %v110_v32 = vld [vmem:[#allocation3 + $0x108] sm:$0xff]  ;;  %v6049_v8 = vcombine.high %v285_v2, %v309_v3 }
 0x3fd   :  { %v5230_v4 = vpop.f32.mrf.mxu0  ;;  %v5271_v35 = vpop.f32.mrf.mxu1  ;;  %v153_v28 = vpack.c.bf16 %v105_v24, %v105_v24  ;;  %v158_v9 = vpack.c.bf16 %v110_v32, %v110_v32  ;;  %v237_v42 = vld [vmem:[#allocation5 + $0x200] sm:$0xff] }
 0x3fe   :  { %v6288_v4 = vcombine.low %v525_v50, %v549_v15  ;;  %v6241_v35 = vcombine.high %v477_v27, %v501_v60  ;;  %v261_v41 = vld [vmem:[#allocation5 + $0x2c0] sm:$0xff] }
 0x3ff   :  { %v6001_v50 = vcombine.high %v237_v42, %v261_v41 }
 0x400   :  { %5374 = vmatpush2.bf16.xpose.msra.mxu0 %v6620_v1  ;;  %5415 = vmatpush2.bf16.xpose.msra.mxu1 %v6622_v33  ;;  %v155_v1 = vpack.c.bf16 %v107_v25, %v107_v25  ;;  %v112_v33 = vld [vmem:[#allocation3 + $0x118] sm:$0xff] }
 0x401   :  { %5375 = vmatprep.subr.bf16.mxu0 %v6573_v34  ;;  %5416 = vmatprep.subr.bf16.mxu1 %v6575_v37  ;;  %v6290_v34 = vcombine.low %v526_v16, %v550_v17  ;;  %v6243_v37 = vcombine.high %v478_v29, %v502_v30  ;;  %v160_v38 = vpack.c.bf16 %v112_v33, %v112_v33  ;;  %v189_v16 = vld [vmem:[#allocation5 + $0x80] sm:$0xff] }
 0x402   :  { %v213_v17 = vld [vmem:[#allocation5 + $0x140] sm:$0xff] }
 0x403   :  { %v5953_v24 = vcombine.high %v189_v16, %v213_v17  ;;  %v861_v33 = vld [vmem:[#allocation5 + $0x1580] sm:$0xff] }
 0x408   :  { %5376 = vmatpush2.bf16.xpose.msra.mxu0 %v6572_v43  ;;  %5417 = vmatpush2.bf16.xpose.msra.mxu1 %v6574_v44  ;;  %v430_v43 = vld [vmem:[#allocation5 + $0x808] sm:$0xff] }
 0x409   :  { %5377 = vmatprep.subr.bf16.mxu0 %v6525_v45  ;;  %5418 = vmatprep.subr.bf16.mxu1 %v6527_v46  ;;  %v454_v44 = vld [vmem:[#allocation5 + $0x8c8] sm:$0xff]  ;;  %v6240_v45 = vcombine.low %v477_v27, %v501_v60  ;;  %v6242_v46 = vcombine.low %v478_v29, %v502_v30  ;;  %v909_v27 = vld [vmem:[#allocation5 + $0x1700] sm:$0xff]  ;;  %v5952_v30 = vcombine.low %v189_v16, %v213_v17 }
 0x40a   :  { %v6195_v48 = vcombine.high %v430_v43, %v454_v44  ;;  %v933_v60 = vld [vmem:[#allocation5 + $0x17c0] sm:$0xff]  ;;  %v934_v29 = vld [vmem:[#allocation5 + $0x17c8] sm:$0xff] }
 0x410   :  { %5378 = vmatpush2.bf16.xpose.msra.mxu0 %v6524_v18  ;;  %5419 = vmatpush2.bf16.xpose.msra.mxu1 %v6526_v52  ;;  %v382_v18 = vld [vmem:[#allocation5 + $0x688] sm:$0xff] }
 0x411   :  { %5379 = vmatprep.subr.bf16.mxu0 %v6477_v53  ;;  %5420 = vmatprep.subr.bf16.mxu1 %v6479_v54  ;;  %v406_v52 = vld [vmem:[#allocation5 + $0x748] sm:$0xff]  ;;  %v6192_v53 = vcombine.low %v429_v39, %v453_v40  ;;  %v6194_v54 = vcombine.low %v430_v43, %v454_v44 }
 0x412   :  { %v6147_v56 = vcombine.high %v382_v18, %v406_v52 }
 0x418   :  { %5380 = vmatpush2.bf16.xpose.msra.mxu0 %v6476_v58  ;;  %5421 = vmatpush2.bf16.xpose.msra.mxu1 %v6478_v59  ;;  %v334_v58 = vld [vmem:[#allocation5 + $0x508] sm:$0xff] }
 0x419   :  { %5381 = vmatprep.subr.bf16.mxu0 %v6429_v61  ;;  %5422 = vmatprep.subr.bf16.mxu1 %v6431_v62  ;;  %v358_v59 = vld [vmem:[#allocation5 + $0x5c8] sm:$0xff]  ;;  %v6144_v61 = vcombine.low %v381_v49, %v405_v51  ;;  %v6146_v62 = vcombine.low %v382_v18, %v406_v52  ;;  %v813_v51 = vld [vmem:[#allocation5 + $0x1400] sm:$0xff] }
 0x41a   :  { %v6099_v0 = vcombine.high %v334_v58, %v358_v59  ;;  %v837_v18 = vld [vmem:[#allocation5 + $0x14c0] sm:$0xff] }
 0x420   :  { %5382 = vmatpush2.bf16.xpose.msra.mxu0 %v6428_v5  ;;  %5423 = vmatpush2.bf16.xpose.msra.mxu1 %v6430_v36  ;;  %v286_v5 = vld [vmem:[#allocation5 + $0x388] sm:$0xff] }
 0x421   :  { %5383 = vmatprep.subr.bf16.mxu0 %v6381_v6  ;;  %5424 = vmatprep.subr.bf16.mxu1 %v6383_v7  ;;  %v310_v36 = vld [vmem:[#allocation5 + $0x448] sm:$0xff]  ;;  %v6096_v6 = vcombine.low %v333_v26, %v357_v57  ;;  %v6098_v7 = vcombine.low %v334_v58, %v358_v59  ;;  %v6577_v58 = vcombine.high %v813_v51, %v837_v18 }
 0x422   :  { %v6051_v10 = vcombine.high %v286_v5, %v310_v36 }
 0x428   :  { %5384 = vmatpush2.bf16.xpose.msra.mxu0 %v6380_v11  ;;  %5425 = vmatpush2.bf16.xpose.msra.mxu1 %v6382_v12  ;;  %v238_v11 = vld [vmem:[#allocation5 + $0x208] sm:$0xff] }
 0x429   :  { %5385 = vmatprep.subr.bf16.mxu0 %v6333_v13  ;;  %5426 = vmatprep.subr.bf16.mxu1 %v6335_v14  ;;  %v262_v12 = vld [vmem:[#allocation5 + $0x2c8] sm:$0xff]  ;;  %v6048_v13 = vcombine.low %v285_v2, %v309_v3  ;;  %v6050_v14 = vcombine.low %v286_v5, %v310_v36  ;;  %v6576_v2 = vcombine.low %v813_v51, %v837_v18  ;;  %v479_v51 = vld [vmem:[#allocation5 + $0x990] sm:$0xff] }
 0x42a   :  { %v6003_v15 = vcombine.high %v238_v11, %v262_v12  ;;  %v503_v18 = vld [vmem:[#allocation5 + $0xa50] sm:$0xff] }
 0x430   :  { %5386 = vmatpush2.bf16.xpose.msra.mxu0 %v6332_v19  ;;  %5427 = vmatpush2.bf16.xpose.msra.mxu1 %v6334_v20  ;;  %v190_v19 = vld [vmem:[#allocation5 + $0x88] sm:$0xff] }
 0x431   :  { %5437 = vmatprep.subr.bf16.mxu0 %v6289_v21  ;;  %5478 = vmatprep.subr.bf16.mxu1 %v6291_v22  ;;  %v214_v20 = vld [vmem:[#allocation5 + $0x148] sm:$0xff]  ;;  %v6000_v21 = vcombine.low %v237_v42, %v261_v41  ;;  %v6002_v22 = vcombine.low %v238_v11, %v262_v12 }
 0x432   :  { %v5955_v25 = vcombine.high %v190_v19, %v214_v20  ;;  %v5954_v32 = vcombine.low %v190_v19, %v214_v20 }
 0x437   :  { %5388 = vmatmul.mubr.bf16.vlgmr.msra.gmra.mxu0 %v153_v28  ;;  %5429 = vmatmul.mubr.bf16.vlgmr.msra.gmra.mxu1 %v155_v1  ;;  %v910_v28 = vld [vmem:[#allocation5 + $0x1708] sm:$0xff]  ;;  %v6673_v1 = vcombine.high %v909_v27, %v933_v60 }
 0x438   :  { %5438 = vmatpush1.bf16.xpose.msra.mxu0 %v6288_v4  ;;  %5479 = vmatpush1.bf16.xpose.msra.mxu1 %v6290_v34  ;;  %v6675_v4 = vcombine.high %v910_v28, %v934_v29  ;;  %v885_v34 = vld [vmem:[#allocation5 + $0x1640] sm:$0xff] }
 0x439   :  { %5439 = vmatprep.subr.bf16.mxu0 %v6241_v35  ;;  %5480 = vmatprep.subr.bf16.mxu1 %v6243_v37  ;;  %v862_v35 = vld [vmem:[#allocation5 + $0x1588] sm:$0xff]  ;;  %v6625_v39 = vcombine.high %v861_v33, %v885_v34 }
 0x43a   :  { %5469 = vmatprep.mubr.bf16.mxu0 %v158_v9  ;;  %5510 = vmatprep.mubr.bf16.mxu1 %v160_v38  ;;  %v886_v37 = vld [vmem:[#allocation5 + $0x1648] sm:$0xff]  ;;  %v6672_v9 = vcombine.low %v909_v27, %v933_v60  ;;  %v6674_v38 = vcombine.low %v910_v28, %v934_v29 }
 0x43b   :  { %v6627_v40 = vcombine.high %v862_v35, %v886_v37  ;;  %v6626_v57 = vcombine.low %v862_v35, %v886_v37 }
 0x440   :  { %5440 = vmatpush1.bf16.xpose.msra.mxu0 %v6240_v45  ;;  %5481 = vmatpush1.bf16.xpose.msra.mxu1 %v6242_v46 }
 0x441   :  { %5441 = vmatprep.subr.bf16.mxu0 %v6193_v47  ;;  %5482 = vmatprep.subr.bf16.mxu1 %v6195_v48 }
 0x448   :  { %5442 = vmatpush1.bf16.xpose.msra.mxu0 %v6192_v53  ;;  %5483 = vmatpush1.bf16.xpose.msra.mxu1 %v6194_v54  ;;  %v814_v53 = vld [vmem:[#allocation5 + $0x1408] sm:$0xff] }
 0x449   :  { %5443 = vmatprep.subr.bf16.mxu0 %v6145_v55  ;;  %5484 = vmatprep.subr.bf16.mxu1 %v6147_v56  ;;  %v838_v54 = vld [vmem:[#allocation5 + $0x14c8] sm:$0xff] }
 0x44a   :  { %v6578_v3 = vcombine.low %v814_v53, %v838_v54 }
 0x450   :  { %5444 = vmatpush1.bf16.xpose.msra.mxu0 %v6144_v61  ;;  %5485 = vmatpush1.bf16.xpose.msra.mxu1 %v6146_v62  ;;  %v6579_v61 = vcombine.high %v814_v53, %v838_v54  ;;  %v789_v62 = vld [vmem:[#allocation5 + $0x1340] sm:$0xff]  ;;  %v480_v53 = vld [vmem:[#allocation5 + $0x998] sm:$0xff] }
 0x451   :  { %5445 = vmatprep.subr.bf16.mxu0 %v6097_v63  ;;  %5486 = vmatprep.subr.bf16.mxu1 %v6099_v0  ;;  %v766_v63 = vld [vmem:[#allocation5 + $0x1288] sm:$0xff]  ;;  %v504_v54 = vld [vmem:[#allocation5 + $0xa58] sm:$0xff] }
 0x452   :  { %v790_v0 = vld [vmem:[#allocation5 + $0x1348] sm:$0xff] }
 0x453   :  { %v6531_v36 = vcombine.high %v766_v63, %v790_v0  ;;  %v6530_v41 = vcombine.low %v766_v63, %v790_v0  ;;  %v431_v63 = vld [vmem:[#allocation5 + $0x810] sm:$0xff] }
 0x454   :  { %v455_v0 = vld [vmem:[#allocation5 + $0x8d0] sm:$0xff] }
 0x458   :  { %5446 = vmatpush1.bf16.xpose.msra.mxu0 %v6096_v6  ;;  %5487 = vmatpush1.bf16.xpose.msra.mxu1 %v6098_v7  ;;  %v717_v6 = vld [vmem:[#allocation5 + $0x1100] sm:$0xff] }
 0x459   :  { %5447 = vmatprep.subr.bf16.mxu0 %v6049_v8  ;;  %5488 = vmatprep.subr.bf16.mxu1 %v6051_v10  ;;  %v741_v7 = vld [vmem:[#allocation5 + $0x11c0] sm:$0xff]  ;;  %v718_v8 = vld [vmem:[#allocation5 + $0x1108] sm:$0xff] }
 0x45a   :  { %v742_v10 = vld [vmem:[#allocation5 + $0x11c8] sm:$0xff]  ;;  %v6481_v11 = vcombine.high %v717_v6, %v741_v7  ;;  %v6480_v16 = vcombine.low %v717_v6, %v741_v7  ;;  %v6197_v6 = vcombine.high %v431_v63, %v455_v0 }
 0x45b   :  { %v6483_v12 = vcombine.high %v718_v8, %v742_v10  ;;  %v6482_v17 = vcombine.low %v718_v8, %v742_v10  ;;  %v383_v8 = vld [vmem:[#allocation5 + $0x690] sm:$0xff] }
 0x45c   :  { %v407_v10 = vld [vmem:[#allocation5 + $0x750] sm:$0xff] }
 0x460   :  { %5448 = vmatpush1.bf16.xpose.msra.mxu0 %v6048_v13  ;;  %5489 = vmatpush1.bf16.xpose.msra.mxu1 %v6050_v14  ;;  %v669_v13 = vld [vmem:[#allocation5 + $0xf80] sm:$0xff] }
 0x461   :  { %5449 = vmatprep.subr.bf16.mxu0 %v6001_v50  ;;  %5490 = vmatprep.subr.bf16.mxu1 %v6003_v15  ;;  %v693_v14 = vld [vmem:[#allocation5 + $0x1040] sm:$0xff]  ;;  %v670_v50 = vld [vmem:[#allocation5 + $0xf88] sm:$0xff] }
 0x462   :  { %v694_v15 = vld [vmem:[#allocation5 + $0x1048] sm:$0xff]  ;;  %v6433_v19 = vcombine.high %v669_v13, %v693_v14  ;;  %v6432_v27 = vcombine.low %v669_v13, %v693_v14  ;;  %v6149_v13 = vcombine.high %v383_v8, %v407_v10 }
 0x463   :  { %v6435_v20 = vcombine.high %v670_v50, %v694_v15  ;;  %v6434_v60 = vcombine.low %v670_v50, %v694_v15  ;;  %v335_v50 = vld [vmem:[#allocation5 + $0x510] sm:$0xff] }
 0x464   :  { %v359_v15 = vld [vmem:[#allocation5 + $0x5d0] sm:$0xff] }
 0x468   :  { %5450 = vmatpush1.bf16.xpose.msra.mxu0 %v6000_v21  ;;  %5491 = vmatpush1.bf16.xpose.msra.mxu1 %v6002_v22  ;;  %v621_v21 = vld [vmem:[#allocation5 + $0xe00] sm:$0xff] }
 0x469   :  { %5451 = vmatprep.subr.bf16.mxu0 %v5953_v24  ;;  %5492 = vmatprep.subr.bf16.mxu1 %v5955_v25  ;;  %v645_v22 = vld [vmem:[#allocation5 + $0xec0] sm:$0xff]  ;;  %v622_v24 = vld [vmem:[#allocation5 + $0xe08] sm:$0xff] }
 0x46a   :  { %v646_v25 = vld [vmem:[#allocation5 + $0xec8] sm:$0xff]  ;;  %v6385_v28 = vcombine.high %v621_v21, %v645_v22 }
 0x46b   :  { %v6387_v29 = vcombine.high %v622_v24, %v646_v25 }
 0x470   :  { %5452 = vmatpush1.bf16.xpose.msra.mxu0 %v5952_v30  ;;  %5493 = vmatpush1.bf16.xpose.msra.mxu1 %v5954_v32  ;;  %v573_v30 = vld [vmem:[#allocation5 + $0xc80] sm:$0xff] }
 0x471   :  { %5453 = vmatprep.subr.bf16.mxu0 %v6673_v1  ;;  %5494 = vmatprep.subr.bf16.mxu1 %v6675_v4  ;;  %v597_v32 = vld [vmem:[#allocation5 + $0xd40] sm:$0xff]  ;;  %v574_v1 = vld [vmem:[#allocation5 + $0xc88] sm:$0xff] }
 0x472   :  { %v598_v4 = vld [vmem:[#allocation5 + $0xd48] sm:$0xff]  ;;  %v6337_v35 = vcombine.high %v573_v30, %v597_v32 }
 0x473   :  { %v6339_v37 = vcombine.high %v574_v1, %v598_v4 }
 0x477   :  { %v5307_v43 = vpop.f32.mrf.mxu0  ;;  %v5348_v45 = vpop.f32.mrf.mxu1 }
 0x478   :  { %v5308_v44 = vadd.f32 %v5307_v43, %v6897_v23  ;;  %5454 = vmatpush2.bf16.xpose.msra.mxu0 %v6672_v9  ;;  %5495 = vmatpush2.bf16.xpose.msra.mxu1 %v6674_v38  ;;  %v6624_v23 = vcombine.low %v861_v33, %v885_v34  ;;  %v6384_v33 = vcombine.low %v621_v21, %v645_v22  ;;  %v527_v9 = vld [vmem:[#allocation5 + $0xb10] sm:$0xff] }
 0x479   :  { %v5309_v46 = vpop.f32.mrf.mxu0  ;;  %5455 = vmatprep.subr.bf16.mxu0 %v6625_v39  ;;  %v5350_v49 = vpop.f32.mrf.mxu1  ;;  %5496 = vmatprep.subr.bf16.mxu1 %v6627_v40  ;;  %v6386_v34 = vcombine.low %v622_v24, %v646_v25  ;;  %v551_v38 = vld [vmem:[#allocation5 + $0xbd0] sm:$0xff]  ;;  %v528_v39 = vld [vmem:[#allocation5 + $0xb18] sm:$0xff]  ;;  %v6336_v43 = vcombine.low %v573_v30, %v597_v32  ;;  %v6101_v21 = vcombine.high %v335_v50, %v359_v15 }
 0x47a   :  { %v6903_v47 = vadd.f32 %v5348_v45, %v5308_v44  ;;  %v5310_v48 = vadd.f32 %v5309_v46, %v6900_v31  ;;  %v765_v31 = vld [vmem:[#allocation5 + $0x1280] sm:$0xff]  ;;  %v552_v40 = vld [vmem:[#allocation5 + $0xbd8] sm:$0xff]  ;;  %v6338_v44 = vcombine.low %v574_v1, %v598_v4  ;;  %v6293_v45 = vcombine.high %v527_v9, %v551_v38  ;;  %v287_v24 = vld [vmem:[#allocation5 + $0x390] sm:$0xff] }
 0x47b   :  { %v5311_v52 = vpop.f32.mrf.mxu0  ;;  %v5352_v56 = vpop.f32.mrf.mxu1  ;;  %v6529_v5 = vcombine.high %v765_v31, %v789_v62  ;;  %v6528_v42 = vcombine.low %v765_v31, %v789_v62  ;;  %v6295_v46 = vcombine.high %v528_v39, %v552_v40  ;;  %v311_v25 = vld [vmem:[#allocation5 + $0x450] sm:$0xff] }
 0x47c   :  { %v6906_v55 = vadd.f32 %v5350_v49, %v5310_v48  ;;  %v109_v48 = vld [vmem:[#allocation3 + $0x100] sm:$0xff]  ;;  %v111_v49 = vld [vmem:[#allocation3 + $0x110] sm:$0xff]  ;;  %v114_v56 = vld [vmem:[#allocation3 + $0x128] sm:$0xff]  ;;  %v6053_v30 = vcombine.high %v287_v24, %v311_v25 }
 0x47d   :  { %v5312_v26 = vpop.f32.mrf.mxu0  ;;  %v5353_v59 = vpop.f32.mrf.mxu1  ;;  %v157_v52 = vpack.c.bf16 %v109_v48, %v109_v48  ;;  %v162_v31 = vpack.c.bf16 %v114_v56, %v114_v56  ;;  %v239_v1 = vld [vmem:[#allocation5 + $0x210] sm:$0xff] }
 0x47e   :  { %v6292_v26 = vcombine.low %v527_v9, %v551_v38  ;;  %v6245_v59 = vcombine.high %v479_v51, %v503_v18  ;;  %v263_v4 = vld [vmem:[#allocation5 + $0x2d0] sm:$0xff] }
 0x47f   :  { %v6005_v9 = vcombine.high %v239_v1, %v263_v4 }
 0x480   :  { %5456 = vmatpush2.bf16.xpose.msra.mxu0 %v6624_v23  ;;  %5497 = vmatpush2.bf16.xpose.msra.mxu1 %v6626_v57  ;;  %v159_v23 = vpack.c.bf16 %v111_v49, %v111_v49  ;;  %v116_v57 = vld [vmem:[#allocation3 + $0x138] sm:$0xff] }
 0x481   :  { %5457 = vmatprep.subr.bf16.mxu0 %v6577_v58  ;;  %5498 = vmatprep.subr.bf16.mxu1 %v6579_v61  ;;  %v6294_v58 = vcombine.low %v528_v39, %v552_v40  ;;  %v6247_v61 = vcombine.high %v480_v53, %v504_v54  ;;  %v164_v62 = vpack.c.bf16 %v116_v57, %v116_v57  ;;  %v191_v39 = vld [vmem:[#allocation5 + $0x90] sm:$0xff] }
 0x482   :  { %v215_v40 = vld [vmem:[#allocation5 + $0x150] sm:$0xff] }
 0x483   :  { %v5957_v48 = vcombine.high %v191_v39, %v215_v40  ;;  %v863_v57 = vld [vmem:[#allocation5 + $0x1590] sm:$0xff] }
 0x488   :  { %5458 = vmatpush2.bf16.xpose.msra.mxu0 %v6576_v2  ;;  %5499 = vmatpush2.bf16.xpose.msra.mxu1 %v6578_v3  ;;  %v432_v2 = vld [vmem:[#allocation5 + $0x818] sm:$0xff] }
 0x489   :  { %5459 = vmatprep.subr.bf16.mxu0 %v6529_v5  ;;  %5500 = vmatprep.subr.bf16.mxu1 %v6531_v36  ;;  %v456_v3 = vld [vmem:[#allocation5 + $0x8d8] sm:$0xff]  ;;  %v6244_v5 = vcombine.low %v479_v51, %v503_v18  ;;  %v6246_v36 = vcombine.low %v480_v53, %v504_v54  ;;  %v911_v51 = vld [vmem:[#allocation5 + $0x1710] sm:$0xff]  ;;  %v5956_v54 = vcombine.low %v191_v39, %v215_v40 }
 0x48a   :  { %v6199_v7 = vcombine.high %v432_v2, %v456_v3  ;;  %v935_v18 = vld [vmem:[#allocation5 + $0x17d0] sm:$0xff]  ;;  %v936_v53 = vld [vmem:[#allocation5 + $0x17d8] sm:$0xff] }
 0x490   :  { %5460 = vmatpush2.bf16.xpose.msra.mxu0 %v6528_v42  ;;  %5501 = vmatpush2.bf16.xpose.msra.mxu1 %v6530_v41  ;;  %v384_v42 = vld [vmem:[#allocation5 + $0x698] sm:$0xff] }
 0x491   :  { %5461 = vmatprep.subr.bf16.mxu0 %v6481_v11  ;;  %5502 = vmatprep.subr.bf16.mxu1 %v6483_v12  ;;  %v408_v41 = vld [vmem:[#allocation5 + $0x758] sm:$0xff]  ;;  %v6196_v11 = vcombine.low %v431_v63, %v455_v0  ;;  %v6198_v12 = vcombine.low %v432_v2, %v456_v3 }
 0x492   :  { %v6151_v14 = vcombine.high %v384_v42, %v408_v41 }
 0x498   :  { %5462 = vmatpush2.bf16.xpose.msra.mxu0 %v6480_v16  ;;  %5503 = vmatpush2.bf16.xpose.msra.mxu1 %v6482_v17  ;;  %v336_v16 = vld [vmem:[#allocation5 + $0x518] sm:$0xff] }
 0x499   :  { %5463 = vmatprep.subr.bf16.mxu0 %v6433_v19  ;;  %5504 = vmatprep.subr.bf16.mxu1 %v6435_v20  ;;  %v360_v17 = vld [vmem:[#allocation5 + $0x5d8] sm:$0xff]  ;;  %v6148_v19 = vcombine.low %v383_v8, %v407_v10  ;;  %v6150_v20 = vcombine.low %v384_v42, %v408_v41  ;;  %v815_v10 = vld [vmem:[#allocation5 + $0x1410] sm:$0xff] }
 0x49a   :  { %v6103_v22 = vcombine.high %v336_v16, %v360_v17  ;;  %v839_v42 = vld [vmem:[#allocation5 + $0x14d0] sm:$0xff] }
 0x4a0   :  { %5464 = vmatpush2.bf16.xpose.msra.mxu0 %v6432_v27  ;;  %5505 = vmatpush2.bf16.xpose.msra.mxu1 %v6434_v60  ;;  %v288_v27 = vld [vmem:[#allocation5 + $0x398] sm:$0xff] }
 0x4a1   :  { %5465 = vmatprep.subr.bf16.mxu0 %v6385_v28  ;;  %5506 = vmatprep.subr.bf16.mxu1 %v6387_v29  ;;  %v312_v60 = vld [vmem:[#allocation5 + $0x458] sm:$0xff]  ;;  %v6100_v28 = vcombine.low %v335_v50, %v359_v15  ;;  %v6102_v29 = vcombine.low %v336_v16, %v360_v17  ;;  %v6581_v16 = vcombine.high %v815_v10, %v839_v42 }
 0x4a2   :  { %v6055_v32 = vcombine.high %v288_v27, %v312_v60 }
 0x4a8   :  { %5466 = vmatpush2.bf16.xpose.msra.mxu0 %v6384_v33  ;;  %5507 = vmatpush2.bf16.xpose.msra.mxu1 %v6386_v34  ;;  %v240_v33 = vld [vmem:[#allocation5 + $0x218] sm:$0xff] }
 0x4a9   :  { %5467 = vmatprep.subr.bf16.mxu0 %v6337_v35  ;;  %5508 = vmatprep.subr.bf16.mxu1 %v6339_v37  ;;  %v264_v34 = vld [vmem:[#allocation5 + $0x2d8] sm:$0xff]  ;;  %v6052_v35 = vcombine.low %v287_v24, %v311_v25  ;;  %v6054_v37 = vcombine.low %v288_v27, %v312_v60  ;;  %v6580_v24 = vcombine.low %v815_v10, %v839_v42  ;;  %v481_v10 = vld [vmem:[#allocation5 + $0x9a0] sm:$0xff] }
 0x4aa   :  { %v6007_v38 = vcombine.high %v240_v33, %v264_v34  ;;  %v505_v42 = vld [vmem:[#allocation5 + $0xa60] sm:$0xff] }
 0x4b0   :  { %5468 = vmatpush2.bf16.xpose.msra.mxu0 %v6336_v43  ;;  %5509 = vmatpush2.bf16.xpose.msra.mxu1 %v6338_v44  ;;  %v192_v43 = vld [vmem:[#allocation5 + $0x98] sm:$0xff] }
 0x4b1   :  { %5519 = vmatprep.subr.bf16.mxu0 %v6293_v45  ;;  %5560 = vmatprep.subr.bf16.mxu1 %v6295_v46  ;;  %v216_v44 = vld [vmem:[#allocation5 + $0x158] sm:$0xff]  ;;  %v6004_v45 = vcombine.low %v239_v1, %v263_v4  ;;  %v6006_v46 = vcombine.low %v240_v33, %v264_v34 }
 0x4b2   :  { %v5959_v49 = vcombine.high %v192_v43, %v216_v44  ;;  %v5958_v56 = vcombine.low %v192_v43, %v216_v44 }
 0x4b7   :  { %5470 = vmatmul.mubr.bf16.vlgmr.msra.gmra.mxu0 %v157_v52  ;;  %5511 = vmatmul.mubr.bf16.vlgmr.msra.gmra.mxu1 %v159_v23  ;;  %v912_v52 = vld [vmem:[#allocation5 + $0x1718] sm:$0xff]  ;;  %v6677_v23 = vcombine.high %v911_v51, %v935_v18 }
 0x4b8   :  { %5520 = vmatpush1.bf16.xpose.msra.mxu0 %v6292_v26  ;;  %5561 = vmatpush1.bf16.xpose.msra.mxu1 %v6294_v58  ;;  %v6679_v26 = vcombine.high %v912_v52, %v936_v53  ;;  %v887_v58 = vld [vmem:[#allocation5 + $0x1650] sm:$0xff] }
 0x4b9   :  { %5521 = vmatprep.subr.bf16.mxu0 %v6245_v59  ;;  %5562 = vmatprep.subr.bf16.mxu1 %v6247_v61  ;;  %v864_v59 = vld [vmem:[#allocation5 + $0x1598] sm:$0xff]  ;;  %v6629_v63 = vcombine.high %v863_v57, %v887_v58 }
 0x4ba   :  { %5551 = vmatprep.mubr.bf16.mxu0 %v162_v31  ;;  %5592 = vmatprep.mubr.bf16.mxu1 %v164_v62  ;;  %v888_v61 = vld [vmem:[#allocation5 + $0x1658] sm:$0xff]  ;;  %v6676_v31 = vcombine.low %v911_v51, %v935_v18  ;;  %v6678_v62 = vcombine.low %v912_v52, %v936_v53 }
 0x4bb   :  { %v6631_v0 = vcombine.high %v864_v59, %v888_v61  ;;  %v6630_v15 = vcombine.low %v864_v59, %v888_v61 }
 0x4c0   :  { %5522 = vmatpush1.bf16.xpose.msra.mxu0 %v6244_v5  ;;  %5563 = vmatpush1.bf16.xpose.msra.mxu1 %v6246_v36 }
 0x4c1   :  { %5523 = vmatprep.subr.bf16.mxu0 %v6197_v6  ;;  %5564 = vmatprep.subr.bf16.mxu1 %v6199_v7 }
 0x4c8   :  { %5524 = vmatpush1.bf16.xpose.msra.mxu0 %v6196_v11  ;;  %5565 = vmatpush1.bf16.xpose.msra.mxu1 %v6198_v12  ;;  %v816_v11 = vld [vmem:[#allocation5 + $0x1418] sm:$0xff] }
 0x4c9   :  { %5525 = vmatprep.subr.bf16.mxu0 %v6149_v13  ;;  %5566 = vmatprep.subr.bf16.mxu1 %v6151_v14  ;;  %v840_v12 = vld [vmem:[#allocation5 + $0x14d8] sm:$0xff] }
 0x4ca   :  { %v6582_v25 = vcombine.low %v816_v11, %v840_v12 }
 0x4d0   :  { %5526 = vmatpush1.bf16.xpose.msra.mxu0 %v6148_v19  ;;  %5567 = vmatpush1.bf16.xpose.msra.mxu1 %v6150_v20  ;;  %v6583_v19 = vcombine.high %v816_v11, %v840_v12  ;;  %v791_v20 = vld [vmem:[#allocation5 + $0x1350] sm:$0xff]  ;;  %v482_v11 = vld [vmem:[#allocation5 + $0x9a8] sm:$0xff] }
 0x4d1   :  { %5527 = vmatprep.subr.bf16.mxu0 %v6101_v21  ;;  %5568 = vmatprep.subr.bf16.mxu1 %v6103_v22  ;;  %v768_v21 = vld [vmem:[#allocation5 + $0x1298] sm:$0xff]  ;;  %v506_v12 = vld [vmem:[#allocation5 + $0xa68] sm:$0xff] }
 0x4d2   :  { %v792_v22 = vld [vmem:[#allocation5 + $0x1358] sm:$0xff] }
 0x4d3   :  { %v6535_v60 = vcombine.high %v768_v21, %v792_v22  ;;  %v6534_v4 = vcombine.low %v768_v21, %v792_v22  ;;  %v433_v21 = vld [vmem:[#allocation5 + $0x820] sm:$0xff] }
 0x4d4   :  { %v457_v22 = vld [vmem:[#allocation5 + $0x8e0] sm:$0xff] }
 0x4d8   :  { %5528 = vmatpush1.bf16.xpose.msra.mxu0 %v6100_v28  ;;  %5569 = vmatpush1.bf16.xpose.msra.mxu1 %v6102_v29  ;;  %v719_v28 = vld [vmem:[#allocation5 + $0x1110] sm:$0xff] }
 0x4d9   :  { %5529 = vmatprep.subr.bf16.mxu0 %v6053_v30  ;;  %5570 = vmatprep.subr.bf16.mxu1 %v6055_v32  ;;  %v743_v29 = vld [vmem:[#allocation5 + $0x11d0] sm:$0xff]  ;;  %v720_v30 = vld [vmem:[#allocation5 + $0x1118] sm:$0xff] }
 0x4da   :  { %v744_v32 = vld [vmem:[#allocation5 + $0x11d8] sm:$0xff]  ;;  %v6485_v33 = vcombine.high %v719_v28, %v743_v29  ;;  %v6484_v39 = vcombine.low %v719_v28, %v743_v29  ;;  %v6201_v28 = vcombine.high %v433_v21, %v457_v22 }
 0x4db   :  { %v6487_v34 = vcombine.high %v720_v30, %v744_v32  ;;  %v6486_v40 = vcombine.low %v720_v30, %v744_v32  ;;  %v385_v30 = vld [vmem:[#allocation5 + $0x6a0] sm:$0xff] }
 0x4dc   :  { %v409_v32 = vld [vmem:[#allocation5 + $0x760] sm:$0xff] }
 0x4e0   :  { %5530 = vmatpush1.bf16.xpose.msra.mxu0 %v6052_v35  ;;  %5571 = vmatpush1.bf16.xpose.msra.mxu1 %v6054_v37  ;;  %v671_v35 = vld [vmem:[#allocation5 + $0xf90] sm:$0xff] }
 0x4e1   :  { %5531 = vmatprep.subr.bf16.mxu0 %v6005_v9  ;;  %5572 = vmatprep.subr.bf16.mxu1 %v6007_v38  ;;  %v695_v37 = vld [vmem:[#allocation5 + $0x1050] sm:$0xff]  ;;  %v672_v9 = vld [vmem:[#allocation5 + $0xf98] sm:$0xff] }
 0x4e2   :  { %v696_v38 = vld [vmem:[#allocation5 + $0x1058] sm:$0xff]  ;;  %v6437_v43 = vcombine.high %v671_v35, %v695_v37  ;;  %v6436_v51 = vcombine.low %v671_v35, %v695_v37  ;;  %v6153_v35 = vcombine.high %v385_v30, %v409_v32 }
 0x4e3   :  { %v6439_v44 = vcombine.high %v672_v9, %v696_v38  ;;  %v6438_v18 = vcombine.low %v672_v9, %v696_v38  ;;  %v337_v9 = vld [vmem:[#allocation5 + $0x520] sm:$0xff] }
 0x4e4   :  { %v361_v38 = vld [vmem:[#allocation5 + $0x5e0] sm:$0xff] }
 0x4e8   :  { %5532 = vmatpush1.bf16.xpose.msra.mxu0 %v6004_v45  ;;  %5573 = vmatpush1.bf16.xpose.msra.mxu1 %v6006_v46  ;;  %v623_v45 = vld [vmem:[#allocation5 + $0xe10] sm:$0xff] }
 0x4e9   :  { %5533 = vmatprep.subr.bf16.mxu0 %v5957_v48  ;;  %5574 = vmatprep.subr.bf16.mxu1 %v5959_v49  ;;  %v647_v46 = vld [vmem:[#allocation5 + $0xed0] sm:$0xff]  ;;  %v624_v48 = vld [vmem:[#allocation5 + $0xe18] sm:$0xff] }
 0x4ea   :  { %v648_v49 = vld [vmem:[#allocation5 + $0xed8] sm:$0xff]  ;;  %v6389_v52 = vcombine.high %v623_v45, %v647_v46 }
 0x4eb   :  { %v6391_v53 = vcombine.high %v624_v48, %v648_v49 }
 0x4f0   :  { %5534 = vmatpush1.bf16.xpose.msra.mxu0 %v5956_v54  ;;  %5575 = vmatpush1.bf16.xpose.msra.mxu1 %v5958_v56  ;;  %v575_v54 = vld [vmem:[#allocation5 + $0xc90] sm:$0xff] }
 0x4f1   :  { %5535 = vmatprep.subr.bf16.mxu0 %v6677_v23  ;;  %5576 = vmatprep.subr.bf16.mxu1 %v6679_v26  ;;  %v599_v56 = vld [vmem:[#allocation5 + $0xd50] sm:$0xff]  ;;  %v576_v23 = vld [vmem:[#allocation5 + $0xc98] sm:$0xff] }
 0x4f2   :  { %v600_v26 = vld [vmem:[#allocation5 + $0xd58] sm:$0xff]  ;;  %v6341_v59 = vcombine.high %v575_v54, %v599_v56 }
 0x4f3   :  { %v6343_v61 = vcombine.high %v576_v23, %v600_v26 }
 0x4f7   :  { %v5389_v2 = vpop.f32.mrf.mxu0  ;;  %v5430_v5 = vpop.f32.mrf.mxu1 }
 0x4f8   :  { %v5390_v3 = vadd.f32 %v5389_v2, %v6903_v47  ;;  %5536 = vmatpush2.bf16.xpose.msra.mxu0 %v6676_v31  ;;  %5577 = vmatpush2.bf16.xpose.msra.mxu1 %v6678_v62  ;;  %v6628_v47 = vcombine.low %v863_v57, %v887_v58  ;;  %v6388_v57 = vcombine.low %v623_v45, %v647_v46  ;;  %v529_v31 = vld [vmem:[#allocation5 + $0xb20] sm:$0xff] }
 0x4f9   :  { %v5391_v36 = vpop.f32.mrf.mxu0  ;;  %5537 = vmatprep.subr.bf16.mxu0 %v6629_v63  ;;  %v5432_v8 = vpop.f32.mrf.mxu1  ;;  %5578 = vmatprep.subr.bf16.mxu1 %v6631_v0  ;;  %v6390_v58 = vcombine.low %v624_v48, %v648_v49  ;;  %v553_v62 = vld [vmem:[#allocation5 + $0xbe0] sm:$0xff]  ;;  %v530_v63 = vld [vmem:[#allocation5 + $0xb28] sm:$0xff]  ;;  %v6340_v2 = vcombine.low %v575_v54, %v599_v56  ;;  %v6105_v45 = vcombine.high %v337_v9, %v361_v38 }
 0x4fa   :  { %v6909_v6 = vadd.f32 %v5430_v5, %v5390_v3  ;;  %v5392_v7 = vadd.f32 %v5391_v36, %v6906_v55  ;;  %v767_v55 = vld [vmem:[#allocation5 + $0x1290] sm:$0xff]  ;;  %v554_v0 = vld [vmem:[#allocation5 + $0xbe8] sm:$0xff]  ;;  %v6342_v3 = vcombine.low %v576_v23, %v600_v26  ;;  %v6297_v5 = vcombine.high %v529_v31, %v553_v62  ;;  %v289_v48 = vld [vmem:[#allocation5 + $0x3a0] sm:$0xff] }
 0x4fb   :  { %v5393_v41 = vpop.f32.mrf.mxu0  ;;  %v5434_v14 = vpop.f32.mrf.mxu1  ;;  %v6533_v27 = vcombine.high %v767_v55, %v791_v20  ;;  %v6532_v1 = vcombine.low %v767_v55, %v791_v20  ;;  %v6299_v36 = vcombine.high %v530_v63, %v554_v0  ;;  %v313_v49 = vld [vmem:[#allocation5 + $0x460] sm:$0xff] }
 0x4fc   :  { %v6912_v13 = vadd.f32 %v5432_v8, %v5392_v7  ;;  %v113_v7 = vld [vmem:[#allocation3 + $0x120] sm:$0xff]  ;;  %v115_v8 = vld [vmem:[#allocation3 + $0x130] sm:$0xff]  ;;  %v118_v14 = vld [vmem:[#allocation3 + $0x148] sm:$0xff]  ;;  %v6057_v54 = vcombine.high %v289_v48, %v313_v49 }
 0x4fd   :  { %v5394_v50 = vpop.f32.mrf.mxu0  ;;  %v5435_v17 = vpop.f32.mrf.mxu1  ;;  %v161_v41 = vpack.c.bf16 %v113_v7, %v113_v7  ;;  %v166_v55 = vpack.c.bf16 %v118_v14, %v118_v14  ;;  %v241_v23 = vld [vmem:[#allocation5 + $0x220] sm:$0xff] }
 0x4fe   :  { %v6296_v50 = vcombine.low %v529_v31, %v553_v62  ;;  %v6249_v17 = vcombine.high %v481_v10, %v505_v42  ;;  %v265_v26 = vld [vmem:[#allocation5 + $0x2e0] sm:$0xff] }
 0x4ff   :  { %v6009_v31 = vcombine.high %v241_v23, %v265_v26 }
 0x500   :  { %5538 = vmatpush2.bf16.xpose.msra.mxu0 %v6628_v47  ;;  %5579 = vmatpush2.bf16.xpose.msra.mxu1 %v6630_v15  ;;  %v163_v47 = vpack.c.bf16 %v115_v8, %v115_v8  ;;  %v120_v15 = vld [vmem:[#allocation3 + $0x158] sm:$0xff] }
 0x501   :  { %5539 = vmatprep.subr.bf16.mxu0 %v6581_v16  ;;  %5580 = vmatprep.subr.bf16.mxu1 %v6583_v19  ;;  %v6298_v16 = vcombine.low %v530_v63, %v554_v0  ;;  %v6251_v19 = vcombine.high %v482_v11, %v506_v12  ;;  %v168_v20 = vpack.c.bf16 %v120_v15, %v120_v15  ;;  %v193_v63 = vld [vmem:[#allocation5 + $0xa0] sm:$0xff] }
 0x502   :  { %v217_v0 = vld [vmem:[#allocation5 + $0x160] sm:$0xff] }
 0x503   :  { %v5961_v7 = vcombine.high %v193_v63, %v217_v0  ;;  %v865_v15 = vld [vmem:[#allocation5 + $0x15a0] sm:$0xff] }
 0x508   :  { %5540 = vmatpush2.bf16.xpose.msra.mxu0 %v6580_v24  ;;  %5581 = vmatpush2.bf16.xpose.msra.mxu1 %v6582_v25  ;;  %v434_v24 = vld [vmem:[#allocation5 + $0x828] sm:$0xff] }
 0x509   :  { %5541 = vmatprep.subr.bf16.mxu0 %v6533_v27  ;;  %5582 = vmatprep.subr.bf16.mxu1 %v6535_v60  ;;  %v458_v25 = vld [vmem:[#allocation5 + $0x8e8] sm:$0xff]  ;;  %v6248_v27 = vcombine.low %v481_v10, %v505_v42  ;;  %v6250_v60 = vcombine.low %v482_v11, %v506_v12  ;;  %v913_v10 = vld [vmem:[#allocation5 + $0x1720] sm:$0xff]  ;;  %v5960_v12 = vcombine.low %v193_v63, %v217_v0 }
 0x50a   :  { %v6203_v29 = vcombine.high %v434_v24, %v458_v25  ;;  %v937_v42 = vld [vmem:[#allocation5 + $0x17e0] sm:$0xff]  ;;  %v938_v11 = vld [vmem:[#allocation5 + $0x17e8] sm:$0xff] }
 0x510   :  { %5542 = vmatpush2.bf16.xpose.msra.mxu0 %v6532_v1  ;;  %5583 = vmatpush2.bf16.xpose.msra.mxu1 %v6534_v4  ;;  %v386_v1 = vld [vmem:[#allocation5 + $0x6a8] sm:$0xff] }
 0x511   :  { %5543 = vmatprep.subr.bf16.mxu0 %v6485_v33  ;;  %5584 = vmatprep.subr.bf16.mxu1 %v6487_v34  ;;  %v410_v4 = vld [vmem:[#allocation5 + $0x768] sm:$0xff]  ;;  %v6200_v33 = vcombine.low %v433_v21, %v457_v22  ;;  %v6202_v34 = vcombine.low %v434_v24, %v458_v25 }
 0x512   :  { %v6155_v37 = vcombine.high %v386_v1, %v410_v4 }
 0x518   :  { %5544 = vmatpush2.bf16.xpose.msra.mxu0 %v6484_v39  ;;  %5585 = vmatpush2.bf16.xpose.msra.mxu1 %v6486_v40  ;;  %v338_v39 = vld [vmem:[#allocation5 + $0x528] sm:$0xff] }
 0x519   :  { %5545 = vmatprep.subr.bf16.mxu0 %v6437_v43  ;;  %5586 = vmatprep.subr.bf16.mxu1 %v6439_v44  ;;  %v362_v40 = vld [vmem:[#allocation5 + $0x5e8] sm:$0xff]  ;;  %v6152_v43 = vcombine.low %v385_v30, %v409_v32  ;;  %v6154_v44 = vcombine.low %v386_v1, %v410_v4  ;;  %v817_v32 = vld [vmem:[#allocation5 + $0x1420] sm:$0xff] }
 0x51a   :  { %v6107_v46 = vcombine.high %v338_v39, %v362_v40  ;;  %v841_v1 = vld [vmem:[#allocation5 + $0x14e0] sm:$0xff] }
 0x520   :  { %5546 = vmatpush2.bf16.xpose.msra.mxu0 %v6436_v51  ;;  %5587 = vmatpush2.bf16.xpose.msra.mxu1 %v6438_v18  ;;  %v290_v51 = vld [vmem:[#allocation5 + $0x3a8] sm:$0xff] }
 0x521   :  { %5547 = vmatprep.subr.bf16.mxu0 %v6389_v52  ;;  %5588 = vmatprep.subr.bf16.mxu1 %v6391_v53  ;;  %v314_v18 = vld [vmem:[#allocation5 + $0x468] sm:$0xff]  ;;  %v6104_v52 = vcombine.low %v337_v9, %v361_v38  ;;  %v6106_v53 = vcombine.low %v338_v39, %v362_v40  ;;  %v6585_v39 = vcombine.high %v817_v32, %v841_v1 }
 0x522   :  { %v6059_v56 = vcombine.high %v290_v51, %v314_v18 }
 0x528   :  { %5548 = vmatpush2.bf16.xpose.msra.mxu0 %v6388_v57  ;;  %5589 = vmatpush2.bf16.xpose.msra.mxu1 %v6390_v58  ;;  %v242_v57 = vld [vmem:[#allocation5 + $0x228] sm:$0xff] }
 0x529   :  { %5549 = vmatprep.subr.bf16.mxu0 %v6341_v59  ;;  %5590 = vmatprep.subr.bf16.mxu1 %v6343_v61  ;;  %v266_v58 = vld [vmem:[#allocation5 + $0x2e8] sm:$0xff]  ;;  %v6056_v59 = vcombine.low %v289_v48, %v313_v49  ;;  %v6058_v61 = vcombine.low %v290_v51, %v314_v18  ;;  %v6584_v48 = vcombine.low %v817_v32, %v841_v1  ;;  %v483_v32 = vld [vmem:[#allocation5 + $0x9b0] sm:$0xff] }
 0x52a   :  { %v6011_v62 = vcombine.high %v242_v57, %v266_v58  ;;  %v507_v1 = vld [vmem:[#allocation5 + $0xa70] sm:$0xff] }
 0x530   :  { %5550 = vmatpush2.bf16.xpose.msra.mxu0 %v6340_v2  ;;  %5591 = vmatpush2.bf16.xpose.msra.mxu1 %v6342_v3  ;;  %v194_v2 = vld [vmem:[#allocation5 + $0xa8] sm:$0xff] }
 0x531   :  { %5601 = vmatprep.subr.bf16.mxu0 %v6297_v5  ;;  %5642 = vmatprep.subr.bf16.mxu1 %v6299_v36  ;;  %v218_v3 = vld [vmem:[#allocation5 + $0x168] sm:$0xff]  ;;  %v6008_v5 = vcombine.low %v241_v23, %v265_v26  ;;  %v6010_v36 = vcombine.low %v242_v57, %v266_v58 }
 0x532   :  { %v5963_v8 = vcombine.high %v194_v2, %v218_v3  ;;  %v5962_v14 = vcombine.low %v194_v2, %v218_v3 }
 0x537   :  { %5552 = vmatmul.mubr.bf16.vlgmr.msra.gmra.mxu0 %v161_v41  ;;  %5593 = vmatmul.mubr.bf16.vlgmr.msra.gmra.mxu1 %v163_v47  ;;  %v914_v41 = vld [vmem:[#allocation5 + $0x1728] sm:$0xff]  ;;  %v6681_v47 = vcombine.high %v913_v10, %v937_v42 }
 0x538   :  { %5602 = vmatpush1.bf16.xpose.msra.mxu0 %v6296_v50  ;;  %5643 = vmatpush1.bf16.xpose.msra.mxu1 %v6298_v16  ;;  %v6683_v50 = vcombine.high %v914_v41, %v938_v11  ;;  %v889_v16 = vld [vmem:[#allocation5 + $0x1660] sm:$0xff] }
 0x539   :  { %5603 = vmatprep.subr.bf16.mxu0 %v6249_v17  ;;  %5644 = vmatprep.subr.bf16.mxu1 %v6251_v19  ;;  %v866_v17 = vld [vmem:[#allocation5 + $0x15a8] sm:$0xff]  ;;  %v6633_v21 = vcombine.high %v865_v15, %v889_v16 }
 0x53a   :  { %5633 = vmatprep.mubr.bf16.mxu0 %v166_v55  ;;  %5674 = vmatprep.mubr.bf16.mxu1 %v168_v20  ;;  %v890_v19 = vld [vmem:[#allocation5 + $0x1668] sm:$0xff]  ;;  %v6680_v55 = vcombine.low %v913_v10, %v937_v42  ;;  %v6682_v20 = vcombine.low %v914_v41, %v938_v11 }
 0x53b   :  { %v6635_v22 = vcombine.high %v866_v17, %v890_v19  ;;  %v6634_v38 = vcombine.low %v866_v17, %v890_v19 }
 0x540   :  { %5604 = vmatpush1.bf16.xpose.msra.mxu0 %v6248_v27  ;;  %5645 = vmatpush1.bf16.xpose.msra.mxu1 %v6250_v60 }
 0x541   :  { %5605 = vmatprep.subr.bf16.mxu0 %v6201_v28  ;;  %5646 = vmatprep.subr.bf16.mxu1 %v6203_v29 }
 0x548   :  { %5606 = vmatpush1.bf16.xpose.msra.mxu0 %v6200_v33  ;;  %5647 = vmatpush1.bf16.xpose.msra.mxu1 %v6202_v34  ;;  %v818_v33 = vld [vmem:[#allocation5 + $0x1428] sm:$0xff] }
 0x549   :  { %5607 = vmatprep.subr.bf16.mxu0 %v6153_v35  ;;  %5648 = vmatprep.subr.bf16.mxu1 %v6155_v37  ;;  %v842_v34 = vld [vmem:[#allocation5 + $0x14e8] sm:$0xff] }
 0x54a   :  { %v6586_v49 = vcombine.low %v818_v33, %v842_v34 }
 0x550   :  { %5608 = vmatpush1.bf16.xpose.msra.mxu0 %v6152_v43  ;;  %5649 = vmatpush1.bf16.xpose.msra.mxu1 %v6154_v44  ;;  %v6587_v43 = vcombine.high %v818_v33, %v842_v34  ;;  %v793_v44 = vld [vmem:[#allocation5 + $0x1360] sm:$0xff]  ;;  %v484_v33 = vld [vmem:[#allocation5 + $0x9b8] sm:$0xff] }
 0x551   :  { %5609 = vmatprep.subr.bf16.mxu0 %v6105_v45  ;;  %5650 = vmatprep.subr.bf16.mxu1 %v6107_v46  ;;  %v770_v45 = vld [vmem:[#allocation5 + $0x12a8] sm:$0xff]  ;;  %v508_v34 = vld [vmem:[#allocation5 + $0xa78] sm:$0xff] }
 0x552   :  { %v794_v46 = vld [vmem:[#allocation5 + $0x1368] sm:$0xff] }
 0x553   :  { %v6539_v18 = vcombine.high %v770_v45, %v794_v46  ;;  %v6538_v26 = vcombine.low %v770_v45, %v794_v46  ;;  %v435_v45 = vld [vmem:[#allocation5 + $0x830] sm:$0xff] }
 0x554   :  { %v459_v46 = vld [vmem:[#allocation5 + $0x8f0] sm:$0xff] }
 0x558   :  { %5610 = vmatpush1.bf16.xpose.msra.mxu0 %v6104_v52  ;;  %5651 = vmatpush1.bf16.xpose.msra.mxu1 %v6106_v53  ;;  %v721_v52 = vld [vmem:[#allocation5 + $0x1120] sm:$0xff] }
 0x559   :  { %5611 = vmatprep.subr.bf16.mxu0 %v6057_v54  ;;  %5652 = vmatprep.subr.bf16.mxu1 %v6059_v56  ;;  %v745_v53 = vld [vmem:[#allocation5 + $0x11e0] sm:$0xff]  ;;  %v722_v54 = vld [vmem:[#allocation5 + $0x1128] sm:$0xff] }
 0x55a   :  { %v746_v56 = vld [vmem:[#allocation5 + $0x11e8] sm:$0xff]  ;;  %v6489_v57 = vcombine.high %v721_v52, %v745_v53  ;;  %v6488_v63 = vcombine.low %v721_v52, %v745_v53  ;;  %v6205_v52 = vcombine.high %v435_v45, %v459_v46 }
 0x55b   :  { %v6491_v58 = vcombine.high %v722_v54, %v746_v56  ;;  %v6490_v0 = vcombine.low %v722_v54, %v746_v56  ;;  %v387_v54 = vld [vmem:[#allocation5 + $0x6b0] sm:$0xff] }
 0x55c   :  { %v411_v56 = vld [vmem:[#allocation5 + $0x770] sm:$0xff] }
 0x560   :  { %5612 = vmatpush1.bf16.xpose.msra.mxu0 %v6056_v59  ;;  %5653 = vmatpush1.bf16.xpose.msra.mxu1 %v6058_v61  ;;  %v673_v59 = vld [vmem:[#allocation5 + $0xfa0] sm:$0xff] }
 0x561   :  { %5613 = vmatprep.subr.bf16.mxu0 %v6009_v31  ;;  %5654 = vmatprep.subr.bf16.mxu1 %v6011_v62  ;;  %v697_v61 = vld [vmem:[#allocation5 + $0x1060] sm:$0xff]  ;;  %v674_v31 = vld [vmem:[#allocation5 + $0xfa8] sm:$0xff] }
 0x562   :  { %v698_v62 = vld [vmem:[#allocation5 + $0x1068] sm:$0xff]  ;;  %v6441_v2 = vcombine.high %v673_v59, %v697_v61  ;;  %v6440_v10 = vcombine.low %v673_v59, %v697_v61  ;;  %v6157_v59 = vcombine.high %v387_v54, %v411_v56 }
 0x563   :  { %v6443_v3 = vcombine.high %v674_v31, %v698_v62  ;;  %v6442_v42 = vcombine.low %v674_v31, %v698_v62  ;;  %v339_v31 = vld [vmem:[#allocation5 + $0x530] sm:$0xff] }
 0x564   :  { %v363_v62 = vld [vmem:[#allocation5 + $0x5f0] sm:$0xff] }
 0x568   :  { %5614 = vmatpush1.bf16.xpose.msra.mxu0 %v6008_v5  ;;  %5655 = vmatpush1.bf16.xpose.msra.mxu1 %v6010_v36  ;;  %v625_v5 = vld [vmem:[#allocation5 + $0xe20] sm:$0xff] }
 0x569   :  { %5615 = vmatprep.subr.bf16.mxu0 %v5961_v7  ;;  %5656 = vmatprep.subr.bf16.mxu1 %v5963_v8  ;;  %v649_v36 = vld [vmem:[#allocation5 + $0xee0] sm:$0xff]  ;;  %v626_v7 = vld [vmem:[#allocation5 + $0xe28] sm:$0xff] }
 0x56a   :  { %v650_v8 = vld [vmem:[#allocation5 + $0xee8] sm:$0xff]  ;;  %v6393_v41 = vcombine.high %v625_v5, %v649_v36 }
 0x56b   :  { %v6395_v11 = vcombine.high %v626_v7, %v650_v8 }
 0x570   :  { %5616 = vmatpush1.bf16.xpose.msra.mxu0 %v5960_v12  ;;  %5657 = vmatpush1.bf16.xpose.msra.mxu1 %v5962_v14  ;;  %v577_v12 = vld [vmem:[#allocation5 + $0xca0] sm:$0xff] }
 0x571   :  { %5617 = vmatprep.subr.bf16.mxu0 %v6681_v47  ;;  %5658 = vmatprep.subr.bf16.mxu1 %v6683_v50  ;;  %v601_v14 = vld [vmem:[#allocation5 + $0xd60] sm:$0xff]  ;;  %v578_v47 = vld [vmem:[#allocation5 + $0xca8] sm:$0xff] }
 0x572   :  { %v602_v50 = vld [vmem:[#allocation5 + $0xd68] sm:$0xff]  ;;  %v6345_v17 = vcombine.high %v577_v12, %v601_v14 }
 0x573   :  { %v6347_v19 = vcombine.high %v578_v47, %v602_v50 }
 0x577   :  { %v5471_v24 = vpop.f32.mrf.mxu0  ;;  %v5512_v27 = vpop.f32.mrf.mxu1 }
 0x578   :  { %v5472_v25 = vadd.f32 %v5471_v24, %v6909_v6  ;;  %5618 = vmatpush2.bf16.xpose.msra.mxu0 %v6680_v55  ;;  %5659 = vmatpush2.bf16.xpose.msra.mxu1 %v6682_v20  ;;  %v6632_v6 = vcombine.low %v865_v15, %v889_v16  ;;  %v6392_v15 = vcombine.low %v625_v5, %v649_v36  ;;  %v531_v55 = vld [vmem:[#allocation5 + $0xb30] sm:$0xff] }
 0x579   :  { %v5473_v60 = vpop.f32.mrf.mxu0  ;;  %5619 = vmatprep.subr.bf16.mxu0 %v6633_v21  ;;  %v5514_v30 = vpop.f32.mrf.mxu1  ;;  %5660 = vmatprep.subr.bf16.mxu1 %v6635_v22  ;;  %v6394_v16 = vcombine.low %v626_v7, %v650_v8  ;;  %v555_v20 = vld [vmem:[#allocation5 + $0xbf0] sm:$0xff]  ;;  %v532_v21 = vld [vmem:[#allocation5 + $0xb38] sm:$0xff]  ;;  %v6344_v24 = vcombine.low %v577_v12, %v601_v14  ;;  %v6109_v5 = vcombine.high %v339_v31, %v363_v62 }
 0x57a   :  { %v6915_v28 = vadd.f32 %v5512_v27, %v5472_v25  ;;  %v5474_v29 = vadd.f32 %v5473_v60, %v6912_v13  ;;  %v769_v13 = vld [vmem:[#allocation5 + $0x12a0] sm:$0xff]  ;;  %v556_v22 = vld [vmem:[#allocation5 + $0xbf8] sm:$0xff]  ;;  %v6346_v25 = vcombine.low %v578_v47, %v602_v50  ;;  %v6301_v27 = vcombine.high %v531_v55, %v555_v20  ;;  %v291_v7 = vld [vmem:[#allocation5 + $0x3b0] sm:$0xff] }
 0x57b   :  { %v5475_v4 = vpop.f32.mrf.mxu0  ;;  %v5516_v37 = vpop.f32.mrf.mxu1  ;;  %v6537_v51 = vcombine.high %v769_v13, %v793_v44  ;;  %v6536_v23 = vcombine.low %v769_v13, %v793_v44  ;;  %v6303_v60 = vcombine.high %v532_v21, %v556_v22  ;;  %v315_v8 = vld [vmem:[#allocation5 + $0x470] sm:$0xff] }
 0x57c   :  { %v6918_v35 = vadd.f32 %v5514_v30, %v5474_v29  ;;  %v117_v29 = vld [vmem:[#allocation3 + $0x140] sm:$0xff]  ;;  %v119_v30 = vld [vmem:[#allocation3 + $0x150] sm:$0xff]  ;;  %v122_v37 = vld [vmem:[#allocation3 + $0x168] sm:$0xff]  ;;  %v6061_v12 = vcombine.high %v291_v7, %v315_v8 }
 0x57d   :  { %v5476_v9 = vpop.f32.mrf.mxu0  ;;  %v5517_v40 = vpop.f32.mrf.mxu1  ;;  %v165_v4 = vpack.c.bf16 %v117_v29, %v117_v29  ;;  %v170_v13 = vpack.c.bf16 %v122_v37, %v122_v37  ;;  %v243_v47 = vld [vmem:[#allocation5 + $0x230] sm:$0xff] }
 0x57e   :  { %v6300_v9 = vcombine.low %v531_v55, %v555_v20  ;;  %v6253_v40 = vcombine.high %v483_v32, %v507_v1  ;;  %v267_v50 = vld [vmem:[#allocation5 + $0x2f0] sm:$0xff] }
 0x57f   :  { %v6013_v55 = vcombine.high %v243_v47, %v267_v50 }
 0x580   :  { %5620 = vmatpush2.bf16.xpose.msra.mxu0 %v6632_v6  ;;  %5661 = vmatpush2.bf16.xpose.msra.mxu1 %v6634_v38  ;;  %v167_v6 = vpack.c.bf16 %v119_v30, %v119_v30  ;;  %v124_v38 = vld [vmem:[#allocation3 + $0x178] sm:$0xff] }
 0x581   :  { %5621 = vmatprep.subr.bf16.mxu0 %v6585_v39  ;;  %5662 = vmatprep.subr.bf16.mxu1 %v6587_v43  ;;  %v6302_v39 = vcombine.low %v532_v21, %v556_v22  ;;  %v6255_v43 = vcombine.high %v484_v33, %v508_v34  ;;  %v172_v44 = vpack.c.bf16 %v124_v38, %v124_v38  ;;  %v195_v21 = vld [vmem:[#allocation5 + $0xb0] sm:$0xff] }
 0x582   :  { %v219_v22 = vld [vmem:[#allocation5 + $0x170] sm:$0xff] }
 0x583   :  { %v5965_v29 = vcombine.high %v195_v21, %v219_v22  ;;  %v867_v38 = vld [vmem:[#allocation5 + $0x15b0] sm:$0xff] }
 0x588   :  { %5622 = vmatpush2.bf16.xpose.msra.mxu0 %v6584_v48  ;;  %5663 = vmatpush2.bf16.xpose.msra.mxu1 %v6586_v49  ;;  %v436_v48 = vld [vmem:[#allocation5 + $0x838] sm:$0xff] }
 0x589   :  { %5623 = vmatprep.subr.bf16.mxu0 %v6537_v51  ;;  %5664 = vmatprep.subr.bf16.mxu1 %v6539_v18  ;;  %v460_v49 = vld [vmem:[#allocation5 + $0x8f8] sm:$0xff]  ;;  %v6252_v51 = vcombine.low %v483_v32, %v507_v1  ;;  %v6254_v18 = vcombine.low %v484_v33, %v508_v34  ;;  %v915_v32 = vld [vmem:[#allocation5 + $0x1730] sm:$0xff]  ;;  %v5964_v34 = vcombine.low %v195_v21, %v219_v22 }
 0x58a   :  { %v6207_v53 = vcombine.high %v436_v48, %v460_v49  ;;  %v939_v1 = vld [vmem:[#allocation5 + $0x17f0] sm:$0xff]  ;;  %v940_v33 = vld [vmem:[#allocation5 + $0x17f8] sm:$0xff] }
 0x590   :  { %5624 = vmatpush2.bf16.xpose.msra.mxu0 %v6536_v23  ;;  %5665 = vmatpush2.bf16.xpose.msra.mxu1 %v6538_v26  ;;  %v388_v23 = vld [vmem:[#allocation5 + $0x6b8] sm:$0xff] }
 0x591   :  { %5625 = vmatprep.subr.bf16.mxu0 %v6489_v57  ;;  %5666 = vmatprep.subr.bf16.mxu1 %v6491_v58  ;;  %v412_v26 = vld [vmem:[#allocation5 + $0x778] sm:$0xff]  ;;  %v6204_v57 = vcombine.low %v435_v45, %v459_v46  ;;  %v6206_v58 = vcombine.low %v436_v48, %v460_v49 }
 0x592   :  { %v6159_v61 = vcombine.high %v388_v23, %v412_v26 }
 0x598   :  { %5626 = vmatpush2.bf16.xpose.msra.mxu0 %v6488_v63  ;;  %5667 = vmatpush2.bf16.xpose.msra.mxu1 %v6490_v0  ;;  %v340_v63 = vld [vmem:[#allocation5 + $0x538] sm:$0xff] }
 0x599   :  { %5627 = vmatprep.subr.bf16.mxu0 %v6441_v2  ;;  %5668 = vmatprep.subr.bf16.mxu1 %v6443_v3  ;;  %v364_v0 = vld [vmem:[#allocation5 + $0x5f8] sm:$0xff]  ;;  %v6156_v2 = vcombine.low %v387_v54, %v411_v56  ;;  %v6158_v3 = vcombine.low %v388_v23, %v412_v26  ;;  %v819_v56 = vld [vmem:[#allocation5 + $0x1430] sm:$0xff] }
 0x59a   :  { %v6111_v36 = vcombine.high %v340_v63, %v364_v0  ;;  %v843_v23 = vld [vmem:[#allocation5 + $0x14f0] sm:$0xff] }
 0x5a0   :  { %5628 = vmatpush2.bf16.xpose.msra.mxu0 %v6440_v10  ;;  %5669 = vmatpush2.bf16.xpose.msra.mxu1 %v6442_v42  ;;  %v292_v10 = vld [vmem:[#allocation5 + $0x3b8] sm:$0xff] }
 0x5a1   :  { %5629 = vmatprep.subr.bf16.mxu0 %v6393_v41  ;;  %5670 = vmatprep.subr.bf16.mxu1 %v6395_v11  ;;  %v316_v42 = vld [vmem:[#allocation5 + $0x478] sm:$0xff]  ;;  %v6108_v41 = vcombine.low %v339_v31, %v363_v62  ;;  %v6110_v11 = vcombine.low %v340_v63, %v364_v0  ;;  %v6589_v63 = vcombine.high %v819_v56, %v843_v23 }
 0x5a2   :  { %v6063_v14 = vcombine.high %v292_v10, %v316_v42 }
 0x5a8   :  { %5630 = vmatpush2.bf16.xpose.msra.mxu0 %v6392_v15  ;;  %5671 = vmatpush2.bf16.xpose.msra.mxu1 %v6394_v16  ;;  %v244_v15 = vld [vmem:[#allocation5 + $0x238] sm:$0xff] }
 0x5a9   :  { %5631 = vmatprep.subr.bf16.mxu0 %v6345_v17  ;;  %5672 = vmatprep.subr.bf16.mxu1 %v6347_v19  ;;  %v268_v16 = vld [vmem:[#allocation5 + $0x2f8] sm:$0xff]  ;;  %v6060_v17 = vcombine.low %v291_v7, %v315_v8  ;;  %v6062_v19 = vcombine.low %v292_v10, %v316_v42  ;;  %v6588_v7 = vcombine.low %v819_v56, %v843_v23  ;;  %v5819_v56 = vld [vmem:[%s7033_s3 + $0xe8] sm:$0xff] }
 0x5aa   :  { %v6015_v20 = vcombine.high %v244_v15, %v268_v16  ;;  %v5803_v23 = vld [vmem:[%s7033_s3 + $0x68] sm:$0xff] }
 0x5b0   :  { %5632 = vmatpush2.bf16.xpose.msra.mxu0 %v6344_v24  ;;  %5673 = vmatpush2.bf16.xpose.msra.mxu1 %v6346_v25  ;;  %v196_v24 = vld [vmem:[#allocation5 + $0xb8] sm:$0xff] }
 0x5b1   :  { %5683 = vmatprep.subr.bf16.mxu0 %v6301_v27  ;;  %5724 = vmatprep.subr.bf16.mxu1 %v6303_v60  ;;  %v220_v25 = vld [vmem:[#allocation5 + $0x178] sm:$0xff]  ;;  %v6012_v27 = vcombine.low %v243_v47, %v267_v50  ;;  %v6014_v60 = vcombine.low %v244_v15, %v268_v16 }
 0x5b2   :  { %v5967_v30 = vcombine.high %v196_v24, %v220_v25  ;;  %v5966_v37 = vcombine.low %v196_v24, %v220_v25 }
 0x5b7   :  { %5634 = vmatmul.mubr.bf16.vlgmr.msra.gmra.mxu0 %v165_v4  ;;  %5675 = vmatmul.mubr.bf16.vlgmr.msra.gmra.mxu1 %v167_v6  ;;  %v916_v4 = vld [vmem:[#allocation5 + $0x1738] sm:$0xff]  ;;  %v6685_v6 = vcombine.high %v915_v32, %v939_v1 }
 0x5b8   :  { %5684 = vmatpush1.bf16.xpose.msra.mxu0 %v6300_v9  ;;  %5725 = vmatpush1.bf16.xpose.msra.mxu1 %v6302_v39  ;;  %v6687_v9 = vcombine.high %v916_v4, %v940_v33  ;;  %v891_v39 = vld [vmem:[#allocation5 + $0x1670] sm:$0xff] }
 0x5b9   :  { %5685 = vmatprep.subr.bf16.mxu0 %v6253_v40  ;;  %5726 = vmatprep.subr.bf16.mxu1 %v6255_v43  ;;  %v868_v40 = vld [vmem:[#allocation5 + $0x15b8] sm:$0xff]  ;;  %v6637_v45 = vcombine.high %v867_v38, %v891_v39 }
 0x5ba   :  { %5715 = vmatprep.mubr.bf16.mxu0 %v170_v13  ;;  %5756 = vmatprep.mubr.bf16.mxu1 %v172_v44  ;;  %v892_v43 = vld [vmem:[#allocation5 + $0x1678] sm:$0xff]  ;;  %v6684_v13 = vcombine.low %v915_v32, %v939_v1  ;;  %v6686_v44 = vcombine.low %v916_v4, %v940_v33 }
 0x5bb   :  { %v6639_v46 = vcombine.high %v868_v40, %v892_v43  ;;  %v6638_v62 = vcombine.low %v868_v40, %v892_v43 }
 0x5c0   :  { %5686 = vmatpush1.bf16.xpose.msra.mxu0 %v6252_v51  ;;  %5727 = vmatpush1.bf16.xpose.msra.mxu1 %v6254_v18 }
 0x5c1   :  { %5687 = vmatprep.subr.bf16.mxu0 %v6205_v52  ;;  %5728 = vmatprep.subr.bf16.mxu1 %v6207_v53 }
 0x5c8   :  { %5688 = vmatpush1.bf16.xpose.msra.mxu0 %v6204_v57  ;;  %5729 = vmatpush1.bf16.xpose.msra.mxu1 %v6206_v58  ;;  %v820_v57 = vld [vmem:[#allocation5 + $0x1438] sm:$0xff] }
 0x5c9   :  { %5689 = vmatprep.subr.bf16.mxu0 %v6157_v59  ;;  %5730 = vmatprep.subr.bf16.mxu1 %v6159_v61  ;;  %v844_v58 = vld [vmem:[#allocation5 + $0x14f8] sm:$0xff] }
 0x5ca   :  { %v6590_v8 = vcombine.low %v820_v57, %v844_v58 }
 0x5d0   :  { %5690 = vmatpush1.bf16.xpose.msra.mxu0 %v6156_v2  ;;  %5731 = vmatpush1.bf16.xpose.msra.mxu1 %v6158_v3  ;;  %v6591_v2 = vcombine.high %v820_v57, %v844_v58  ;;  %v795_v3 = vld [vmem:[#allocation5 + $0x1370] sm:$0xff]  ;;  %v5802_v57 = vld [vmem:[%s7033_s3 + $0x60] sm:$0xff]  ;;  %v5817_v58 = vld [vmem:[%s7033_s3 + $0xd8] sm:$0xff] }
 0x5d1   :  { %5691 = vmatprep.subr.bf16.mxu0 %v6109_v5  ;;  %5732 = vmatprep.subr.bf16.mxu1 %v6111_v36  ;;  %v772_v5 = vld [vmem:[#allocation5 + $0x12b8] sm:$0xff] }
 0x5d2   :  { %v796_v36 = vld [vmem:[#allocation5 + $0x1378] sm:$0xff] }
 0x5d3   :  { %v6543_v42 = vcombine.high %v772_v5, %v796_v36  ;;  %v6542_v50 = vcombine.low %v772_v5, %v796_v36  ;;  %v5812_v5 = vld [vmem:[%s7033_s3 + $0xb0] sm:$0xff] }
 0x5d4   :  { %v5796_v36 = vld [vmem:[%s7033_s3 + $0x30] sm:$0xff] }
 0x5d8   :  { %5692 = vmatpush1.bf16.xpose.msra.mxu0 %v6108_v41  ;;  %5733 = vmatpush1.bf16.xpose.msra.mxu1 %v6110_v11  ;;  %v723_v41 = vld [vmem:[#allocation5 + $0x1130] sm:$0xff] }
 0x5d9   :  { %5693 = vmatprep.subr.bf16.mxu0 %v6061_v12  ;;  %5734 = vmatprep.subr.bf16.mxu1 %v6063_v14  ;;  %v747_v11 = vld [vmem:[#allocation5 + $0x11f0] sm:$0xff]  ;;  %v724_v12 = vld [vmem:[#allocation5 + $0x1138] sm:$0xff] }
 0x5da   :  { %v748_v14 = vld [vmem:[#allocation5 + $0x11f8] sm:$0xff]  ;;  %v6493_v15 = vcombine.high %v723_v41, %v747_v11  ;;  %v6492_v21 = vcombine.low %v723_v41, %v747_v11  ;;  %v5795_v41 = vld [vmem:[%s7033_s3 + $0x28] sm:$0xff] }
 0x5db   :  { %v6495_v16 = vcombine.high %v724_v12, %v748_v14  ;;  %v6494_v22 = vcombine.low %v724_v12, %v748_v14  ;;  %v5810_v12 = vld [vmem:[%s7033_s3 + $0xa0] sm:$0xff] }
 0x5e0   :  { %5694 = vmatpush1.bf16.xpose.msra.mxu0 %v6060_v17  ;;  %5735 = vmatpush1.bf16.xpose.msra.mxu1 %v6062_v19  ;;  %v675_v17 = vld [vmem:[#allocation5 + $0xfb0] sm:$0xff] }
 0x5e1   :  { %5695 = vmatprep.subr.bf16.mxu0 %v6013_v55  ;;  %5736 = vmatprep.subr.bf16.mxu1 %v6015_v20  ;;  %v699_v19 = vld [vmem:[#allocation5 + $0x1070] sm:$0xff]  ;;  %v676_v55 = vld [vmem:[#allocation5 + $0xfb8] sm:$0xff] }
 0x5e2   :  { %v700_v20 = vld [vmem:[#allocation5 + $0x1078] sm:$0xff]  ;;  %v6445_v24 = vcombine.high %v675_v17, %v699_v19  ;;  %v6444_v32 = vcombine.low %v675_v17, %v699_v19 }
 0x5e3   :  { %v6447_v25 = vcombine.high %v676_v55, %v700_v20  ;;  %v6446_v1 = vcombine.low %v676_v55, %v700_v20  ;;  %v5793_v55 = vld [vmem:[%s7033_s3 + $0x18] sm:$0xff]  ;;  %v5808_v20 = vld [vmem:[%s7033_s3 + $0x90] sm:$0xff] }
 0x5e8   :  { %5696 = vmatpush1.bf16.xpose.msra.mxu0 %v6012_v27  ;;  %5737 = vmatpush1.bf16.xpose.msra.mxu1 %v6014_v60  ;;  %v627_v27 = vld [vmem:[#allocation5 + $0xe30] sm:$0xff] }
 0x5e9   :  { %5697 = vmatprep.subr.bf16.mxu0 %v5965_v29  ;;  %5738 = vmatprep.subr.bf16.mxu1 %v5967_v30  ;;  %v651_v60 = vld [vmem:[#allocation5 + $0xef0] sm:$0xff]  ;;  %v628_v29 = vld [vmem:[#allocation5 + $0xe38] sm:$0xff] }
 0x5ea   :  { %v652_v30 = vld [vmem:[#allocation5 + $0xef8] sm:$0xff]  ;;  %v6397_v4 = vcombine.high %v627_v27, %v651_v60 }
 0x5eb   :  { %v6399_v33 = vcombine.high %v628_v29, %v652_v30 }
 0x5f0   :  { %5698 = vmatpush1.bf16.xpose.msra.mxu0 %v5964_v34  ;;  %5739 = vmatpush1.bf16.xpose.msra.mxu1 %v5966_v37  ;;  %v579_v34 = vld [vmem:[#allocation5 + $0xcb0] sm:$0xff] }
 0x5f1   :  { %5699 = vmatprep.subr.bf16.mxu0 %v6685_v6  ;;  %5740 = vmatprep.subr.bf16.mxu1 %v6687_v9  ;;  %v603_v37 = vld [vmem:[#allocation5 + $0xd70] sm:$0xff]  ;;  %v580_v6 = vld [vmem:[#allocation5 + $0xcb8] sm:$0xff] }
 0x5f2   :  { %v604_v9 = vld [vmem:[#allocation5 + $0xd78] sm:$0xff]  ;;  %v6349_v40 = vcombine.high %v579_v34, %v603_v37 }
 0x5f3   :  { %v6351_v43 = vcombine.high %v580_v6, %v604_v9 }
 0x5f7   :  { %v5553_v48 = vpop.f32.mrf.mxu0  ;;  %v5594_v51 = vpop.f32.mrf.mxu1 }
 0x5f8   :  { %v5554_v49 = vadd.f32 %v5553_v48, %v6915_v28  ;;  %5700 = vmatpush2.bf16.xpose.msra.mxu0 %v6684_v13  ;;  %5741 = vmatpush2.bf16.xpose.msra.mxu1 %v6686_v44  ;;  %v6636_v28 = vcombine.low %v867_v38, %v891_v39  ;;  %v6396_v38 = vcombine.low %v627_v27, %v651_v60  ;;  %v123_v48 = vld [vmem:[#allocation3 + $0x170] sm:$0xff]  ;;  %v5806_v27 = vld [vmem:[%s7033_s3 + $0x80] sm:$0xff] }
 0x5f9   :  { %v5555_v18 = vpop.f32.mrf.mxu0  ;;  %5701 = vmatprep.subr.bf16.mxu0 %v6637_v45  ;;  %v5596_v54 = vpop.f32.mrf.mxu1  ;;  %5742 = vmatprep.subr.bf16.mxu1 %v6639_v46  ;;  %v6398_v39 = vcombine.low %v628_v29, %v652_v30  ;;  %v6348_v13 = vcombine.low %v579_v34, %v603_v37  ;;  %v6350_v44 = vcombine.low %v580_v6, %v604_v9  ;;  %v5821_v45 = vld [vmem:[%s7033_s3 + $0xf8] sm:$0xff]  ;;  %v121_v46 = vld [vmem:[#allocation3 + $0x160] sm:$0xff]  ;;  %v5776_v29 = vlaneseq }
 0x5fa   :  { %v6921_v52 = vadd.f32 %v5594_v51, %v5554_v49  ;;  %v5556_v53 = vadd.f32 %v5555_v18, %v6918_v35  ;;  %v771_v35 = vld [vmem:[#allocation5 + $0x12b0] sm:$0xff]  ;;  %v169_v49 = vpack.c.bf16 %v121_v46, %v121_v46  ;;  %v171_v51 = vpack.c.bf16 %v123_v48, %v123_v48  ;;  %v5805_v18 = vld [vmem:[%s7033_s3 + $0x78] sm:$0xff]  ;;  %v5790_v60 = vld [vmem:[%s7033_s3] sm:$0xff] }
 0x5fb   :  { %v5557_v26 = vpop.f32.mrf.mxu0  ;;  %v5598_v61 = vpop.f32.mrf.mxu1  ;;  %v6541_v10 = vcombine.high %v771_v35, %v795_v3  ;;  %v6540_v47 = vcombine.low %v771_v35, %v795_v3  ;;  %v5813_v35 = vld [vmem:[%s7033_s3 + $0xb8] sm:$0xff]  ;;  %v5777_v30 = vshrl.u32 %v5776_v29, 7 }
 0x5fc   :  { %v6924_v59 = vadd.f32 %v5596_v54, %v5556_v53  ;;  %v5820_v53 = vld [vmem:[%s7033_s3 + $0xf0] sm:$0xff]  ;;  %v5818_v26 = vld [vmem:[%s7033_s3 + $0xe0] sm:$0xff]  ;;  %v5801_v61 = vld [vmem:[%s7033_s3 + $0x58] sm:$0xff] }
 0x5fd   :  { %v5558_v31 = vpop.f32.mrf.mxu0  ;;  %v5599_v0 = vpop.f32.mrf.mxu1  ;;  %v5804_v54 = vld [vmem:[%s7033_s3 + $0x70] sm:$0xff]  ;;  %v5797_v3 = vld [vmem:[%s7033_s3 + $0x38] sm:$0xff] }
 0x5fe   :  { %v5800_v31 = vld [vmem:[%s7033_s3 + $0x50] sm:$0xff]  ;;  %v5814_v0 = vld [vmem:[%s7033_s3 + $0xc0] sm:$0xff] }
 0x600   :  { %5702 = vmatpush2.bf16.xpose.msra.mxu0 %v6636_v28  ;;  %5743 = vmatpush2.bf16.xpose.msra.mxu1 %v6638_v62  ;;  %v5816_v28 = vld [vmem:[%s7033_s3 + $0xd0] sm:$0xff]  ;;  %v5815_v62 = vld [vmem:[%s7033_s3 + $0xc8] sm:$0xff] }
 0x601   :  { %5703 = vmatprep.subr.bf16.mxu0 %v6589_v63  ;;  %5744 = vmatprep.subr.bf16.mxu1 %v6591_v2  ;;  %v5799_v63 = vld [vmem:[%s7033_s3 + $0x48] sm:$0xff]  ;;  %v5798_v2 = vld [vmem:[%s7033_s3 + $0x40] sm:$0xff] }
 0x608   :  { %5704 = vmatpush2.bf16.xpose.msra.mxu0 %v6588_v7  ;;  %5745 = vmatpush2.bf16.xpose.msra.mxu1 %v6590_v8  ;;  %v5811_v8 = vld [vmem:[%s7033_s3 + $0xa8] sm:$0xff] }
 0x609   :  { %5705 = vmatprep.subr.bf16.mxu0 %v6541_v10  ;;  %5746 = vmatprep.subr.bf16.mxu1 %v6543_v42 }
 0x610   :  { %5706 = vmatpush2.bf16.xpose.msra.mxu0 %v6540_v47  ;;  %5747 = vmatpush2.bf16.xpose.msra.mxu1 %v6542_v50 }
 0x611   :  { %5707 = vmatprep.subr.bf16.mxu0 %v6493_v15  ;;  %5748 = vmatprep.subr.bf16.mxu1 %v6495_v16  ;;  %v5809_v16 = vld [vmem:[%s7033_s3 + $0x98] sm:$0xff] }
 0x618   :  { %5708 = vmatpush2.bf16.xpose.msra.mxu0 %v6492_v21  ;;  %5749 = vmatpush2.bf16.xpose.msra.mxu1 %v6494_v22  ;;  %v5792_v22 = vld [vmem:[%s7033_s3 + $0x10] sm:$0xff] }
 0x619   :  { %5709 = vmatprep.subr.bf16.mxu0 %v6445_v24  ;;  %5750 = vmatprep.subr.bf16.mxu1 %v6447_v25  ;;  %v5807_v24 = vld [vmem:[%s7033_s3 + $0x88] sm:$0xff] }
 0x61a   :  { %v5791_v25 = vld [vmem:[%s7033_s3 + $0x8] sm:$0xff] }
 0x620   :  { %5710 = vmatpush2.bf16.xpose.msra.mxu0 %v6444_v32  ;;  %5751 = vmatpush2.bf16.xpose.msra.mxu1 %v6446_v1  ;;  %v5778_v32 = vsub.s32 0, %v5777_v30  ;;  %v5774_v1 = vld [vmem:[#allocation7] sm:$0x3] }
 0x621   :  { %5711 = vmatprep.subr.bf16.mxu0 %v6397_v4  ;;  %5752 = vmatprep.subr.bf16.mxu1 %v6399_v33  ;;  %v5782_v4 = vsub.s32 1, %v5777_v30 }
 0x622   :  { %v5779_v6 = vrot.slane %v5774_v1, %v5778_v32 }
 0x628   :  { %5712 = vmatpush2.bf16.xpose.msra.mxu0 %v6396_v38  ;;  %5753 = vmatpush2.bf16.xpose.msra.mxu1 %v6398_v39 }
 0x629   :  { %5713 = vmatprep.subr.bf16.mxu0 %v6349_v40  ;;  %5754 = vmatprep.subr.bf16.mxu1 %v6351_v43  ;;  %v5783_v43 = vrot.slane %v5774_v1, %v5782_v4 }
 0x630   :  { %5714 = vmatpush2.bf16.xpose.msra.mxu0 %v6348_v13  ;;  %5755 = vmatpush2.bf16.xpose.msra.mxu1 %v6350_v44 }
 0x631   :  { %6689 = vmatprep.subr.mxu0 %v5821_v45 }
 0x637   :  { %5716 = vmatmul.mubr.bf16.vlgmr.msra.gmra.mxu0 %v169_v49  ;;  %5757 = vmatmul.mubr.bf16.vlgmr.msra.gmra.mxu1 %v171_v51 }
 0x638   :  { %6690 = vmatpush3.msra.mxu0 %v5805_v18 }
 0x639   :  { %6691 = vmatprep.subr.mxu0 %v5820_v53 }
 0x63a   :  { %6692 = vmatpush3.msra.mxu0 %v5804_v54 }
 0x63b   :  { %6693 = vmatprep.subr.mxu0 %v5819_v56 }
 0x63c   :  { %6694 = vmatpush3.msra.mxu0 %v5803_v23  ;;  %v6688_v23 = vld [vmem:[#allocation8] ss:$0 sm:$0xff] }
 0x63d   :  { %6695 = vmatprep.subr.mxu0 %v5818_v26 }
 0x63e   :  { %6696 = vmatpush3.msra.mxu0 %v5802_v57 }
 0x63f   :  { %6697 = vmatprep.subr.mxu0 %v5817_v58 }
 0x640   :  { %6698 = vmatpush3.msra.mxu0 %v5801_v61 }
 0x641   :  { %6699 = vmatprep.subr.mxu0 %v5816_v28 }
 0x642   :  { %6700 = vmatpush3.msra.mxu0 %v5800_v31 }
 0x643   :  { %6701 = vmatprep.subr.mxu0 %v5815_v62 }
 0x644   :  { %6702 = vmatpush3.msra.mxu0 %v5799_v63 }
 0x645   :  { %6703 = vmatprep.subr.mxu0 %v5814_v0 }
 0x646   :  { %6704 = vmatpush3.msra.mxu0 %v5798_v2 }
 0x647   :  { %6705 = vmatprep.subr.mxu0 %v5813_v35 }
 0x648   :  { %6706 = vmatpush3.msra.mxu0 %v5797_v3 }
 0x649   :  { %6707 = vmatprep.subr.mxu0 %v5812_v5 }
 0x64a   :  { %6708 = vmatpush3.msra.mxu0 %v5796_v36 }
 0x64b   :  { %6709 = vmatprep.subr.mxu0 %v5811_v8 }
 0x64c   :  { %6710 = vmatpush3.msra.mxu0 %v5795_v41 }
 0x64d   :  { %6711 = vmatprep.subr.mxu0 %v5810_v12 }
 0x677   :  { %v5635_v7 = vpop.f32.mrf.mxu0  ;;  %v5676_v42 = vpop.f32.mrf.mxu1 }
 0x678   :  { %v5636_v10 = vadd.f32 %v5635_v7, %v6921_v52  ;;  %v5794_v52 = vld [vmem:[%s7033_s3 + $0x20] sm:$0xff] }
 0x679   :  { %v5637_v11 = vpop.f32.mrf.mxu0  ;;  %v5678_v50 = vpop.f32.mrf.mxu1  ;;  %6712 = vmatpush3.msra.mxu0 %v5794_v52 }
 0x67a   :  { %v5677_v14 = vadd.f32 %v5676_v42, %v5636_v10  ;;  %v5638_v47 = vadd.f32 %v5637_v11, %v6924_v59  ;;  %6713 = vmatprep.subr.mxu0 %v5809_v16 }
 0x67b   :  { %v5639_v15 = vpop.f32.mrf.mxu0  ;;  %v5680_v19 = vpop.f32.mrf.mxu1  ;;  %6714 = vmatpush3.msra.mxu0 %v5793_v55 }
 0x67c   :  { %v5679_v17 = vadd.f32 %v5678_v50, %v5638_v47  ;;  %6715 = vmatprep.subr.mxu0 %v5808_v20 }
 0x67d   :  { %v5640_v59 = vpop.f32.mrf.mxu0  ;;  %v5681_v21 = vpop.f32.mrf.mxu1  ;;  %6716 = vmatpush3.msra.mxu0 %v5792_v22 }
 0x67e   :  { %6717 = vmatprep.subr.mxu0 %v5807_v24 }
 0x67f   :  { %6718 = vmatpush3.msra.mxu0 %v5791_v25 }
 0x680   :  { %6719 = vmatprep.subr.mxu0 %v5806_v27 }
 0x681   :  { %6720 = vmatpush3.msra.mxu0 %v5790_v60 }
 0x6f7   :  { %v5717_v33 = vpop.f32.mrf.mxu0  ;;  %v5758_v37 = vpop.f32.mrf.mxu1 }
 0x6f8   :  { %v5718_v34 = vadd.f32 %v5717_v33, %v5677_v14 }
 0x6f9   :  { %v5719_v9 = vpop.f32.mrf.mxu0  ;;  %v5760_v40 = vpop.f32.mrf.mxu1 }
 0x6fa   :  { %v5759_v38 = vadd.f32 %v5758_v37, %v5718_v34  ;;  %v5720_v39 = vadd.f32 %v5719_v9, %v5679_v17 }
 0x6fb   :  { %v5721_v13 = vpop.f32.mrf.mxu0  ;;  %v5762_v45 = vpop.f32.mrf.mxu1 }
 0x6fc   :  { %v5761_v44 = vadd.f32 %v5760_v40, %v5720_v39  ;;  %v5786_v46 = vadd.f32 %v5779_v6, %v5759_v38 }
 0x6fd   :  { %v5722_v48 = vpop.f32.mrf.mxu0  ;;  %v5763_v51 = vpop.f32.mrf.mxu1 }
 0x6fe   :  { %v5787_v49 = vadd.f32 %v5783_v43, %v5761_v44  ;;  %v5788_v53 = vmax.f32 %v5786_v46, 0.0 }
 0x700   :  { %v5789_v18 = vmax.f32 %v5787_v49, 0.0 }
 0x702   :  { %5893 = vmatprep.mubr.f32.mxu0 %v5789_v18 }
 0x703   :  { %5894 = vmatmul.mubr.f32.vlgmr.msra.gmra.mxu0 %v5788_v53 }
 0x7c3   :  { %v6721_v54 = vpop.f32.mrf.mxu0 }
 0x7c5   :  { %v6722_v56 = vpop.f32.mrf.mxu0 }
 0x7c6   :  { %v6723_v26 = vadd.f32 %v6722_v56, %v6721_v54 }
 0x7c8   :  { %v5896_v57 = vadd.f32 %v6723_v26, %v6688_v23 }
 0x7ca   :  { %v5900_v58 = vsel %vm5899_vm0, %v5896_v57, -inf }
 0x7cb   :  { %5901 = vmax.xlane.f32.xlu0 %v5900_v58 }
 0x854   :  { %v5902_v61 = vpop.xlane.xlu0 %5901 }
 0x855   :  { %v5903_v28 = vsub.f32 %v5896_v57, %v5902_v61 }
 0x857   :  { %v5904_v31 = vmul.f32 1.442695, %v5903_v28 }
 0x859   :  { %6730 = vpow2.f32 %v5904_v31 }
 0x866   :  { %v6731_v62 = vpop.eup %6730 }
 0x867   :  { %v5906_v63 = vsel %vm5899_vm0, %v6731_v62, 0.0 }
 0x868   :  { %5907 = vadd.xlane.f32.xlu0 %v5906_v63 }
 0x8f1   :  { %v5908_v0 = vpop.xlane.xlu0 %5907 }
 0x8f2   :  { %6732 = vlog2.f32 %v5908_v0 }
 0x8ff   :  { %v6733_v2 = vpop.eup %6732 }
 0x900   :  { %v5910_v35 = vmul.f32 0.6931472, %v6733_v2 }
 0x902   :  { %v5911_v3 = vsub.f32 %v5903_v28, %v5910_v35 }
 0x904   :  { %5912 = vst.msk [vmem:[%s7035_s5] sm:$0xff] %vm5899_vm0, %v5911_v3 }
 0x905   :  { %5917 = vsyncpa [#allocation4], 1 }
 0x906   :  { %5918 = vsyncpa [#allocation6], 1 }
 0x907   :  { %5919 = vsyncpa [#allocation9], 1 }

</bundles_post_ra>
